<compile_context>
chip_gen: v7x
topology: tpu7x:2x2x1
jax: 0.10.0
libtpu: 0.0.40
codegen_flags: <defaults>
</compile_context>

<pallas_src>
import numpy as np
import jax
import jax.numpy as jnp
from jax.experimental import pallas as pl
from jax.experimental.pallas import tpu as pltpu


def _attn_pool_kernel(case_ref, lens_ref, wvu_ref, bvu_ref, wa_ref, ba_ref,
                      wm_ref, bm_ref, out_ref, att_ref):
    GB = lens_ref.shape[0]            # bags per block
    H, D = wa_ref.shape               # heads, lane-padded gate dim
    M = att_ref.shape[1] // H         # padded instances per bag
    E = case_ref.shape[1]             # lane-padded feature dim

    flat = case_ref[...]                                              # (GB*M, E)

    # Fused gated-attention projection: one MXU matmul over every instance of every bag
    # (weights shared across bags).  Slices are tile-aligned because D is 128-padded.
    vu = (jnp.dot(flat, wvu_ref[...], preferred_element_type=jnp.float32)
          + bvu_ref[...])                                             # (GB*M, 2D) f32
    gated = jnp.tanh(vu[:, :D]) * jax.nn.sigmoid(vu[:, D:])           # (GB*M, D)

    lens = lens_ref[...]                                              # (GB, 1) int32

    if H == 1:
        # Score = <gated, wa> per instance: VPU multiply + lane (XLU) reduce.  Keeps the
        # MXU free and lands directly in a lane-dense (GB, M) layout (instances on lanes).
        scores = jnp.sum(gated.reshape(GB, M, D) * wa_ref[...].reshape(1, 1, D),
                         axis=-1) + ba_ref[...]                       # (GB, M)
        pos = jax.lax.broadcasted_iota(jnp.int32, (GB, M), 1)
        masked = jnp.where(pos < lens, scores, -jnp.inf)
        mx = jnp.maximum(jnp.max(masked, axis=-1, keepdims=True), -1e30)  # all-pad guard
        e = jnp.exp(masked - mx)
        ssum = jnp.maximum(jnp.sum(e, axis=-1, keepdims=True), 1e-30)
        att = jnp.maximum(e / ssum, 1e-5)                             # (GB, M)
        att_ref[...] = att                                            # lane-dense store
        att3 = att[:, :, None]                                        # (GB, M, 1)
    else:
        # General multi-head fallback (H is small); kept simple rather than lane-optimal.
        s2 = (jax.lax.dot_general(gated, wa_ref[...], (((1,), (1,)), ((), ())),
                                  preferred_element_type=jnp.float32)
              + ba_ref[...]).reshape(GB, M, H)
        pos = jax.lax.broadcasted_iota(jnp.int32, (GB, M, 1), 1)
        masked = jnp.where(pos < lens.reshape(GB, 1, 1), s2, -jnp.inf)
        mx = jnp.maximum(jnp.max(masked, axis=1, keepdims=True), -1e30)
        e = jnp.exp(masked - mx)
        ssum = jnp.maximum(jnp.sum(e, axis=1, keepdims=True), 1e-30)
        att3 = jnp.maximum(e / ssum, 1e-5)                            # (GB, M, H)
        att_ref[...] = att3.reshape(GB, M * H)

    # Pool-first (VPU multiply + sublane reduce), then ONE mapper matmul for the block:
    #   pooled[g, h*E + e] = sum_m att[g, m, h] * case[g, m, e]
    # Padded rows contribute 0 because their case rows are exactly zero.
    case3 = flat.reshape(GB, M, E)
    parts = [jnp.sum(att3[:, :, h:h + 1] * case3, axis=1) for h in range(H)]  # (GB, E)
    pooled = parts[0] if H == 1 else jnp.concatenate(parts, axis=-1)          # (GB, H*E)
    out_ref[...] = (jnp.dot(pooled.astype(wm_ref.dtype), wm_ref[...],
                            preferred_element_type=jnp.float32) + bm_ref[...])


def _pallas_attention_pool(case2, lens, wvu, bvu, wa, ba, wm2, bm, *,
                           bag_block, m_pad, num_heads):
    G_pad = lens.shape[0]
    E_pad = case2.shape[1]
    D2 = wvu.shape[1]
    H = num_heads
    EP = wm2.shape[1]
    gb, M = bag_block, m_pad

    out, att = pl.pallas_call(
        _attn_pool_kernel,
        out_shape=(
            jax.ShapeDtypeStruct((G_pad, EP), jnp.float32),        # pooled+mapped (lane-padded)
            jax.ShapeDtypeStruct((G_pad, M * H), jnp.float32),     # clamped att, lane-dense
        ),
        grid_spec=pltpu.PrefetchScalarGridSpec(
            num_scalar_prefetch=0,
            grid=(G_pad // gb,),
            in_specs=[
                pl.BlockSpec((gb * M, E_pad), lambda g: (g, 0)),   # bag-block instances, flat
                pl.BlockSpec((gb, 1), lambda g: (g, 0)),           # per-bag valid lengths
                pl.BlockSpec((E_pad, D2), lambda g: (0, 0)),       # fused [Wv | Wu]^T
                pl.BlockSpec((1, D2), lambda g: (0, 0)),           # fused [bv | bu]
                pl.BlockSpec((H, D2 // 2), lambda g: (0, 0)),      # Wa (head-major rows)
                pl.BlockSpec((1, H), lambda g: (0, 0)),            # ba
                pl.BlockSpec((H * E_pad, EP), lambda g: (0, 0)),   # mapper weight (head-major)
                pl.BlockSpec((1, EP), lambda g: (0, 0)),           # bm
            ],
            out_specs=[
                pl.BlockSpec((gb, EP), lambda g: (g, 0)),
                pl.BlockSpec((gb, M * H), lambda g: (g, 0)),
            ],
        ),
        compiler_params=pltpu.CompilerParams(
            dimension_semantics=("parallel",),       # bags independent -> megacore-shardable
            vmem_limit_bytes=32 * 1024 * 1024,       # explicit budget, safe on v7x's 64 MiB
        ),
    )(case2, lens, wvu, bvu, wa, ba, wm2, bm)
    return out, att


def attention_pooling_reducer(x, supercase_indices, params, num_heads=1,
                              bag_block=None, compute_dtype=jnp.float32):
    """Forward pass matching the PyTorch AttentionPoolingReducer semantics (gated=True)."""
    x_np = np.asarray(x, np.float32)
    sup = np.asarray(supercase_indices)
    _, E = x_np.shape
    H = num_heads
    D = np.asarray(params["wv_t"]).shape[1]

    uniq = np.unique(sup)                          # torch .unique() -> sorted
    groups = [np.where(sup == u)[0] for u in uniq]
    G = len(groups)
    M = max(len(g) for g in groups)
    M_pad = ((M + 15) // 16) * 16                  # sublane / bf16-pack aligned instances

    if bag_block is None:
        # Target ~512 instance rows per grid step (amortizes ~0.35us/step overhead and
        # fills MXU rows) while keeping the VMEM footprint small enough for v7x.
        bag_block = max(8, min(256, ((-(-512 // M_pad)) + 7) // 8 * 8))
    gb = max(8, (int(bag_block) + 7) // 8 * 8)
    G_pad = ((G + gb - 1) // gb) * gb

    # Lane-pad feature / gate / mapper dims to 128 (zero-padded weights keep math exact).
    E_pad = ((E + 127) // 128) * 128
    D_pad = ((D + 127) // 128) * 128
    EP = E_pad

    # Host-side padded bag layout.  Padded rows are exactly zero, so their 1e-5-clamped
    # attention contributes exactly 0 to the pooled vector.
    # TODO(synk): replace host padding with scalar-prefetched offsets + a data-dependent
    # index_map gather straight from x to avoid the padded copy / HBM inflation.
    case_pad = np.zeros((G_pad, M_pad, E_pad), np.float32)
    lens = np.zeros((G_pad, 1), np.int32)
    for gi, idxs in enumerate(groups):
        case_pad[gi, :len(idxs), :E] = x_np[idxs]
        lens[gi, 0] = len(idxs)

    # Fused [Wv | Wu] projection, lane-padded.
    wvu = np.zeros((E_pad, 2 * D_pad), np.float32)
    wvu[:E, :D] = np.asarray(params["wv_t"], np.float32)
    wvu[:E, D_pad:D_pad + D] = np.asarray(params["wu_t"], np.float32)
    bvu = np.zeros((1, 2 * D_pad), np.float32)
    bvu[0, :D] = np.asarray(params["bv"], np.float32).reshape(-1)
    bvu[0, D_pad:D_pad + D] = np.asarray(params["bu"], np.float32).reshape(-1)

    wa = np.zeros((H, D_pad), np.float32)          # head-major rows for the VPU score path
    wa[:, :D] = np.asarray(params["wa_t"], np.float32).T
    ba = np.asarray(params["ba"], np.float32).reshape(1, H)

    # Mapper weight with head-major, lane-padded rows matching pooled's (h, e) layout.
    wm2 = np.zeros((H * E_pad, EP), np.float32)
    wm_src = np.asarray(params["wm_t"], np.float32).reshape(H, E, E)
    for h in range(H):
        wm2[h * E_pad:h * E_pad + E, :E] = wm_src[h]
    bm = np.zeros((1, EP), np.float32)
    bm[0, :E] = np.asarray(params["bm"], np.float32).reshape(-1)

    out, att = _pallas_attention_pool(
        jnp.asarray(case_pad.reshape(G_pad * M_pad, E_pad), compute_dtype),
        jnp.asarray(lens),
        jnp.asarray(wvu, compute_dtype), jnp.asarray(bvu),
        jnp.asarray(wa), jnp.asarray(ba),
        jnp.asarray(wm2, compute_dtype), jnp.asarray(bm),
        bag_block=gb, m_pad=M_pad, num_heads=H)

    outs = out[:G, :E]

    # Gather reproducing torch's per-bag att.T.view(-1, H) (head-outer, instance-inner)
    # ordering from the lane-dense (G_pad, M_pad*H) attention slab.
    idx_chunks = []
    for gi, idxs in enumerate(groups):
        n = len(idxs)
        h_idx = np.repeat(np.arange(H), n)
        m_idx = np.tile(np.arange(n), H)
        idx_chunks.append(gi * (M_pad * H) + m_idx * H + h_idx)
    gather_idx = jnp.asarray(np.concatenate(idx_chunks).astype(np.int32))
    weights = att.reshape(-1)[gather_idx].reshape(-1, H)
    return outs, weights


def reference_forward(x, supercase_indices, params, num_heads=1):
    """Pure-JAX reference mirroring the PyTorch module (gated=True)."""
    sup = np.asarray(supercase_indices)
    outs, ws = [], []
    for u in np.unique(sup):
        idxs = np.where(sup == u)[0]
        case = x[idxs]                                              # (n, E)
        v = jnp.tanh(case @ params["wv_t"] + params["bv"])
        g = jax.nn.sigmoid(case @ params["wu_t"] + params["bu"])
        att = (v * g) @ params["wa_t"] + params["ba"]               # (n, H)
        att = att.T                                                 # (H, n)
        att = jax.nn.softmax(att, axis=1)
        att = jnp.maximum(att, 1e-5)
        pooled = (att @ case).reshape(1, -1)                        # (1, H*E)
        outs.append(pooled @ params["wm_t"] + params["bm"])
        ws.append(att.reshape(-1, num_heads))
    return (jnp.concatenate(outs).reshape(-1, x.shape[1]),
            jnp.concatenate(ws).reshape(-1, num_heads))


if __name__ == "__main__":
    E, H = 48, 1          # embedding_dim, num_heads
    D = E // 3
    N = 12

    key = jax.random.PRNGKey(0)
    (kx, kwv, kbv, kwu, kbu, kwa, kba, kwm, kbm) = jax.random.split(key, 9)

    x = jax.random.normal(kx, (N, E), jnp.float32)
    supercase_indices = np.array([0, 0, 0, 0, 1, 1, 1, 2, 2, 2, 2, 2], np.int32)

    # Deterministic synthetic parameters (stored pre-transposed as (in, out)).
    params = {
        "wv_t": 0.1 * jax.random.normal(kwv, (E, D), jnp.float32),
        "bv":   0.1 * jax.random.normal(kbv, (1, D), jnp.float32),
        "wu_t": 0.1 * jax.random.normal(kwu, (E, D), jnp.float32),
        "bu":   0.1 * jax.random.normal(kbu, (1, D), jnp.float32),
        "wa_t": 0.1 * jax.random.normal(kwa, (D, H), jnp.float32),
        "ba":   0.1 * jax.random.normal(kba, (1, H), jnp.float32),
        "wm_t": 0.1 * jax.random.normal(kwm, (H * E, E), jnp.float32),
        "bm":   0.1 * jax.random.normal(kbm, (1, E), jnp.float32),
    }

    ref_outs, ref_weights = reference_forward(x, supercase_indices, params, H)

    # f32 path (tight correctness check).
    outs, weights = attention_pooling_reducer(x, supercase_indices, params, H)
    outs, weights = jax.block_until_ready((outs, weights))
    assert outs.shape == (3, E) and weights.shape == (N, H)
    np.testing.assert_allclose(np.asarray(outs), np.asarray(ref_outs),
                               rtol=1e-4, atol=1e-4)
    np.testing.assert_allclose(np.asarray(weights), np.asarray(ref_weights),
                               rtol=1e-4, atol=1e-4)

    # bf16 input/weight path (v6e/v7x MXU-native inputs, f32 accumulation) - loose tolerance.
    outs16, weights16 = attention_pooling_reducer(
        x, supercase_indices, params, H, compute_dtype=jnp.bfloat16)
    outs16, weights16 = jax.block_until_ready((outs16, weights16))
    np.testing.assert_allclose(np.asarray(outs16), np.asarray(ref_outs),
                               rtol=5e-2, atol=5e-2)
    np.testing.assert_allclose(np.asarray(weights16), np.asarray(ref_weights),
                               rtol=5e-2, atol=5e-2)

    print("KERNEL_OK")
</pallas_src>

<mosaic_0001>
module attributes {stable_mosaic.version = 11 : i64} {
  func.func @_attn_pool_kernel(%arg0: i32, %arg1: memref<512x128xf32, #tpu.memory_space<vmem>>, %arg2: memref<32x1xi32, #tpu.memory_space<vmem>>, %arg3: memref<128x256xf32, #tpu.memory_space<vmem>>, %arg4: memref<1x256xf32, #tpu.memory_space<vmem>>, %arg5: memref<1x128xf32, #tpu.memory_space<vmem>>, %arg6: memref<1x1xf32, #tpu.memory_space<vmem>>, %arg7: memref<128x128xf32, #tpu.memory_space<vmem>>, %arg8: memref<1x128xf32, #tpu.memory_space<vmem>>, %arg9: memref<32x128xf32, #tpu.memory_space<vmem>>, %arg10: memref<32x16xf32, #tpu.memory_space<vmem>>) attributes {dimension_semantics = [#tpu.dimension_semantics<parallel>], iteration_bounds = array<i64: 1>, scalar_prefetch = 0 : i64, scratch_operands = 0 : i64, tpu.core_type = #tpu.core_type<tc>, window_params = [{transform_indices = @transform_0, window_bounds = array<i64: 512, 128>}, {transform_indices = @transform_1, window_bounds = array<i64: 32, 1>}, {pipeline_mode = #tpu.pipeline_mode<synchronous>, transform_indices = @transform_2, window_bounds = array<i64: 128, 256>}, {pipeline_mode = #tpu.pipeline_mode<synchronous>, transform_indices = @transform_3, window_bounds = array<i64: 1, 256>}, {pipeline_mode = #tpu.pipeline_mode<synchronous>, transform_indices = @transform_4, window_bounds = array<i64: 1, 128>}, {pipeline_mode = #tpu.pipeline_mode<synchronous>, transform_indices = @transform_5, window_bounds = array<i64: 1, 1>}, {pipeline_mode = #tpu.pipeline_mode<synchronous>, transform_indices = @transform_6, window_bounds = array<i64: 128, 128>}, {pipeline_mode = #tpu.pipeline_mode<synchronous>, transform_indices = @transform_7, window_bounds = array<i64: 1, 128>}, {transform_indices = @transform_8, window_bounds = array<i64: 32, 128>}, {transform_indices = @transform_9, window_bounds = array<i64: 32, 16>}]} {
    %c0 = arith.constant 0 : index
    %c0_0 = arith.constant 0 : index
    %0 = vector.load %arg1[%c0, %c0_0] : memref<512x128xf32, #tpu.memory_space<vmem>>, vector<512x128xf32>
    %c0_1 = arith.constant 0 : index
    %c0_2 = arith.constant 0 : index
    %1 = vector.load %arg3[%c0_1, %c0_2] : memref<128x256xf32, #tpu.memory_space<vmem>>, vector<128x256xf32>
    %cst = arith.constant dense<0.000000e+00> : vector<512x256xf32>
    %2 = tpu.matmul %0, %1, %cst {dimension_numbers = #tpu.dot_dimension_numbers<[1], [0], [0], [1], [0, 0, 1, 1], [], []>} : vector<512x128xf32>, vector<128x256xf32>, vector<512x256xf32> -> vector<512x256xf32>
    %c0_3 = arith.constant 0 : index
    %c0_4 = arith.constant 0 : index
    %3 = vector.load %arg4[%c0_3, %c0_4] : memref<1x256xf32, #tpu.memory_space<vmem>>, vector<1x256xf32>
    %4 = vector.broadcast %3 : vector<1x256xf32> to vector<512x256xf32>
    %5 = arith.addf %2, %4 : vector<512x256xf32>
    %6 = vector.extract_strided_slice %5 {offsets = [0, 0], sizes = [512, 128], strides = [1, 1]} : vector<512x256xf32> to vector<512x128xf32>
    %7 = math.tanh %6 : vector<512x128xf32>
    %8 = vector.extract_strided_slice %5 {offsets = [0, 128], sizes = [512, 128], strides = [1, 1]} : vector<512x256xf32> to vector<512x128xf32>
    %9 = arith.negf %8 : vector<512x128xf32>
    %10 = math.exp %9 : vector<512x128xf32>
    %cst_5 = arith.constant 1.000000e+00 : f32
    %11 = vector.broadcast %cst_5 : f32 to vector<512x128xf32>
    %12 = arith.addf %11, %10 : vector<512x128xf32>
    %13 = arith.divf %11, %12 : vector<512x128xf32>
    %14 = arith.mulf %7, %13 : vector<512x128xf32>
    %c0_6 = arith.constant 0 : index
    %c0_7 = arith.constant 0 : index
    %15 = vector.load %arg2[%c0_6, %c0_7] : memref<32x1xi32, #tpu.memory_space<vmem>>, vector<32x1xi32>
    %16 = vector.shape_cast %14 : vector<512x128xf32> to vector<32x16x128xf32>
    %c0_8 = arith.constant 0 : index
    %c0_9 = arith.constant 0 : index
    %17 = vector.load %arg5[%c0_8, %c0_9] : memref<1x128xf32, #tpu.memory_space<vmem>>, vector<1x128xf32>
    %18 = vector.shape_cast %17 : vector<1x128xf32> to vector<1x1x128xf32>
    %19 = vector.broadcast %18 : vector<1x1x128xf32> to vector<32x16x128xf32>
    %20 = arith.mulf %16, %19 : vector<32x16x128xf32>
    %cst_10 = arith.constant dense<0.000000e+00> : vector<32x16xf32>
    %21 = vector.multi_reduction <add>, %20, %cst_10 [2] : vector<32x16x128xf32> to vector<32x16xf32>
    %c0_11 = arith.constant 0 : index
    %c0_12 = arith.constant 0 : index
    %22 = vector.load %arg6[%c0_11, %c0_12] : memref<1x1xf32, #tpu.memory_space<vmem>>, vector<1x1xf32>
    %23 = vector.broadcast %22 : vector<1x1xf32> to vector<32x16xf32>
    %24 = arith.addf %21, %23 : vector<32x16xf32>
    %25 = tpu.iota {dimensions = array<i32: 1>} : vector<32x16xi32>
    %26 = vector.broadcast %15 : vector<32x1xi32> to vector<32x16xi32>
    %27 = arith.cmpi slt, %25, %26 : vector<32x16xi32>
    %cst_13 = arith.constant 0xFF800000 : f32
    %28 = vector.broadcast %cst_13 : f32 to vector<32x16xf32>
    %29 = arith.select %27, %24, %28 : vector<32x16xi1>, vector<32x16xf32>
    %cst_14 = arith.constant dense<0xFF800000> : vector<32xf32>
    %30 = vector.multi_reduction <maximumf>, %29, %cst_14 [1] : vector<32x16xf32> to vector<32xf32>
    %31 = vector.shape_cast %30 : vector<32xf32> to vector<32x1xf32>
    %cst_15 = arith.constant -1.000000e+30 : f32
    %32 = vector.broadcast %cst_15 : f32 to vector<32x1xf32>
    %33 = arith.maximumf %31, %32 : vector<32x1xf32>
    %34 = vector.broadcast %33 : vector<32x1xf32> to vector<32x16xf32>
    %35 = arith.subf %29, %34 : vector<32x16xf32>
    %36 = math.exp %35 : vector<32x16xf32>
    %cst_16 = arith.constant dense<0.000000e+00> : vector<32xf32>
    %37 = vector.multi_reduction <add>, %36, %cst_16 [1] : vector<32x16xf32> to vector<32xf32>
    %38 = vector.shape_cast %37 : vector<32xf32> to vector<32x1xf32>
    %cst_17 = arith.constant 1.000000e-30 : f32
    %39 = vector.broadcast %cst_17 : f32 to vector<32x1xf32>
    %40 = arith.maximumf %38, %39 : vector<32x1xf32>
    %41 = vector.broadcast %40 : vector<32x1xf32> to vector<32x16xf32>
    %42 = arith.divf %36, %41 : vector<32x16xf32>
    %cst_18 = arith.constant 9.99999974E-6 : f32
    %43 = vector.broadcast %cst_18 : f32 to vector<32x16xf32>
    %44 = arith.maximumf %42, %43 : vector<32x16xf32>
    %c0_19 = arith.constant 0 : index
    %c0_20 = arith.constant 0 : index
    %45 = vector.load %arg10[%c0_19, %c0_20] : memref<32x16xf32, #tpu.memory_space<vmem>>, vector<32x16xf32>
    tpu.vector_store %arg10[%c0_19, %c0_20], %44 {strides = array<i32>} : memref<32x16xf32, #tpu.memory_space<vmem>>, vector<32x16xf32>,
    %46 = vector.shape_cast %44 : vector<32x16xf32> to vector<32x16x1xf32>
    %47 = vector.shape_cast %0 : vector<512x128xf32> to vector<32x16x128xf32>
    %48 = vector.broadcast %46 : vector<32x16x1xf32> to vector<32x16x128xf32>
    %49 = arith.mulf %48, %47 : vector<32x16x128xf32>
    %cst_21 = arith.constant dense<0.000000e+00> : vector<32x128xf32>
    %50 = vector.multi_reduction <add>, %49, %cst_21 [1] : vector<32x16x128xf32> to vector<32x128xf32>
    %c0_22 = arith.constant 0 : index
    %c0_23 = arith.constant 0 : index
    %51 = vector.load %arg7[%c0_22, %c0_23] : memref<128x128xf32, #tpu.memory_space<vmem>>, vector<128x128xf32>
    %cst_24 = arith.constant dense<0.000000e+00> : vector<32x128xf32>
    %52 = tpu.matmul %50, %51, %cst_24 {dimension_numbers = #tpu.dot_dimension_numbers<[1], [0], [0], [1], [0, 0, 1, 1], [], []>} : vector<32x128xf32>, vector<128x128xf32>, vector<32x128xf32> -> vector<32x128xf32>
    %c0_25 = arith.constant 0 : index
    %c0_26 = arith.constant 0 : index
    %53 = vector.load %arg8[%c0_25, %c0_26] : memref<1x128xf32, #tpu.memory_space<vmem>>, vector<1x128xf32>
    %54 = vector.broadcast %53 : vector<1x128xf32> to vector<32x128xf32>
    %55 = arith.addf %52, %54 : vector<32x128xf32>
    %c0_27 = arith.constant 0 : index
    %c0_28 = arith.constant 0 : index
    %56 = vector.load %arg9[%c0_27, %c0_28] : memref<32x128xf32, #tpu.memory_space<vmem>>, vector<32x128xf32>
    tpu.vector_store %arg9[%c0_27, %c0_28], %55 {strides = array<i32>} : memref<32x128xf32, #tpu.memory_space<vmem>>, vector<32x128xf32>,
    return
  }
  func.func @transform_0(%arg0: i32) -> (i32, i32) {
    %c0_i32 = arith.constant 0 : i32
    %c0_i32_0 = arith.constant 0 : i32
    return %arg0, %c0_i32 : i32, i32
  }
  func.func @transform_1(%arg0: i32) -> (i32, i32) {
    %c0_i32 = arith.constant 0 : i32
    %c0_i32_0 = arith.constant 0 : i32
    return %arg0, %c0_i32 : i32, i32
  }
  func.func @transform_2(%arg0: i32) -> (i32, i32) {
    %c0_i32 = arith.constant 0 : i32
    %c0_i32_0 = arith.constant 0 : i32
    %c0_i32_1 = arith.constant 0 : i32
    return %c0_i32, %c0_i32_0 : i32, i32
  }
  func.func @transform_3(%arg0: i32) -> (i32, i32) {
    %c0_i32 = arith.constant 0 : i32
    %c0_i32_0 = arith.constant 0 : i32
    %c0_i32_1 = arith.constant 0 : i32
    return %c0_i32, %c0_i32_0 : i32, i32
  }
  func.func @transform_4(%arg0: i32) -> (i32, i32) {
    %c0_i32 = arith.constant 0 : i32
    %c0_i32_0 = arith.constant 0 : i32
    %c0_i32_1 = arith.constant 0 : i32
    return %c0_i32, %c0_i32_0 : i32, i32
  }
  func.func @transform_5(%arg0: i32) -> (i32, i32) {
    %c0_i32 = arith.constant 0 : i32
    %c0_i32_0 = arith.constant 0 : i32
    %c0_i32_1 = arith.constant 0 : i32
    return %c0_i32, %c0_i32_0 : i32, i32
  }
  func.func @transform_6(%arg0: i32) -> (i32, i32) {
    %c0_i32 = arith.constant 0 : i32
    %c0_i32_0 = arith.constant 0 : i32
    %c0_i32_1 = arith.constant 0 : i32
    return %c0_i32, %c0_i32_0 : i32, i32
  }
  func.func @transform_7(%arg0: i32) -> (i32, i32) {
    %c0_i32 = arith.constant 0 : i32
    %c0_i32_0 = arith.constant 0 : i32
    %c0_i32_1 = arith.constant 0 : i32
    return %c0_i32, %c0_i32_0 : i32, i32
  }
  func.func @transform_8(%arg0: i32) -> (i32, i32) {
    %c0_i32 = arith.constant 0 : i32
    %c0_i32_0 = arith.constant 0 : i32
    return %arg0, %c0_i32 : i32, i32
  }
  func.func @transform_9(%arg0: i32) -> (i32, i32) {
    %c0_i32 = arith.constant 0 : i32
    %c0_i32_0 = arith.constant 0 : i32
    return %arg0, %c0_i32 : i32, i32
  }
}

</mosaic_0001>

<bundles_post_ra>
// kernel: tpu_custom_call.1
= control target key start
LH: loop header
LB: loop body
LE: loop exit
PB: predicated region body
PF: predicated region fallthrough
CT: control target
= control target key end

     0   :  { %s4733_s0 = inlined_call_operand.hbm [shape: f32[512,128], index: 0, kind: input, shape index: {}]   ;;  %s4734_s1 = inlined_call_operand.vmem [shape: s32[32,1], index: 1, kind: input, shape index: {}]   ;;  %s4735_s2 = inlined_call_operand.hbm [shape: f32[128,256], index: 2, kind: input, shape index: {}]   ;;  %s4736_s3 = inlined_call_operand.vmem [shape: f32[1,256], index: 3, kind: input, shape index: {}]   ;;  %s4737_s4 = inlined_call_operand.vmem [shape: f32[1,128], index: 4, kind: input, shape index: {}]   ;;  %s4738_s5 = inlined_call_operand.<no memory space> [shape: f32[1,1], index: 5, kind: input, shape index: {}]   ;;  %s4739_s6 = inlined_call_operand.hbm [shape: f32[128,128], index: 6, kind: input, shape index: {}]   ;;  %s4740_s7 = inlined_call_operand.vmem [shape: f32[1,128], index: 7, kind: input, shape index: {}]   ;;  %s4741_s8 = inlined_call_operand.hbm [shape: f32[32,128], index: 8, kind: output, shape index: {0}]   ;;  %s4742_s9 = inlined_call_operand.vmem [shape: f32[32,16], index: 9, kind: output, shape index: {1}]  }
   0x1   :  { %v15_v0 = vstv %s4738_s5 }
   0x2   :  { %16 = vst [vmem:[#allocation2] sm:$0x1] %v15_v0 }
   0x3   :  { %17 = vsyncpa [#allocation4], 0 }
   0x4   :  { %18 = vsyncpa [#allocation7], 0 }
   0x5   :  { %19 = vsyncpa [#allocation5], 0  ;;  %s3511_s11 = smov [#allocation6]   ;;  %s3417_s15 = scalar_lea.hbm %s4735_s2, 4096 }
   0x6   :  { %s39_s12 = sshll.u32 %s3511_s11, 4  ;;  %p3418_p0 = scmp.ne.s32.totalorder %s4735_s2, %s3417_s15  ;;  %s40_s12 = int_to_ptr.vmem [resolvable:$true] %s39_s12 }
   0x7   :  { %p3421_p1 = scmp.lt.u32.totalorder %s3417_s15, %s4735_s2 }
   0x9   :  { %p3423_p2 = pnand %p3421_p1, %p3418_p0 }
   0xb   :  { %3426 = shalt.err (!%p3423_p2)
}
   0xc   :  { %s3427_s5 = scalar_lea.vmem %s40_s12, 4096  ;;  %p3432_p4 = scmp.lt.s32.totalorder %s40_s12, %s40_s12 }
   0xd   :  { %p3428_p3 = scmp.ne.s32.totalorder %s40_s12, %s3427_s5  ;;  %p3433_p5 = scmp.lt.s32.totalorder %s3427_s5, %s3427_s5 }
   0xf   :  { %p3434_p6 = por %p3433_p5, %p3432_p4 }
  0x11   :  { %p3435_p7 = pnand %p3434_p6, %p3428_p3 }
  0x13   :  { %3438 = shalt.err (!%p3435_p7)
}
  0x14   :  { %s3512_s20 = smov 256   ;;  %s3513_s21 = smov 16  }
  0x15   :  { %45 = dma.hbm_to_vmem [thread:$0]  %s4735_s2, 4096, %s40_s12, [#allocation7], %s3512_s20, %s3512_s20, %s3513_s21  }
  0x16   :  { %s3514_s24 = smov [#allocation3]   ;;  %s3439_s28 = scalar_lea.hbm %s4733_s0, 8192 }
  0x17   :  { %s25_s25 = sshll.u32 %s3514_s24, 4  ;;  %p3440_p8 = scmp.ne.s32.totalorder %s4733_s0, %s3439_s28  ;;  %s26_s25 = int_to_ptr.vmem [resolvable:$true] %s25_s25 }
  0x18   :  { %p3443_p9 = scmp.lt.u32.totalorder %s3439_s28, %s4733_s0 }
  0x1a   :  { %p3445_p10 = pnand %p3443_p9, %p3440_p8 }
  0x1c   :  { %3448 = shalt.err (!%p3445_p10)
}
  0x1d   :  { %s3449_s13 = scalar_lea.vmem %s26_s25, 8192  ;;  %p3454_p12 = scmp.lt.s32.totalorder %s26_s25, %s26_s25 }
  0x1e   :  { %p3450_p11 = scmp.ne.s32.totalorder %s26_s25, %s3449_s13  ;;  %p3455_p13 = scmp.lt.s32.totalorder %s3449_s13, %s3449_s13 }
  0x20   :  { %p3456_p0 = por %p3455_p13, %p3454_p12 }
  0x22   :  { %p3457_p1 = pnand %p3456_p0, %p3450_p11 }
  0x24   :  { %3460 = shalt.err (!%p3457_p1)
}
  0x25   :  { %s3515_s2 = smov 128   ;;  %s3516_s12 = smov 8  }
  0x26   :  { %31 = dma.hbm_to_vmem [thread:$0]  %s4733_s0, 8192, %s26_s25, [#allocation4], %s3515_s2, %s3515_s2, %s3516_s12  }
  0x27   :  { %s3517_s16 = smov [#allocation8]   ;;  %s3461_s5 = scalar_lea.hbm %s4739_s6, 2048 }
  0x28   :  { %s57_s17 = sshll.u32 %s3517_s16, 4  ;;  %p3462_p2 = scmp.ne.s32.totalorder %s4739_s6, %s3461_s5  ;;  %s58_s17 = int_to_ptr.vmem [resolvable:$true] %s57_s17 }
  0x29   :  { %p3465_p3 = scmp.lt.u32.totalorder %s3461_s5, %s4739_s6 }
  0x2b   :  { %p3467_p4 = pnand %p3465_p3, %p3462_p2 }
  0x2d   :  { %3470 = shalt.err (!%p3467_p4)
}
  0x2e   :  { %s3471_s24 = scalar_lea.vmem %s58_s17, 2048  ;;  %p3476_p6 = scmp.lt.s32.totalorder %s58_s17, %s58_s17 }
  0x2f   :  { %p3472_p5 = scmp.ne.s32.totalorder %s58_s17, %s3471_s24  ;;  %p3477_p7 = scmp.lt.s32.totalorder %s3471_s24, %s3471_s24 }
  0x31   :  { %p3478_p8 = por %p3477_p7, %p3476_p6 }
  0x33   :  { %p3479_p9 = pnand %p3478_p8, %p3472_p5 }
  0x35   :  { %3482 = shalt.err (!%p3479_p9)
}
  0x36   :  { %63 = dma.hbm_to_vmem [thread:$0]  %s4739_s6, 2048, %s58_s17, [#allocation7], %s3515_s2, %s3515_s2, %s3516_s12  }
  0x37   :  { %3505 = dma.done.wait [#allocation4], 8192  }
  0x38   :  { %3506 = vsyncadd [#allocation4], 4294959104 }
  0x39   :  { %3507 = dma.done.wait [#allocation7], 6144  }
  0x3a   :  { %3508 = vsyncadd [#allocation7], 4294961152  ;;  %v3518_v1 = vmov 0.0   ;;  %v140_v2 = vld [vmem:[#allocation6 + $0x8] sm:$0xff]  ;;  %v142_v3 = vld [vmem:[#allocation6 + $0x18] sm:$0xff]  ;;  %v3519_v55 = vmov 0  }
  0x3b   :  { %247 = vmatprep.mubr.f32.mxu0 %v3518_v1  ;;  %445 = vmatprep.mubr.f32.mxu1 %v3518_v1  ;;  %v139_v4 = vld [vmem:[#allocation6] sm:$0xff]  ;;  %v2860_v5 = vpack.c.bf16 %v142_v3, %v140_v2  ;;  %v141_v6 = vld [vmem:[#allocation6 + $0x10] sm:$0xff]  ;;  %v144_v7 = vld [vmem:[#allocation6 + $0x28] sm:$0xff]  ;;  %vm1512_vm0 = vcmask 130112   ;;  %vm1793_vm1 = vcmask 1041409   ;;  %vm1795_vm2 = vcmask 1042434  }
  0x3c   :  { %v146_v8 = vld [vmem:[#allocation6 + $0x38] sm:$0xff]  ;;  %v2862_v9 = vpack.c.bf16 %v141_v6, %v139_v4  ;;  %v143_v11 = vld [vmem:[#allocation6 + $0x20] sm:$0xff]  ;;  %v145_v12 = vld [vmem:[#allocation6 + $0x30] sm:$0xff]  ;;  %2951 = vset.pattern.permute.xlu1 %v3519_v55  ;;  %2950 = vset.pattern.permute.xlu0 %v3519_v55  ;;  %v4743_v55 = vlaneseq  ;;  %vm1797_vm3 = vcmask 1043459   ;;  %vm1799_vm4 = vcmask 1044484   ;;  %s3520_s24 = smov [#allocation9]  }
  0x3d   :  { %v2864_v10 = vpack.c.bf16 %v146_v8, %v144_v7  ;;  %v148_v13 = vld [vmem:[#allocation6 + $0x48] sm:$0xff]  ;;  %2861 = vmatprep.subr.bf16.mxu0 %v2860_v5  ;;  %2924 = vmatprep.subr.bf16.mxu1 %v2860_v5  ;;  %v150_v14 = vld [vmem:[#allocation6 + $0x58] sm:$0xff]  ;;  %v2866_v15 = vpack.c.bf16 %v145_v12, %v143_v11  ;;  %v147_v17 = vld [vmem:[#allocation6 + $0x40] sm:$0xff]  ;;  %vm1801_vm5 = vcmask 1045509   ;;  %vm1803_vm6 = vcmask 1046534   ;;  %s2718_s0 = sshll.u32 %s3520_s24, 4  ;;  %s2719_s0 = int_to_ptr.vmem [resolvable:$true] %s2718_s0 }
  0x3e   :  { %2863 = vmatpush1.bf16.msra.mxu0 %v2862_v9  ;;  %2932 = vmatpush1.bf16.msra.mxu1 %v2862_v9  ;;  %v2868_v16 = vpack.c.bf16 %v150_v14, %v148_v13  ;;  %v149_v18 = vld [vmem:[#allocation6 + $0x50] sm:$0xff]  ;;  %v152_v19 = vld [vmem:[#allocation6 + $0x68] sm:$0xff]  ;;  %v154_v20 = vld [vmem:[#allocation6 + $0x78] sm:$0xff]  ;;  %vm1805_vm7 = vcmask 1047559   ;;  %vm1836_vm9 = vcmask 130048   ;;  %s3483_s25 = scalar_lea.vmem %s2719_s0, 512  ;;  %p3488_p11 = scmp.lt.s32.totalorder %s2719_s0, %s2719_s0 }
  0x3f   :  { %2865 = vmatprep.subr.bf16.mxu0 %v2864_v10  ;;  %2925 = vmatprep.subr.bf16.mxu1 %v2864_v10  ;;  %v2870_v21 = vpack.c.bf16 %v149_v18, %v147_v17  ;;  %v2872_v22 = vpack.c.bf16 %v154_v20, %v152_v19  ;;  %v151_v23 = vld [vmem:[#allocation6 + $0x60] sm:$0xff]  ;;  %v153_v24 = vld [vmem:[#allocation6 + $0x70] sm:$0xff]  ;;  %v156_v25 = vld [vmem:[#allocation6 + $0x88] sm:$0xff]  ;;  %p3484_p10 = scmp.ne.s32.totalorder %s2719_s0, %s3483_s25  ;;  %p3489_p12 = scmp.lt.s32.totalorder %s3483_s25, %s3483_s25 }
  0x40   :  { %v158_v26 = vld [vmem:[#allocation6 + $0x98] sm:$0xff]  ;;  %v2874_v27 = vpack.c.bf16 %v153_v24, %v151_v23  ;;  %v155_v29 = vld [vmem:[#allocation6 + $0x80] sm:$0xff]  ;;  %v157_v30 = vld [vmem:[#allocation6 + $0x90] sm:$0xff] }
  0x41   :  { %v2876_v28 = vpack.c.bf16 %v158_v26, %v156_v25  ;;  %v160_v31 = vld [vmem:[#allocation6 + $0xa8] sm:$0xff]  ;;  %v162_v32 = vld [vmem:[#allocation6 + $0xb8] sm:$0xff]  ;;  %v2878_v33 = vpack.c.bf16 %v157_v30, %v155_v29  ;;  %v159_v35 = vld [vmem:[#allocation6 + $0xa0] sm:$0xff]  ;;  %p3490_p13 = por %p3489_p12, %p3488_p11 }
  0x42   :  { %2867 = vmatpush1.bf16.msra.mxu0 %v2866_v15  ;;  %2933 = vmatpush1.bf16.msra.mxu1 %v2866_v15  ;;  %v2880_v34 = vpack.c.bf16 %v162_v32, %v160_v31  ;;  %v161_v36 = vld [vmem:[#allocation6 + $0xb0] sm:$0xff]  ;;  %v164_v37 = vld [vmem:[#allocation6 + $0xc8] sm:$0xff]  ;;  %v166_v38 = vld [vmem:[#allocation6 + $0xd8] sm:$0xff] }
  0x43   :  { %2869 = vmatprep.subr.bf16.mxu0 %v2868_v16  ;;  %2926 = vmatprep.subr.bf16.mxu1 %v2868_v16  ;;  %v2882_v39 = vpack.c.bf16 %v161_v36, %v159_v35  ;;  %v2884_v40 = vpack.c.bf16 %v166_v38, %v164_v37  ;;  %v163_v41 = vld [vmem:[#allocation6 + $0xc0] sm:$0xff]  ;;  %v165_v42 = vld [vmem:[#allocation6 + $0xd0] sm:$0xff]  ;;  %v168_v43 = vld [vmem:[#allocation6 + $0xe8] sm:$0xff]  ;;  %p3491_p0 = pnand %p3490_p13, %p3484_p10 }
  0x44   :  { %v170_v44 = vld [vmem:[#allocation6 + $0xf8] sm:$0xff]  ;;  %v2886_v45 = vpack.c.bf16 %v165_v42, %v163_v41  ;;  %v167_v47 = vld [vmem:[#allocation6 + $0xe0] sm:$0xff]  ;;  %v169_v48 = vld [vmem:[#allocation6 + $0xf0] sm:$0xff] }
  0x45   :  { %v2888_v46 = vpack.c.bf16 %v170_v44, %v168_v43  ;;  %v2890_v49 = vpack.c.bf16 %v169_v48, %v167_v47  ;;  %v75_v50 = vld [vmem:[#allocation3] sm:$0xff]  ;;  %v108_v51 = vld [vmem:[#allocation3 + $0x108] sm:$0xff]  ;;  %v109_v54 = vld [vmem:[#allocation3 + $0x110] sm:$0xff] }
  0x46   :  { %2871 = vmatpush1.bf16.msra.mxu0 %v2870_v21  ;;  %2934 = vmatpush1.bf16.msra.mxu1 %v2870_v21  ;;  %v1144_v52 = vld [vmem:[%s4734_s1] sm:$0xff]  ;;  %v76_v53 = vld [vmem:[#allocation3 + $0x8] sm:$0xff]  ;;  %v77_v57 = vld [vmem:[#allocation3 + $0x10] sm:$0xff] }
  0x47   :  { %2873 = vmatprep.subr.bf16.mxu0 %v2872_v22  ;;  %2927 = vmatprep.subr.bf16.mxu1 %v2872_v22  ;;  %v1145_v56 = vld [vmem:[%s4734_s1 + $0x8] sm:$0xff]  ;;  %v110_v58 = vld [vmem:[#allocation3 + $0x118] sm:$0xff]  ;;  %v113_v0 = vld [vmem:[#allocation3 + $0x130] sm:$0xff] }
  0x48   :  { %1424 = vperm.xlu1 %2951, %v1144_v52   ;;  %v78_v59 = vld [vmem:[#allocation3 + $0x18] sm:$0xff]  ;;  %v111_v60 = vld [vmem:[#allocation3 + $0x120] sm:$0xff]  ;;  %v112_v62 = vld [vmem:[#allocation3 + $0x128] sm:$0xff] }
  0x49   :  { %v79_v61 = vld [vmem:[#allocation3 + $0x20] sm:$0xff]  ;;  %v80_v63 = vld [vmem:[#allocation3 + $0x28] sm:$0xff]  ;;  %v81_v2 = vld [vmem:[#allocation3 + $0x30] sm:$0xff] }
  0x4a   :  { %2875 = vmatpush1.bf16.msra.mxu0 %v2874_v27  ;;  %2935 = vmatpush1.bf16.msra.mxu1 %v2874_v27  ;;  %v114_v3 = vld [vmem:[#allocation3 + $0x138] sm:$0xff]  ;;  %v115_v5 = vld [vmem:[#allocation3 + $0x140] sm:$0xff]  ;;  %v116_v7 = vld [vmem:[#allocation3 + $0x148] sm:$0xff] }
  0x4b   :  { %2877 = vmatprep.subr.bf16.mxu0 %v2876_v28  ;;  %2928 = vmatprep.subr.bf16.mxu1 %v2876_v28  ;;  %v82_v4 = vld [vmem:[#allocation3 + $0x38] sm:$0xff]  ;;  %v83_v6 = vld [vmem:[#allocation3 + $0x40] sm:$0xff]  ;;  %v84_v8 = vld [vmem:[#allocation3 + $0x48] sm:$0xff] }
  0x4c   :  { %1427 = vperm.xlu1 %2951, %v1145_v56   ;;  %v117_v9 = vld [vmem:[#allocation3 + $0x150] sm:$0xff]  ;;  %v118_v11 = vld [vmem:[#allocation3 + $0x158] sm:$0xff]  ;;  %v119_v13 = vld [vmem:[#allocation3 + $0x160] sm:$0xff]  ;;  %v3687_v56 = vshrl.u32 %v4743_v55, 7 }
  0x4d   :  { %v85_v10 = vld [vmem:[#allocation3 + $0x50] sm:$0xff]  ;;  %v86_v12 = vld [vmem:[#allocation3 + $0x58] sm:$0xff]  ;;  %v87_v14 = vld [vmem:[#allocation3 + $0x60] sm:$0xff] }
  0x4e   :  { %2879 = vmatpush1.bf16.msra.mxu0 %v2878_v33  ;;  %2936 = vmatpush1.bf16.msra.mxu1 %v2878_v33  ;;  %v120_v15 = vld [vmem:[#allocation3 + $0x168] sm:$0xff]  ;;  %v121_v17 = vld [vmem:[#allocation3 + $0x170] sm:$0xff]  ;;  %v122_v19 = vld [vmem:[#allocation3 + $0x178] sm:$0xff]  ;;  %4750 = vst [vmem:[#allocation13_spill] sm:$0xff] %v3687_v56 }
  0x4f   :  { %2881 = vmatprep.subr.bf16.mxu0 %v2880_v34  ;;  %2929 = vmatprep.subr.bf16.mxu1 %v2880_v34  ;;  %v88_v16 = vld [vmem:[#allocation3 + $0x68] sm:$0xff]  ;;  %v89_v18 = vld [vmem:[#allocation3 + $0x70] sm:$0xff]  ;;  %v90_v20 = vld [vmem:[#allocation3 + $0x78] sm:$0xff] }
  0x50   :  { %v123_v21 = vld [vmem:[#allocation3 + $0x180] sm:$0xff]  ;;  %v124_v23 = vld [vmem:[#allocation3 + $0x188] sm:$0xff]  ;;  %v125_v25 = vld [vmem:[#allocation3 + $0x190] sm:$0xff] }
  0x51   :  { %v91_v22 = vld [vmem:[#allocation3 + $0x80] sm:$0xff]  ;;  %v92_v24 = vld [vmem:[#allocation3 + $0x88] sm:$0xff]  ;;  %v93_v26 = vld [vmem:[#allocation3 + $0x90] sm:$0xff] }
  0x52   :  { %2883 = vmatpush1.bf16.msra.mxu0 %v2882_v39  ;;  %2937 = vmatpush1.bf16.msra.mxu1 %v2882_v39  ;;  %v126_v27 = vld [vmem:[#allocation3 + $0x198] sm:$0xff]  ;;  %v127_v29 = vld [vmem:[#allocation3 + $0x1a0] sm:$0xff]  ;;  %v128_v31 = vld [vmem:[#allocation3 + $0x1a8] sm:$0xff] }
  0x53   :  { %2885 = vmatprep.subr.bf16.mxu0 %v2884_v40  ;;  %2930 = vmatprep.subr.bf16.mxu1 %v2884_v40  ;;  %v94_v28 = vld [vmem:[#allocation3 + $0x98] sm:$0xff]  ;;  %v95_v30 = vld [vmem:[#allocation3 + $0xa0] sm:$0xff]  ;;  %v96_v32 = vld [vmem:[#allocation3 + $0xa8] sm:$0xff] }
  0x54   :  { %v129_v33 = vld [vmem:[#allocation3 + $0x1b0] sm:$0xff]  ;;  %v130_v35 = vld [vmem:[#allocation3 + $0x1b8] sm:$0xff]  ;;  %v131_v38 = vld [vmem:[#allocation3 + $0x1c0] sm:$0xff] }
  0x55   :  { %v97_v34 = vld [vmem:[#allocation3 + $0xb0] sm:$0xff]  ;;  %v2800_v36 = vld [vmem:[#allocation2] ss:$0 sm:$0xff]  ;;  %v99_v39 = vld [vmem:[#allocation3 + $0xc0] sm:$0xff] }
  0x56   :  { %2887 = vmatpush1.bf16.msra.mxu0 %v2886_v45  ;;  %2938 = vmatpush1.bf16.msra.mxu1 %v2886_v45  ;;  %v98_v37 = vld [vmem:[#allocation3 + $0xb8] sm:$0xff]  ;;  %v132_v40 = vld [vmem:[#allocation3 + $0x1c8] sm:$0xff]  ;;  %v133_v42 = vld [vmem:[#allocation3 + $0x1d0] sm:$0xff] }
  0x57   :  { %2889 = vmatprep.subr.bf16.mxu0 %v2888_v46  ;;  %2931 = vmatprep.subr.bf16.mxu1 %v2888_v46  ;;  %v100_v41 = vld [vmem:[#allocation3 + $0xc8] sm:$0xff]  ;;  %v101_v43 = vld [vmem:[#allocation3 + $0xd0] sm:$0xff]  ;;  %v134_v44 = vld [vmem:[#allocation3 + $0x1d8] sm:$0xff] }
  0x58   :  { %1354 = vperm.xlu0 %2950, %v2800_v36   ;;  %v102_v45 = vld [vmem:[#allocation3 + $0xd8] sm:$0xff]  ;;  %v135_v46 = vld [vmem:[#allocation3 + $0x1e0] sm:$0xff]  ;;  %v136_v48 = vld [vmem:[#allocation3 + $0x1e8] sm:$0xff] }
  0x59   :  { %v103_v47 = vld [vmem:[#allocation3 + $0xe0] sm:$0xff]  ;;  %v138_v52 = vld [vmem:[#allocation3 + $0x1f8] sm:$0xff] }
  0x5a   :  { %2891 = vmatpush1.bf16.msra.mxu0 %v2890_v49  ;;  %2939 = vmatpush1.bf16.msra.mxu1 %v2890_v49  ;;  %v104_v49 = vld [vmem:[#allocation3 + $0xe8] sm:$0xff] }
  0x5d   :  { %248 = vmatmul.mubr.f32.vlgmr.msra.gmra.mrb[0].mxu0 %v75_v50  ;;  %446 = vmatmul.mubr.f32.vlgmr.msra.gmra.mrb[0].mxu1 %v108_v51  ;;  %v137_v50 = vld [vmem:[#allocation3 + $0x1f0] sm:$0xff] }
  0x5e   :  { %253 = vmatprep.mubr.f32.mxu0 %v3518_v1  ;;  %451 = vmatprep.mubr.f32.mxu1 %v3518_v1  ;;  %v105_v51 = vld [vmem:[#allocation3 + $0xf0] sm:$0xff] }
  0x61   :  { %254 = vmatmul.mubr.f32.gmra.mrb[2].mxu0 %v76_v53  ;;  %452 = vmatmul.mubr.f32.gmra.mrb[2].mxu1 %v109_v54  ;;  %v106_v53 = vld [vmem:[#allocation3 + $0xf8] sm:$0xff]  ;;  %v107_v54 = vld [vmem:[#allocation3 + $0x100] sm:$0xff] }
  0x62   :  { %259 = vmatprep.mubr.f32.mxu0 %v3518_v1  ;;  %457 = vmatprep.mubr.f32.mxu1 %v3518_v1 }
  0x65   :  { %260 = vmatmul.mubr.f32.gmra.mrb[4].mxu0 %v77_v57  ;;  %458 = vmatmul.mubr.f32.gmra.mrb[4].mxu1 %v110_v58  ;;  %v3690_v57 = vsub.s32 1, %v3687_v56  ;;  %v171_v58 = vld [vmem:[%s4736_s3] sm:$0x3] }
  0x66   :  { %265 = vmatprep.mubr.f32.mxu0 %v3518_v1  ;;  %463 = vmatprep.mubr.f32.mxu1 %v3518_v1 }
  0x67   :  { %4751 = vst [vmem:[#allocation14_spill] sm:$0xff] %v3690_v57 }
  0x69   :  { %266 = vmatmul.mubr.f32.gmra.mrb[6].mxu0 %v78_v59  ;;  %464 = vmatmul.mubr.f32.gmra.mrb[6].mxu1 %v111_v60  ;;  %v3696_v59 = vsub.s32 0, %v3687_v56  ;;  %v3699_v60 = vrot.slane %v171_v58, %v3690_v57 }
  0x6a   :  { %271 = vmatprep.mubr.f32.mxu0 %v3518_v1  ;;  %469 = vmatprep.mubr.f32.mxu1 %v3518_v1 }
  0x6b   :  { %4752 = vst [vmem:[#allocation15_spill] sm:$0xff] %v3696_v59 }
  0x6d   :  { %272 = vmatmul.mubr.f32.gmra.mrb[8].mxu0 %v79_v61  ;;  %470 = vmatmul.mubr.f32.gmra.mrb[8].mxu1 %v112_v62  ;;  %v3702_v62 = vrot.slane %v171_v58, %v3696_v59 }
  0x6e   :  { %277 = vmatprep.mubr.f32.mxu0 %v3518_v1  ;;  %475 = vmatprep.mubr.f32.mxu1 %v3518_v1 }
  0x71   :  { %278 = vmatmul.mubr.f32.gmra.mrb[10].mxu0 %v80_v63  ;;  %476 = vmatmul.mubr.f32.gmra.mrb[10].mxu1 %v113_v0 }
  0x72   :  { %283 = vmatprep.mubr.f32.mxu0 %v3518_v1  ;;  %481 = vmatprep.mubr.f32.mxu1 %v3518_v1 }
  0x75   :  { %284 = vmatmul.mubr.f32.gmra.mrb[12].mxu0 %v81_v2  ;;  %482 = vmatmul.mubr.f32.gmra.mrb[12].mxu1 %v114_v3 }
  0x76   :  { %289 = vmatprep.mubr.f32.mxu0 %v3518_v1  ;;  %487 = vmatprep.mubr.f32.mxu1 %v3518_v1 }
  0x79   :  { %290 = vmatmul.mubr.f32.gmra.mrb[14].mxu0 %v82_v4  ;;  %488 = vmatmul.mubr.f32.gmra.mrb[14].mxu1 %v115_v5 }
  0x7a   :  { %295 = vmatprep.mubr.f32.mxu0 %v3518_v1  ;;  %493 = vmatprep.mubr.f32.mxu1 %v3518_v1 }
  0x7d   :  { %296 = vmatmul.mubr.f32.gmra.mrb[16].mxu0 %v83_v6  ;;  %494 = vmatmul.mubr.f32.gmra.mrb[16].mxu1 %v116_v7 }
  0x7e   :  { %301 = vmatprep.mubr.f32.mxu0 %v3518_v1  ;;  %499 = vmatprep.mubr.f32.mxu1 %v3518_v1 }
  0x81   :  { %302 = vmatmul.mubr.f32.gmra.mrb[18].mxu0 %v84_v8  ;;  %500 = vmatmul.mubr.f32.gmra.mrb[18].mxu1 %v117_v9 }
  0x82   :  { %307 = vmatprep.mubr.f32.mxu0 %v3518_v1  ;;  %505 = vmatprep.mubr.f32.mxu1 %v3518_v1 }
  0x85   :  { %308 = vmatmul.mubr.f32.gmra.mrb[20].mxu0 %v85_v10  ;;  %506 = vmatmul.mubr.f32.gmra.mrb[20].mxu1 %v118_v11 }
  0x86   :  { %313 = vmatprep.mubr.f32.mxu0 %v3518_v1  ;;  %511 = vmatprep.mubr.f32.mxu1 %v3518_v1 }
  0x89   :  { %314 = vmatmul.mubr.f32.gmra.mrb[22].mxu0 %v86_v12  ;;  %512 = vmatmul.mubr.f32.gmra.mrb[22].mxu1 %v119_v13 }
  0x8a   :  { %319 = vmatprep.mubr.f32.mxu0 %v3518_v1  ;;  %517 = vmatprep.mubr.f32.mxu1 %v3518_v1 }
  0x8d   :  { %320 = vmatmul.mubr.f32.gmra.mrb[24].mxu0 %v87_v14  ;;  %518 = vmatmul.mubr.f32.gmra.mrb[24].mxu1 %v120_v15 }
  0x8e   :  { %325 = vmatprep.mubr.f32.mxu0 %v3518_v1  ;;  %523 = vmatprep.mubr.f32.mxu1 %v3518_v1 }
  0x91   :  { %326 = vmatmul.mubr.f32.gmra.mrb[26].mxu0 %v88_v16  ;;  %524 = vmatmul.mubr.f32.gmra.mrb[26].mxu1 %v121_v17 }
  0x92   :  { %331 = vmatprep.mubr.f32.mxu0 %v3518_v1  ;;  %529 = vmatprep.mubr.f32.mxu1 %v3518_v1 }
  0x95   :  { %332 = vmatmul.mubr.f32.gmra.mrb[28].mxu0 %v89_v18  ;;  %530 = vmatmul.mubr.f32.gmra.mrb[28].mxu1 %v122_v19 }
  0x96   :  { %337 = vmatprep.mubr.f32.mxu0 %v3518_v1  ;;  %535 = vmatprep.mubr.f32.mxu1 %v3518_v1 }
  0x99   :  { %338 = vmatmul.mubr.f32.gmra.mrb[30].mxu0 %v90_v20  ;;  %536 = vmatmul.mubr.f32.gmra.mrb[30].mxu1 %v123_v21 }
  0x9a   :  { %343 = vmatprep.mubr.f32.mxu0 %v3518_v1  ;;  %541 = vmatprep.mubr.f32.mxu1 %v3518_v1 }
  0x9d   :  { %344 = vmatmul.mubr.f32.gmra.mrb[32].mxu0 %v91_v22  ;;  %542 = vmatmul.mubr.f32.gmra.mrb[32].mxu1 %v124_v23 }
  0x9e   :  { %349 = vmatprep.mubr.f32.mxu0 %v3518_v1  ;;  %547 = vmatprep.mubr.f32.mxu1 %v3518_v1 }
  0xa1   :  { %350 = vmatmul.mubr.f32.gmra.mrb[34].mxu0 %v92_v24  ;;  %548 = vmatmul.mubr.f32.gmra.mrb[34].mxu1 %v125_v25 }
  0xa2   :  { %355 = vmatprep.mubr.f32.mxu0 %v3518_v1  ;;  %553 = vmatprep.mubr.f32.mxu1 %v3518_v1 }
  0xa5   :  { %356 = vmatmul.mubr.f32.gmra.mrb[36].mxu0 %v93_v26  ;;  %554 = vmatmul.mubr.f32.gmra.mrb[36].mxu1 %v126_v27 }
  0xa6   :  { %361 = vmatprep.mubr.f32.mxu0 %v3518_v1  ;;  %559 = vmatprep.mubr.f32.mxu1 %v3518_v1 }
  0xa9   :  { %362 = vmatmul.mubr.f32.gmra.mrb[38].mxu0 %v94_v28  ;;  %560 = vmatmul.mubr.f32.gmra.mrb[38].mxu1 %v127_v29 }
  0xaa   :  { %367 = vmatprep.mubr.f32.mxu0 %v3518_v1  ;;  %565 = vmatprep.mubr.f32.mxu1 %v3518_v1 }
  0xad   :  { %368 = vmatmul.mubr.f32.gmra.mrb[40].mxu0 %v95_v30  ;;  %566 = vmatmul.mubr.f32.gmra.mrb[40].mxu1 %v128_v31 }
  0xae   :  { %373 = vmatprep.mubr.f32.mxu0 %v3518_v1  ;;  %571 = vmatprep.mubr.f32.mxu1 %v3518_v1 }
  0xb1   :  { %374 = vmatmul.mubr.f32.gmra.mrb[42].mxu0 %v96_v32  ;;  %572 = vmatmul.mubr.f32.gmra.mrb[42].mxu1 %v129_v33 }
  0xb2   :  { %379 = vmatprep.mubr.f32.mxu0 %v3518_v1  ;;  %577 = vmatprep.mubr.f32.mxu1 %v3518_v1 }
  0xb5   :  { %380 = vmatmul.mubr.f32.gmra.mrb[44].mxu0 %v97_v34  ;;  %578 = vmatmul.mubr.f32.gmra.mrb[44].mxu1 %v130_v35 }
  0xb6   :  { %385 = vmatprep.mubr.f32.mxu0 %v3518_v1  ;;  %583 = vmatprep.mubr.f32.mxu1 %v3518_v1 }
  0xb9   :  { %386 = vmatmul.mubr.f32.gmra.mrb[46].mxu0 %v98_v37  ;;  %584 = vmatmul.mubr.f32.gmra.mrb[46].mxu1 %v131_v38 }
  0xba   :  { %391 = vmatprep.mubr.f32.mxu0 %v3518_v1  ;;  %589 = vmatprep.mubr.f32.mxu1 %v3518_v1 }
  0xbd   :  { %392 = vmatmul.mubr.f32.gmra.mrb[48].mxu0 %v99_v39  ;;  %590 = vmatmul.mubr.f32.gmra.mrb[48].mxu1 %v132_v40 }
  0xbe   :  { %397 = vmatprep.mubr.f32.mxu0 %v3518_v1  ;;  %595 = vmatprep.mubr.f32.mxu1 %v3518_v1 }
  0xc1   :  { %398 = vmatmul.mubr.f32.gmra.mrb[50].mxu0 %v100_v41  ;;  %596 = vmatmul.mubr.f32.gmra.mrb[50].mxu1 %v133_v42 }
  0xc2   :  { %403 = vmatprep.mubr.f32.mxu0 %v3518_v1  ;;  %601 = vmatprep.mubr.f32.mxu1 %v3518_v1 }
  0xc5   :  { %404 = vmatmul.mubr.f32.gmra.mrb[52].mxu0 %v101_v43  ;;  %602 = vmatmul.mubr.f32.gmra.mrb[52].mxu1 %v134_v44 }
  0xc6   :  { %409 = vmatprep.mubr.f32.mxu0 %v3518_v1  ;;  %607 = vmatprep.mubr.f32.mxu1 %v3518_v1 }
  0xc9   :  { %410 = vmatmul.mubr.f32.gmra.mrb[54].mxu0 %v102_v45  ;;  %608 = vmatmul.mubr.f32.gmra.mrb[54].mxu1 %v135_v46 }
  0xca   :  { %415 = vmatprep.mubr.f32.mxu0 %v3518_v1  ;;  %613 = vmatprep.mubr.f32.mxu1 %v3518_v1 }
  0xcd   :  { %416 = vmatmul.mubr.f32.gmra.mrb[56].mxu0 %v103_v47  ;;  %614 = vmatmul.mubr.f32.gmra.mrb[56].mxu1 %v136_v48 }
  0xce   :  { %421 = vmatprep.mubr.f32.mxu0 %v3518_v1  ;;  %619 = vmatprep.mubr.f32.mxu1 %v3518_v1 }
  0xd1   :  { %422 = vmatmul.mubr.f32.gmra.mrb[58].mxu0 %v104_v49  ;;  %620 = vmatmul.mubr.f32.gmra.mrb[58].mxu1 %v137_v50 }
  0xd2   :  { %427 = vmatprep.mubr.f32.mxu0 %v3518_v1  ;;  %625 = vmatprep.mubr.f32.mxu1 %v3518_v1 }
  0xd5   :  { %428 = vmatmul.mubr.f32.gmra.mrb[60].mxu0 %v105_v51  ;;  %626 = vmatmul.mubr.f32.gmra.mrb[60].mxu1 %v138_v52 }
  0xd6   :  { %433 = vmatprep.mubr.f32.mxu0 %v3518_v1 }
  0xd9   :  { %434 = vmatmul.mubr.f32.gmra.mrb[62].mxu0 %v106_v53 }
  0xda   :  { %439 = vmatprep.mubr.f32.mxu0 %v3518_v1 }
  0xdd   :  { %440 = vmatmul.mubr.f32.gmra.mrb[64].mxu0 %v107_v54 }
 0x130   :  { %v249_v1 = vpop.f32.mrb[0].mxu0  ;;  %v447_v61 = vpop.f32.mrb[0].mxu1 }
 0x131   :  { %v251_v63 = vpop.f32.mrb[1].mxu0  ;;  %v449_v0 = vpop.f32.mrb[1].mxu1  ;;  %v250_v8 = vadd.f32 %v249_v1, %v3702_v62  ;;  %v448_v13 = vadd.f32 %v447_v61, %v3702_v62 }
 0x132   :  { %v252_v2 = vadd.f32 %v251_v63, %v3699_v60  ;;  %v450_v3 = vadd.f32 %v449_v0, %v3699_v60 }
 0x134   :  { %v2735_v4 = vmul.f32 -1.442695, %v252_v2  ;;  %v2768_v5 = vmul.f32 -1.442695, %v450_v3  ;;  %v255_v6 = vpop.f32.mrb[2].mxu0  ;;  %v453_v7 = vpop.f32.mrb[2].mxu1 }
 0x135   :  { %v257_v9 = vpop.f32.mrb[3].mxu0  ;;  %v455_v10 = vpop.f32.mrb[3].mxu1  ;;  %v256_v18 = vadd.f32 %v255_v6, %v3702_v62  ;;  %v454_v23 = vadd.f32 %v453_v7, %v3702_v62 }
 0x136   :  { %2952 = vpow2.f32 %v2735_v4  ;;  %v258_v11 = vadd.f32 %v257_v9, %v3699_v60  ;;  %v456_v12 = vadd.f32 %v455_v10, %v3699_v60 }
 0x137   :  { %2954 = vpow2.f32 %v2768_v5 }
 0x138   :  { %v2736_v14 = vmul.f32 -1.442695, %v258_v11  ;;  %v2769_v15 = vmul.f32 -1.442695, %v456_v12  ;;  %v261_v16 = vpop.f32.mrb[4].mxu0  ;;  %v459_v17 = vpop.f32.mrb[4].mxu1  ;;  %2956 = vtanh.f32 %v250_v8 }
 0x139   :  { %v263_v19 = vpop.f32.mrb[5].mxu0  ;;  %v461_v20 = vpop.f32.mrb[5].mxu1  ;;  %v262_v28 = vadd.f32 %v261_v16, %v3702_v62  ;;  %v460_v43 = vadd.f32 %v459_v17, %v3702_v62 }
 0x13a   :  { %2958 = vpow2.f32 %v2736_v14  ;;  %v264_v21 = vadd.f32 %v263_v19, %v3699_v60  ;;  %v462_v22 = vadd.f32 %v461_v20, %v3699_v60 }
 0x13b   :  { %2960 = vpow2.f32 %v2769_v15 }
 0x13c   :  { %2962 = vtanh.f32 %v448_v13  ;;  %v2737_v24 = vmul.f32 -1.442695, %v264_v21  ;;  %v2770_v25 = vmul.f32 -1.442695, %v462_v22  ;;  %v267_v26 = vpop.f32.mrb[6].mxu0  ;;  %v465_v27 = vpop.f32.mrb[6].mxu1 }
 0x13d   :  { %2964 = vtanh.f32 %v256_v18  ;;  %v269_v29 = vpop.f32.mrb[7].mxu0  ;;  %v467_v30 = vpop.f32.mrb[7].mxu1  ;;  %v268_v51 = vadd.f32 %v267_v26, %v3702_v62  ;;  %v466_v12 = vadd.f32 %v465_v27, %v3702_v62  ;;  %v3743_v26 = vld [vmem:[%s4737_s4] ss:$0 sm:$0xff] }
 0x13e   :  { %2966 = vpow2.f32 %v2737_v24  ;;  %v270_v31 = vadd.f32 %v269_v29, %v3699_v60  ;;  %v468_v32 = vadd.f32 %v467_v30, %v3699_v60 }
 0x13f   :  { %2968 = vpow2.f32 %v2770_v25 }
 0x140   :  { %v2953_v33 = vpop.eup %2952  ;;  %2970 = vtanh.f32 %v454_v23  ;;  %v2738_v34 = vmul.f32 -1.442695, %v270_v31  ;;  %v273_v35 = vpop.f32.mrb[8].mxu0  ;;  %v2771_v39 = vmul.f32 -1.442695, %v468_v32 }
 0x141   :  { %v3717_v36 = vpop.f32.mrb[8].mxu1  ;;  %v2955_v37 = vpop.eup %2954  ;;  %v888_v38 = vadd.f32 1.0, %v2953_v33  ;;  %2972 = vtanh.f32 %v262_v28  ;;  %v274_v16 = vadd.f32 %v273_v35, %v3702_v62 }
 0x142   :  { %v275_v40 = vpop.f32.mrb[9].mxu0  ;;  %v473_v41 = vpop.f32.mrb[9].mxu1  ;;  %v921_v42 = vadd.f32 1.0, %v2955_v37  ;;  %2974 = vpow2.f32 %v2738_v34  ;;  %v472_v33 = vadd.f32 %v3717_v36, %v3702_v62 }
 0x143   :  { %v276_v44 = vadd.f32 %v275_v40, %v3699_v60  ;;  %v2957_v45 = vpop.eup %2956  ;;  %2976 = vrcp.f32 %v888_v38  ;;  %v474_v52 = vadd.f32 %v473_v41, %v3699_v60 }
 0x144   :  { %v2959_v46 = vpop.eup %2958  ;;  %2978 = vrcp.f32 %v921_v42  ;;  %v279_v47 = vpop.f32.mrb[10].mxu0 }
 0x145   :  { %v3721_v48 = vpop.f32.mrb[10].mxu1  ;;  %v2961_v49 = vpop.eup %2960  ;;  %v889_v50 = vadd.f32 1.0, %v2959_v46  ;;  %2980 = vpow2.f32 %v2771_v39  ;;  %v2739_v61 = vmul.f32 -1.442695, %v276_v44  ;;  %v2772_v6 = vmul.f32 -1.442695, %v474_v52 }
 0x146   :  { %v281_v53 = vpop.f32.mrb[11].mxu0  ;;  %v479_v54 = vpop.f32.mrb[11].mxu1  ;;  %v922_v1 = vadd.f32 1.0, %v2961_v49  ;;  %2982 = vtanh.f32 %v460_v43  ;;  %v280_v38 = vadd.f32 %v279_v47, %v3702_v62 }
 0x147   :  { %v2963_v58 = vpop.eup %2962  ;;  %2984 = vrcp.f32 %v889_v50  ;;  %v282_v7 = vadd.f32 %v281_v53, %v3699_v60  ;;  %v480_v14 = vadd.f32 %v479_v54, %v3699_v60 }
 0x148   :  { %v2965_v63 = vpop.eup %2964  ;;  %2986 = vrcp.f32 %v922_v1  ;;  %v3725_v2 = vpop.f32.mrb[12].mxu0 }
 0x149   :  { %v2967_v0 = vpop.eup %2966  ;;  %v3727_v3 = vpop.f32.mrb[12].mxu1  ;;  %2988 = vtanh.f32 %v268_v51  ;;  %v2740_v21 = vmul.f32 -1.442695, %v282_v7  ;;  %v2773_v29 = vmul.f32 -1.442695, %v480_v14  ;;  %v286_v7 = vadd.f32 %v3725_v2, %v3702_v62 }
 0x14a   :  { %v2969_v4 = vpop.eup %2968  ;;  %v890_v5 = vadd.f32 1.0, %v2967_v0  ;;  %v287_v8 = vpop.f32.mrb[13].mxu0  ;;  %2990 = vpow2.f32 %v2739_v61  ;;  %v478_v61 = vadd.f32 %v3721_v48, %v3702_v62 }
 0x14b   :  { %v485_v9 = vpop.f32.mrb[13].mxu1  ;;  %v2971_v10 = vpop.eup %2970  ;;  %v923_v11 = vadd.f32 1.0, %v2969_v4  ;;  %v288_v25 = vadd.f32 %v287_v8, %v3699_v60 }
 0x14c   :  { %v3731_v13 = vpop.eup %2972  ;;  %2992 = vrcp.f32 %v890_v5  ;;  %v3735_v17 = vpop.f32.mrb[14].mxu0  ;;  %v486_v34 = vadd.f32 %v485_v9, %v3699_v60 }
 0x14d   :  { %v2975_v15 = vpop.eup %2974  ;;  %2994 = vrcp.f32 %v923_v11  ;;  %v3737_v18 = vpop.f32.mrb[14].mxu1  ;;  %v2741_v44 = vmul.f32 -1.442695, %v288_v25  ;;  %v484_v25 = vadd.f32 %v3727_v3, %v3702_v62 }
 0x14e   :  { %v2977_v19 = vpop.eup %2976  ;;  %v891_v20 = vadd.f32 1.0, %v2975_v15  ;;  %2996 = vpow2.f32 %v2772_v6  ;;  %v293_v22 = vpop.f32.mrb[15].mxu0  ;;  %v2774_v47 = vmul.f32 -1.442695, %v486_v34 }
 0x14f   :  { %v491_v23 = vpop.f32.mrb[15].mxu1  ;;  %v2979_v24 = vpop.eup %2978  ;;  %2998 = vtanh.f32 %v466_v12  ;;  %v1080_v27 = vmul.f32 %v2977_v19, %v2957_v45  ;;  %v294_v51 = vadd.f32 %v293_v22, %v3699_v60 }
 0x150   :  { %v2981_v28 = vpop.eup %2980  ;;  %3000 = vrcp.f32 %v891_v20  ;;  %v1113_v30 = vmul.f32 %v2979_v24, %v2963_v58  ;;  %v3748_v35 = vpop.f32.mrb[16].mxu0 }
 0x151   :  { %v2983_v31 = vpop.eup %2982  ;;  %v924_v32 = vadd.f32 1.0, %v2981_v28  ;;  %3002 = vtanh.f32 %v274_v16  ;;  %v3751_v39 = vpop.f32.mrb[16].mxu1  ;;  %v1155_v42 = vmul.f32 %v3743_v26, %v1080_v27  ;;  %v2742_v48 = vmul.f32 -1.442695, %v294_v51 }
 0x152   :  { %v2985_v37 = vpop.eup %2984  ;;  %3004 = vpow2.f32 %v2740_v21  ;;  %v299_v40 = vpop.f32.mrb[17].mxu0  ;;  %v1188_v41 = vmul.f32 %v3743_v26, %v1113_v30 }
 0x153   :  { %v2987_v43 = vpop.eup %2986  ;;  %3006 = vrcp.f32 %v924_v32  ;;  %v497_v45 = vpop.f32.mrb[17].mxu1  ;;  %v1081_v36 = vmul.f32 %v2985_v37, %v2965_v63  ;;  %1219 = vadd.xlane.f32.xlu0 %v1155_v42  ;;  %v492_v63 = vadd.f32 %v491_v23, %v3699_v60 }
 0x154   :  { %v2989_v46 = vpop.eup %2988  ;;  %3008 = vpow2.f32 %v2773_v29  ;;  %1285 = vadd.xlane.f32.xlu1 %v1188_v41  ;;  %v1114_v49 = vmul.f32 %v2987_v43, %v2971_v10  ;;  %v3756_v52 = vpop.f32.mrb[18].mxu0  ;;  %v498_v29 = vadd.f32 %v497_v45, %v3699_v60 }
 0x155   :  { %v2991_v50 = vpop.eup %2990  ;;  %3010 = vtanh.f32 %v472_v33  ;;  %v3758_v53 = vpop.f32.mrb[18].mxu1  ;;  %v1156_v54 = vmul.f32 %v3743_v26, %v1081_v36  ;;  %v2775_v15 = vmul.f32 -1.442695, %v492_v63  ;;  %v292_v33 = vadd.f32 %v3735_v17, %v3702_v62 }
 0x156   :  { %v2993_v58 = vpop.eup %2992  ;;  %v892_v1 = vadd.f32 1.0, %v2991_v50  ;;  %3012 = vtanh.f32 %v280_v38  ;;  %v305_v0 = vpop.f32.mrb[19].mxu0  ;;  %v1189_v2 = vmul.f32 %v3743_v26, %v1114_v49  ;;  %v2776_v45 = vmul.f32 -1.442695, %v498_v29 }
 0x157   :  { %v3764_v4 = vpop.f32.mrb[19].mxu1  ;;  %v2995_v5 = vpop.eup %2994  ;;  %3014 = vpow2.f32 %v2741_v44  ;;  %1221 = vadd.xlane.f32.xlu0 %v1156_v54  ;;  %v1082_v8 = vmul.f32 %v2993_v58, %v3731_v13  ;;  %v300_v13 = vadd.f32 %v299_v40, %v3699_v60  ;;  %v306_v17 = vadd.f32 %v305_v0, %v3699_v60 }
 0x158   :  { %v2997_v6 = vpop.eup %2996  ;;  %3016 = vrcp.f32 %v892_v1  ;;  %v1115_v9 = vmul.f32 %v2995_v5, %v2983_v31  ;;  %v3769_v12 = vpop.f32.mrb[20].mxu0  ;;  %v298_v63 = vadd.f32 %v3748_v35, %v3702_v62 }
 0x159   :  { %v2999_v10 = vpop.eup %2998  ;;  %v925_v11 = vadd.f32 1.0, %v2997_v6  ;;  %3018 = vpow2.f32 %v2774_v47  ;;  %v3771_v16 = vpop.f32.mrb[20].mxu1  ;;  %v1157_v20 = vmul.f32 %v3743_v26, %v1082_v8  ;;  %v2743_v41 = vmul.f32 -1.442695, %v300_v13 }
 0x15a   :  { %v3001_v14 = vpop.eup %3000  ;;  %3020 = vtanh.f32 %v478_v61  ;;  %v3773_v19 = vpop.f32.mrb[21].mxu0  ;;  %v1190_v3 = vmul.f32 %v3743_v26, %v1115_v9  ;;  %v490_v61 = vadd.f32 %v3737_v18, %v3702_v62  ;;  %v504_v6 = vadd.f32 %v3764_v4, %v3699_v60 }
 0x15b   :  { %v3003_v21 = vpop.eup %3002  ;;  %3022 = vrcp.f32 %v925_v11  ;;  %v3778_v22 = vpop.f32.mrb[21].mxu1  ;;  %v1083_v23 = vmul.f32 %v3001_v14, %v2989_v46  ;;  %1223 = vadd.xlane.f32.xlu1 %v1157_v20  ;;  %1287 = vadd.xlane.f32.xlu0 %v1189_v2  ;;  %v2744_v9 = vmul.f32 -1.442695, %v306_v17  ;;  %v312_v4 = vadd.f32 %v3773_v19, %v3699_v60 }
 0x15c   :  { %v3005_v24 = vpop.eup %3004  ;;  %3024 = vtanh.f32 %v286_v7  ;;  %v3783_v30 = vpop.f32.mrb[22].mxu0  ;;  %v2777_v13 = vmul.f32 -1.442695, %v504_v6  ;;  %v304_v19 = vadd.f32 %v3756_v52, %v3702_v62 }
 0x15d   :  { %v3007_v27 = vpop.eup %3006  ;;  %v893_v28 = vadd.f32 1.0, %v3005_v24  ;;  %3026 = vpow2.f32 %v2742_v48  ;;  %v3785_v31 = vpop.f32.mrb[22].mxu1  ;;  %v1158_v58 = vmul.f32 %v3743_v26, %v1083_v23 }
 0x15e   :  { %v3009_v32 = vpop.eup %3008  ;;  %3028 = vpow2.f32 %v2775_v15  ;;  %v3789_v34 = vpop.f32.mrb[23].mxu0  ;;  %v1116_v43 = vmul.f32 %v3007_v27, %v2999_v10  ;;  %v510_v27 = vadd.f32 %v3778_v22, %v3699_v60 }
 0x15f   :  { %v3791_v37 = vpop.f32.mrb[23].mxu1  ;;  %v3011_v38 = vpop.eup %3010  ;;  %3030 = vrcp.f32 %v893_v28  ;;  %v926_v40 = vadd.f32 1.0, %v3009_v32  ;;  %1289 = vadd.xlane.f32.xlu1 %v1190_v3  ;;  %v318_v52 = vadd.f32 %v3789_v34, %v3699_v60 }
 0x160   :  { %v3013_v42 = vpop.eup %3012  ;;  %3032 = vtanh.f32 %v484_v25  ;;  %v3795_v36 = vpop.f32.mrb[24].mxu0  ;;  %v1191_v47 = vmul.f32 %v3743_v26, %v1116_v43  ;;  %v496_v25 = vadd.f32 %v3751_v39, %v3702_v62  ;;  %v2745_v39 = vmul.f32 -1.442695, %v312_v4 }
 0x161   :  { %v3015_v44 = vpop.eup %3014  ;;  %3034 = vrcp.f32 %v926_v40  ;;  %v3797_v46 = vpop.f32.mrb[24].mxu1  ;;  %v516_v34 = vadd.f32 %v3791_v37, %v3699_v60 }
 0x162   :  { %v3017_v49 = vpop.eup %3016  ;;  %v894_v50 = vadd.f32 1.0, %v3015_v44  ;;  %3036 = vtanh.f32 %v292_v33  ;;  %v3800_v51 = vpop.f32.mrb[25].mxu0  ;;  %1291 = vadd.xlane.f32.xlu0 %v1191_v47 }
 0x163   :  { %v3802_v54 = vpop.f32.mrb[25].mxu1  ;;  %v3019_v1 = vpop.eup %3018  ;;  %3038 = vpow2.f32 %v2743_v41  ;;  %1225 = vadd.xlane.f32.xlu1 %v1158_v58  ;;  %v1084_v7 = vmul.f32 %v3017_v49, %v3003_v21 }
 0x164   :  { %v3021_v0 = vpop.eup %3020  ;;  %3040 = vrcp.f32 %v894_v50  ;;  %v927_v5 = vadd.f32 1.0, %v3019_v1  ;;  %v3811_v10 = vpop.f32.mrb[26].mxu0 }
 0x165   :  { %v3023_v8 = vpop.eup %3022  ;;  %3042 = vpow2.f32 %v2776_v45  ;;  %v3813_v11 = vpop.f32.mrb[26].mxu1  ;;  %v1159_v35 = vmul.f32 %v3743_v26, %v1084_v7  ;;  %v2778_v45 = vmul.f32 -1.442695, %v510_v27  ;;  %v508_v27 = vadd.f32 %v3771_v16, %v3702_v62 }
 0x166   :  { %v3025_v18 = vpop.eup %3024  ;;  %3044 = vrcp.f32 %v927_v5  ;;  %v3816_v48 = vpop.f32.mrb[27].mxu0  ;;  %v1117_v20 = vmul.f32 %v3023_v8, %v3011_v38  ;;  %v310_v8 = vadd.f32 %v3769_v12, %v3702_v62  ;;  %v2779_v12 = vmul.f32 -1.442695, %v516_v34 }
 0x167   :  { %v3818_v14 = vpop.f32.mrb[27].mxu1  ;;  %v3027_v15 = vpop.eup %3026  ;;  %3046 = vtanh.f32 %v490_v61  ;;  %1227 = vadd.xlane.f32.xlu0 %v1159_v35  ;;  %v2746_v35 = vmul.f32 -1.442695, %v318_v52 }
 0x168   :  { %v3029_v2 = vpop.eup %3028  ;;  %v895_v21 = vadd.f32 1.0, %v3027_v15  ;;  %3048 = vtanh.f32 %v298_v63  ;;  %v3826_v28 = vpop.f32.mrb[28].mxu0  ;;  %v1192_v32 = vmul.f32 %v3743_v26, %v1117_v20 }
 0x169   :  { %v3031_v23 = vpop.eup %3030  ;;  %v928_v24 = vadd.f32 1.0, %v3029_v2  ;;  %3050 = vpow2.f32 %v2744_v9  ;;  %v3831_v33 = vpop.f32.mrb[28].mxu1 }
 0x16a   :  { %v3033_v29 = vpop.eup %3032  ;;  %3052 = vrcp.f32 %v895_v21  ;;  %v3833_v3 = vpop.f32.mrb[29].mxu0  ;;  %v1085_v38 = vmul.f32 %v3031_v23, %v3013_v42  ;;  %1293 = vadd.xlane.f32.xlu1 %v1192_v32 }
 0x16b   :  { %v3035_v40 = vpop.eup %3034  ;;  %3054 = vrcp.f32 %v928_v24  ;;  %v3835_v41 = vpop.f32.mrb[29].mxu1 }
 0x16c   :  { %v3037_v22 = vpop.eup %3036  ;;  %3056 = vpow2.f32 %v2777_v13  ;;  %v1118_v43 = vmul.f32 %v3035_v40, %v3021_v0  ;;  %v3839_v17 = vpop.f32.mrb[30].mxu0  ;;  %v1160_v58 = vmul.f32 %v3743_v26, %v1085_v38  ;;  %v502_v0 = vadd.f32 %v3758_v53, %v3702_v62 }
 0x16d   :  { %v3039_v44 = vpop.eup %3038  ;;  %3058 = vtanh.f32 %v496_v25  ;;  %v3841_v49 = vpop.f32.mrb[30].mxu1  ;;  %v324_v13 = vadd.f32 %v3800_v51, %v3699_v60 }
 0x16e   :  { %v3041_v42 = vpop.eup %3040  ;;  %v896_v50 = vadd.f32 1.0, %v3039_v44  ;;  %3060 = vtanh.f32 %v304_v19  ;;  %v1193_v47 = vmul.f32 %v3743_v26, %v1118_v43  ;;  %v3845_v1 = vpop.f32.mrb[31].mxu0  ;;  %1229 = vadd.xlane.f32.xlu1 %v1160_v58  ;;  %v522_v19 = vadd.f32 %v3802_v54, %v3699_v60 }
 0x16f   :  { %v3847_v61 = vpop.f32.mrb[31].mxu1  ;;  %v3043_v63 = vpop.eup %3042  ;;  %3062 = vpow2.f32 %v2745_v39  ;;  %v1086_v5 = vmul.f32 %v3041_v42, %v3025_v18  ;;  %v316_v39 = vadd.f32 %v3783_v30, %v3702_v62  ;;  %v2747_v54 = vmul.f32 -1.442695, %v324_v13 }
 0x170   :  { %v3045_v6 = vpop.eup %3044  ;;  %3064 = vrcp.f32 %v896_v50  ;;  %v929_v7 = vadd.f32 1.0, %v3043_v63  ;;  %1295 = vadd.xlane.f32.xlu0 %v1193_v47  ;;  %v3856_v53 = vpop.f32.mrb[32].mxu0  ;;  %v2780_v58 = vmul.f32 -1.442695, %v522_v19  ;;  %v330_v30 = vadd.f32 %v3816_v48, %v3699_v60 }
 0x171   :  { %v3047_v9 = vpop.eup %3046  ;;  %3066 = vpow2.f32 %v2778_v45  ;;  %v1161_v15 = vmul.f32 %v3743_v26, %v1086_v5  ;;  %v1119_v4 = vmul.f32 %v3045_v6, %v3033_v29  ;;  %v3858_v20 = vpop.f32.mrb[32].mxu1 }
 0x172   :  { %v3049_v37 = vpop.eup %3048  ;;  %3068 = vrcp.f32 %v929_v7  ;;  %v3860_v18 = vpop.f32.mrb[33].mxu0  ;;  %v2748_v13 = vmul.f32 -1.442695, %v330_v30 }
 0x173   :  { %v3862_v2 = vpop.f32.mrb[33].mxu1  ;;  %v3051_v21 = vpop.eup %3050  ;;  %3070 = vtanh.f32 %v502_v0  ;;  %v1194_v23 = vmul.f32 %v3743_v26, %v1119_v4 }
 0x174   :  { %v3053_v24 = vpop.eup %3052  ;;  %v897_v25 = vadd.f32 1.0, %v3051_v21  ;;  %3072 = vtanh.f32 %v310_v8  ;;  %1231 = vadd.xlane.f32.xlu0 %v1161_v15  ;;  %v3871_v38 = vpop.f32.mrb[34].mxu0  ;;  %v514_v8 = vadd.f32 %v3785_v31, %v3702_v62  ;;  %v322_v21 = vadd.f32 %v3795_v36, %v3702_v62 }
 0x175   :  { %v3055_v29 = vpop.eup %3054  ;;  %3074 = vpow2.f32 %v2746_v35  ;;  %1297 = vadd.xlane.f32.xlu1 %v1194_v23  ;;  %v1087_v32 = vmul.f32 %v3053_v24, %v3037_v22  ;;  %v3873_v40 = vpop.f32.mrb[34].mxu1  ;;  %v336_v36 = vadd.f32 %v3833_v3, %v3699_v60 }
 0x176   :  { %v3057_v51 = vpop.eup %3056  ;;  %3076 = vrcp.f32 %v897_v25  ;;  %v1120_v43 = vmul.f32 %v3055_v29, %v3047_v9  ;;  %v3877_v44 = vpop.f32.mrb[35].mxu0  ;;  %v528_v9 = vadd.f32 %v3818_v14, %v3699_v60 }
 0x177   :  { %v3879_v16 = vpop.f32.mrb[35].mxu1  ;;  %v3059_v45 = vpop.eup %3058  ;;  %v930_v52 = vadd.f32 1.0, %v3057_v51  ;;  %3078 = vpow2.f32 %v2779_v12  ;;  %v1162_v22 = vmul.f32 %v3743_v26, %v1087_v32 }
 0x178   :  { %v3061_v42 = vpop.eup %3060  ;;  %3080 = vtanh.f32 %v508_v27  ;;  %v1195_v50 = vmul.f32 %v3743_v26, %v1120_v43  ;;  %v3885_v63 = vpop.f32.mrb[36].mxu0  ;;  %v2781_v19 = vmul.f32 -1.442695, %v528_v9 }
 0x179   :  { %v3063_v47 = vpop.eup %3062  ;;  %3082 = vrcp.f32 %v930_v52  ;;  %1233 = vadd.xlane.f32.xlu1 %v1162_v22  ;;  %v3887_v0 = vpop.f32.mrb[36].mxu1  ;;  %v534_v52 = vadd.f32 %v3835_v41, %v3699_v60 }
 0x17a   :  { %v3065_v34 = vpop.eup %3064  ;;  %v898_v5 = vadd.f32 1.0, %v3063_v47  ;;  %3084 = vtanh.f32 %v316_v39  ;;  %1299 = vadd.xlane.f32.xlu0 %v1195_v50  ;;  %v3889_v6 = vpop.f32.mrb[37].mxu0 }
 0x17b   :  { %v3067_v7 = vpop.eup %3066  ;;  %3086 = vpow2.f32 %v2747_v54  ;;  %v1088_v48 = vmul.f32 %v3065_v34, %v3049_v37  ;;  %v3895_v35 = vpop.f32.mrb[37].mxu1  ;;  %v2782_v9 = vmul.f32 -1.442695, %v534_v52 }
 0x17c   :  { %v3069_v15 = vpop.eup %3068  ;;  %3088 = vrcp.f32 %v898_v5  ;;  %v931_v4 = vadd.f32 1.0, %v3067_v7  ;;  %v3900_v31 = vpop.f32.mrb[38].mxu0  ;;  %v2749_v5 = vmul.f32 -1.442695, %v336_v36 }
 0x17d   :  { %v3071_v12 = vpop.eup %3070  ;;  %3090 = vpow2.f32 %v2780_v58  ;;  %v1163_v23 = vmul.f32 %v3743_v26, %v1088_v48  ;;  %v1121_v24 = vmul.f32 %v3069_v15, %v3059_v45  ;;  %v3902_v25 = vpop.f32.mrb[38].mxu1  ;;  %v520_v45 = vadd.f32 %v3797_v46, %v3702_v62 }
 0x17e   :  { %v3073_v14 = vpop.eup %3072  ;;  %3092 = vrcp.f32 %v931_v4  ;;  %v3904_v37 = vpop.f32.mrb[39].mxu0  ;;  %v328_v58 = vadd.f32 %v3811_v10, %v3702_v62  ;;  %v342_v48 = vadd.f32 %v3845_v1, %v3699_v60  ;;  %v540_v1 = vadd.f32 %v3847_v61, %v3699_v60 }
 0x17f   :  { %v3906_v27 = vpop.f32.mrb[39].mxu1  ;;  %v3075_v29 = vpop.eup %3074  ;;  %3094 = vtanh.f32 %v514_v8  ;;  %1235 = vadd.xlane.f32.xlu0 %v1163_v23  ;;  %v1196_v32 = vmul.f32 %v3743_v26, %v1121_v24 }
 0x180   :  { %v3077_v51 = vpop.eup %3076  ;;  %v899_v39 = vadd.f32 1.0, %v3075_v29  ;;  %3096 = vtanh.f32 %v322_v21  ;;  %v3915_v22 = vpop.f32.mrb[40].mxu0 }
 0x181   :  { %v3079_v43 = vpop.eup %3078  ;;  %3098 = vpow2.f32 %v2748_v13  ;;  %1301 = vadd.xlane.f32.xlu1 %v1196_v32  ;;  %v1089_v54 = vmul.f32 %v3077_v51, %v3061_v42  ;;  %v3917_v50 = vpop.f32.mrb[40].mxu1  ;;  %v526_v13 = vadd.f32 %v3813_v11, %v3702_v62  ;;  %v334_v51 = vadd.f32 %v3826_v28, %v3702_v62 }
 0x182   :  { %v3081_v3 = vpop.eup %3080  ;;  %3100 = vrcp.f32 %v899_v39  ;;  %v932_v47 = vadd.f32 1.0, %v3079_v43  ;;  %v3921_v30 = vpop.f32.mrb[41].mxu0  ;;  %v2750_v11 = vmul.f32 -1.442695, %v342_v48  ;;  %v2783_v28 = vmul.f32 -1.442695, %v540_v1 }
 0x183   :  { %v3923_v34 = vpop.f32.mrb[41].mxu1  ;;  %v3083_v46 = vpop.eup %3082  ;;  %3102 = vpow2.f32 %v2781_v19  ;;  %v1164_v41 = vmul.f32 %v3743_v26, %v1089_v54 }
 0x184   :  { %v3085_v42 = vpop.eup %3084  ;;  %3104 = vrcp.f32 %v932_v47  ;;  %v1122_v7 = vmul.f32 %v3083_v46, %v3071_v12  ;;  %v3928_v10 = vpop.f32.mrb[42].mxu0  ;;  %v348_v46 = vadd.f32 %v3860_v18, %v3699_v60 }
 0x185   :  { %v3087_v8 = vpop.eup %3086  ;;  %3106 = vtanh.f32 %v520_v45  ;;  %1237 = vadd.xlane.f32.xlu1 %v1164_v41  ;;  %v3930_v15 = vpop.f32.mrb[42].mxu1 }
 0x186   :  { %v3089_v4 = vpop.eup %3088  ;;  %v900_v21 = vadd.f32 1.0, %v3087_v8  ;;  %3108 = vtanh.f32 %v328_v58  ;;  %v3934_v23 = vpop.f32.mrb[43].mxu0  ;;  %v1197_v19 = vmul.f32 %v3743_v26, %v1122_v7  ;;  %v532_v8 = vadd.f32 %v3831_v33, %v3702_v62 }
 0x187   :  { %v3936_v12 = vpop.f32.mrb[43].mxu1  ;;  %v3091_v24 = vpop.eup %3090  ;;  %3110 = vpow2.f32 %v2749_v5  ;;  %v1090_v29 = vmul.f32 %v3089_v4, %v3073_v14 }
 0x188   :  { %v3093_v36 = vpop.eup %3092  ;;  %3112 = vrcp.f32 %v900_v21  ;;  %v933_v32 = vadd.f32 1.0, %v3091_v24  ;;  %v3944_v52 = vpop.f32.mrb[44].mxu0  ;;  %v340_v24 = vadd.f32 %v3839_v17, %v3702_v62 }
 0x189   :  { %v3095_v39 = vpop.eup %3094  ;;  %3114 = vpow2.f32 %v2782_v9  ;;  %v1165_v43 = vmul.f32 %v3743_v26, %v1090_v29  ;;  %1303 = vadd.xlane.f32.xlu1 %v1197_v19  ;;  %v1123_v45 = vmul.f32 %v3093_v36, %v3081_v3  ;;  %v3946_v54 = vpop.f32.mrb[44].mxu1  ;;  %v546_v9 = vadd.f32 %v3862_v2, %v3699_v60 }
 0x18a   :  { %v3097_v61 = vpop.eup %3096  ;;  %3116 = vrcp.f32 %v933_v32  ;;  %v3948_v14 = vpop.f32.mrb[45].mxu0  ;;  %v2751_v19 = vmul.f32 -1.442695, %v348_v46 }
 0x18b   :  { %v3950_v47 = vpop.f32.mrb[45].mxu1  ;;  %v3099_v58 = vpop.eup %3098  ;;  %3118 = vtanh.f32 %v526_v13  ;;  %1239 = vadd.xlane.f32.xlu0 %v1165_v43  ;;  %v1198_v5 = vmul.f32 %v3743_v26, %v1123_v45 }
 0x18c   :  { %v3101_v3 = vpop.eup %3100  ;;  %v901_v41 = vadd.f32 1.0, %v3099_v58  ;;  %3120 = vtanh.f32 %v334_v51  ;;  %v3959_v4 = vpop.f32.mrb[46].mxu0  ;;  %v2784_v51 = vmul.f32 -1.442695, %v546_v9  ;;  %v346_v9 = vadd.f32 %v3856_v53, %v3702_v62 }
 0x18d   :  { %v3103_v7 = vpop.eup %3102  ;;  %3122 = vpow2.f32 %v2750_v11  ;;  %1305 = vadd.xlane.f32.xlu1 %v1198_v5  ;;  %v1091_v48 = vmul.f32 %v3101_v3, %v3085_v42  ;;  %v3961_v21 = vpop.f32.mrb[46].mxu1  ;;  %v354_v11 = vadd.f32 %v3877_v44, %v3699_v60  ;;  %v552_v44 = vadd.f32 %v3879_v16, %v3699_v60 }
 0x18e   :  { %v3105_v18 = vpop.eup %3104  ;;  %3124 = vrcp.f32 %v901_v41  ;;  %v934_v13 = vadd.f32 1.0, %v3103_v7  ;;  %v3965_v1 = vpop.f32.mrb[47].mxu0 }
 0x18f   :  { %v3967_v29 = vpop.f32.mrb[47].mxu1  ;;  %v3107_v33 = vpop.eup %3106  ;;  %3126 = vpow2.f32 %v2783_v28  ;;  %v1166_v2 = vmul.f32 %v3743_v26, %v1091_v48  ;;  %v1124_v42 = vmul.f32 %v3105_v18, %v3095_v39  ;;  %v538_v28 = vadd.f32 %v3841_v49, %v3702_v62 }
 0x190   :  { %v3109_v36 = vpop.eup %3108  ;;  %3128 = vrcp.f32 %v934_v13  ;;  %v3972_v17 = vpop.f32.mrb[48].mxu0  ;;  %v2752_v49 = vmul.f32 -1.442695, %v354_v11  ;;  %v2785_v53 = vmul.f32 -1.442695, %v552_v44 }
 0x191   :  { %v3111_v32 = vpop.eup %3110  ;;  %3130 = vtanh.f32 %v532_v8  ;;  %1241 = vadd.xlane.f32.xlu1 %v1166_v2  ;;  %v3974_v43 = vpop.f32.mrb[48].mxu1  ;;  %v1199_v41 = vmul.f32 %v3743_v26, %v1124_v42 }
 0x192   :  { %v3113_v45 = vpop.eup %3112  ;;  %v902_v58 = vadd.f32 1.0, %v3111_v32  ;;  %3132 = vtanh.f32 %v340_v24  ;;  %v3978_v39 = vpop.f32.mrb[49].mxu0  ;;  %v360_v32 = vadd.f32 %v3889_v6, %v3699_v60 }
 0x193   :  { %v3980_v46 = vpop.f32.mrb[49].mxu1  ;;  %v3115_v5 = vpop.eup %3114  ;;  %3134 = vpow2.f32 %v2751_v19  ;;  %v1092_v3 = vmul.f32 %v3113_v45, %v3097_v61 }
 0x194   :  { %v3117_v7 = vpop.eup %3116  ;;  %3136 = vrcp.f32 %v902_v58  ;;  %v935_v8 = vadd.f32 1.0, %v3115_v5  ;;  %v3988_v24 = vpop.f32.mrb[50].mxu0  ;;  %v544_v58 = vadd.f32 %v3858_v20, %v3702_v62  ;;  %v558_v5 = vadd.f32 %v3895_v35, %v3699_v60 }
 0x195   :  { %v3119_v48 = vpop.eup %3118  ;;  %3138 = vpow2.f32 %v2784_v51  ;;  %v1167_v18 = vmul.f32 %v3743_v26, %v1092_v3  ;;  %1307 = vadd.xlane.f32.xlu1 %v1199_v41  ;;  %v1125_v13 = vmul.f32 %v3117_v7, %v3107_v33  ;;  %v3990_v19 = vpop.f32.mrb[50].mxu1  ;;  %v352_v7 = vadd.f32 %v3871_v38, %v3702_v62 }
 0x196   :  { %v3121_v16 = vpop.eup %3120  ;;  %3140 = vrcp.f32 %v935_v8  ;;  %v3992_v61 = vpop.f32.mrb[51].mxu0 }
 0x197   :  { %v3994_v2 = vpop.f32.mrb[51].mxu1  ;;  %v3123_v42 = vpop.eup %3122  ;;  %3142 = vtanh.f32 %v538_v28  ;;  %1243 = vadd.xlane.f32.xlu0 %v1167_v18  ;;  %v1200_v51 = vmul.f32 %v3743_v26, %v1125_v13 }
 0x198   :  { %v3125_v33 = vpop.eup %3124  ;;  %v903_v11 = vadd.f32 1.0, %v3123_v42  ;;  %3144 = vtanh.f32 %v346_v9  ;;  %v4003_v44 = vpop.f32.mrb[52].mxu0  ;;  %v2786_v42 = vmul.f32 -1.442695, %v558_v5 }
 0x199   :  { %v3127_v45 = vpop.eup %3126  ;;  %3146 = vpow2.f32 %v2752_v49  ;;  %1309 = vadd.xlane.f32.xlu1 %v1200_v51  ;;  %v1093_v28 = vmul.f32 %v3125_v33, %v3109_v36  ;;  %v4005_v3 = vpop.f32.mrb[52].mxu1  ;;  %v2753_v49 = vmul.f32 -1.442695, %v360_v32  ;;  %v366_v51 = vadd.f32 %v3904_v37, %v3699_v60 }
 0x19a   :  { %v3129_v6 = vpop.eup %3128  ;;  %3148 = vrcp.f32 %v903_v11  ;;  %v936_v41 = vadd.f32 1.0, %v3127_v45  ;;  %v4009_v8 = vpop.f32.mrb[53].mxu0  ;;  %v564_v37 = vadd.f32 %v3906_v27, %v3699_v60 }
 0x19b   :  { %v4011_v9 = vpop.f32.mrb[53].mxu1  ;;  %v3131_v20 = vpop.eup %3130  ;;  %3150 = vpow2.f32 %v2785_v53  ;;  %v1168_v35 = vmul.f32 %v3743_v26, %v1093_v28  ;;  %v1126_v36 = vmul.f32 %v3129_v6, %v3119_v48  ;;  %v550_v53 = vadd.f32 %v3873_v40, %v3702_v62 }
 0x19c   :  { %v3133_v18 = vpop.eup %3132  ;;  %3152 = vrcp.f32 %v936_v41  ;;  %v4016_v38 = vpop.f32.mrb[54].mxu0  ;;  %v2754_v40 = vmul.f32 -1.442695, %v366_v51 }
 0x19d   :  { %v3135_v13 = vpop.eup %3134  ;;  %3154 = vtanh.f32 %v544_v58  ;;  %1245 = vadd.xlane.f32.xlu1 %v1168_v35  ;;  %v4018_v33 = vpop.f32.mrb[54].mxu1  ;;  %v1201_v28 = vmul.f32 %v3743_v26, %v1126_v36 }
 0x19e   :  { %v3137_v11 = vpop.eup %3136  ;;  %v904_v45 = vadd.f32 1.0, %v3135_v13  ;;  %3156 = vtanh.f32 %v352_v7  ;;  %v4022_v48 = vpop.f32.mrb[55].mxu0  ;;  %v358_v7 = vadd.f32 %v3885_v63, %v3702_v62  ;;  %v2787_v63 = vmul.f32 -1.442695, %v564_v37 }
 0x19f   :  { %v4024_v32 = vpop.f32.mrb[55].mxu1  ;;  %v3139_v58 = vpop.eup %3138  ;;  %3158 = vpow2.f32 %v2753_v49  ;;  %v1094_v5 = vmul.f32 %v3137_v11, %v3121_v16 }
 0x1a0   :  { %v3141_v6 = vpop.eup %3140  ;;  %3160 = vrcp.f32 %v904_v45  ;;  %v937_v41 = vadd.f32 1.0, %v3139_v58  ;;  %v4032_v49 = vpop.f32.mrb[56].mxu0 }
 0x1a1   :  { %v3143_v35 = vpop.eup %3142  ;;  %3162 = vpow2.f32 %v2786_v42  ;;  %v1169_v13 = vmul.f32 %v3743_v26, %v1094_v5  ;;  %1311 = vadd.xlane.f32.xlu1 %v1201_v28  ;;  %v1127_v55 = vmul.f32 %v3141_v6, %v3131_v20  ;;  %v4034_v57 = vpop.f32.mrb[56].mxu1  ;;  %v372_v42 = vadd.f32 %v3921_v30, %v3699_v60 }
 0x1a2   :  { %v3145_v27 = vpop.eup %3144  ;;  %3164 = vrcp.f32 %v937_v41  ;;  %v4036_v16 = vpop.f32.mrb[57].mxu0  ;;  %v556_v5 = vadd.f32 %v3887_v0, %v3702_v62  ;;  %v570_v28 = vadd.f32 %v3923_v34, %v3699_v60  ;;  %v364_v41 = vadd.f32 %v3900_v31, %v3702_v62 }
 0x1a3   :  { %v4038_v36 = vpop.f32.mrb[57].mxu1  ;;  %v3147_v11 = vpop.eup %3146  ;;  %3166 = vtanh.f32 %v550_v53  ;;  %1247 = vadd.xlane.f32.xlu0 %v1169_v13  ;;  %v1202_v51 = vmul.f32 %v3743_v26, %v1127_v55 }
 0x1a4   :  { %v3149_v20 = vpop.eup %3148  ;;  %v905_v45 = vadd.f32 1.0, %v3147_v11  ;;  %3168 = vtanh.f32 %v358_v7  ;;  %v4047_v37 = vpop.f32.mrb[58].mxu0 }
 0x1a5   :  { %v3151_v58 = vpop.eup %3150  ;;  %3170 = vpow2.f32 %v2754_v40  ;;  %1313 = vadd.xlane.f32.xlu1 %v1202_v51  ;;  %v1095_v53 = vmul.f32 %v3149_v20, %v3133_v18  ;;  %v4049_v6 = vpop.f32.mrb[58].mxu1  ;;  %v2755_v40 = vmul.f32 -1.442695, %v372_v42  ;;  %v2788_v20 = vmul.f32 -1.442695, %v570_v28 }
 0x1a6   :  { %4753 = vst [vmem:[#allocation16_spill] sm:$0xff] %v4049_v6  ;;  %v3153_v30 = vpop.eup %3152  ;;  %3172 = vrcp.f32 %v905_v45  ;;  %v938_v55 = vadd.f32 1.0, %v3151_v58  ;;  %v4053_v7 = vpop.f32.mrb[59].mxu0  ;;  %v378_v45 = vadd.f32 %v3934_v23, %v3699_v60  ;;  %v576_v23 = vadd.f32 %v3936_v12, %v3699_v60 }
 0x1a7   :  { %v4055_v13 = vpop.f32.mrb[59].mxu1  ;;  %v3155_v0 = vpop.eup %3154  ;;  %3174 = vpow2.f32 %v2787_v63  ;;  %v1128_v34 = vmul.f32 %v3153_v30, %v3143_v35  ;;  %v1170_v18 = vmul.f32 %v3743_v26, %v1095_v53 }
 0x1a8   :  { %v3157_v11 = vpop.eup %3156  ;;  %3176 = vrcp.f32 %v938_v55  ;;  %v4061_v58 = vpop.f32.mrb[60].mxu0 }
 0x1a9   :  { %v3159_v51 = vpop.eup %3158  ;;  %3178 = vtanh.f32 %v556_v5  ;;  %v1203_v31 = vmul.f32 %v3743_v26, %v1128_v34  ;;  %1249 = vadd.xlane.f32.xlu1 %v1170_v18  ;;  %v4063_v59 = vpop.f32.mrb[60].mxu1  ;;  %v562_v5 = vadd.f32 %v3902_v25, %v3702_v62 }
 0x1aa   :  { %4754 = vst [vmem:[#allocation17_spill] sm:$0xff] %v4063_v59  ;;  %v3161_v63 = vpop.eup %3160  ;;  %v906_v42 = vadd.f32 1.0, %v3159_v51  ;;  %3180 = vtanh.f32 %v364_v41  ;;  %v4065_v35 = vpop.f32.mrb[61].mxu0  ;;  %v370_v41 = vadd.f32 %v3915_v22, %v3702_v62  ;;  %v2756_v51 = vmul.f32 -1.442695, %v378_v45 }
 0x1ab   :  { %v4067_v53 = vpop.f32.mrb[61].mxu1  ;;  %v3163_v30 = vpop.eup %3162  ;;  %3182 = vpow2.f32 %v2755_v40  ;;  %1315 = vadd.xlane.f32.xlu0 %v1203_v31  ;;  %v1096_v28 = vmul.f32 %v3161_v63, %v3145_v27  ;;  %v2789_v27 = vmul.f32 -1.442695, %v576_v23  ;;  %v384_v31 = vadd.f32 %v3948_v14, %v3699_v60  ;;  %v4085_v22 = vld [vmem:[%s4737_s4] ss:$0 sm:$0xff] }
 0x1ac   :  { %v3165_v55 = vpop.eup %3164  ;;  %3184 = vrcp.f32 %v906_v42  ;;  %v939_v34 = vadd.f32 1.0, %v3163_v30  ;;  %v4076_v6 = vpop.f32.mrb[62].mxu0  ;;  %v568_v63 = vadd.f32 %v3917_v50, %v3702_v62  ;;  %v582_v42 = vadd.f32 %v3950_v47, %v3699_v60 }
 0x1ad   :  { %v3167_v18 = vpop.eup %3166  ;;  %3186 = vpow2.f32 %v2788_v20  ;;  %v1171_v56 = vmul.f32 %v3743_v26, %v1096_v28  ;;  %v1129_v59 = vmul.f32 %v3165_v55, %v3155_v0  ;;  %v4078_v40 = vpop.f32.mrb[63].mxu0  ;;  %v2757_v55 = vmul.f32 -1.442695, %v384_v31 }
 0x1ae   :  { %v3169_v25 = vpop.eup %3168  ;;  %3188 = vrcp.f32 %v939_v34  ;;  %v390_v47 = vadd.f32 %v3965_v1, %v3699_v60  ;;  %v382_v1 = vadd.f32 %v3944_v52, %v3702_v62 }
 0x1af   :  { %v3171_v12 = vpop.eup %3170  ;;  %3190 = vtanh.f32 %v562_v5  ;;  %1251 = vadd.xlane.f32.xlu0 %v1171_v56  ;;  %v1204_v26 = vmul.f32 %v4085_v22, %v1129_v59  ;;  %v376_v59 = vadd.f32 %v3928_v10, %v3702_v62 }
 0x1b0   :  { %v3173_v0 = vpop.eup %3172  ;;  %v907_v20 = vadd.f32 1.0, %v3171_v12  ;;  %3192 = vtanh.f32 %v370_v41  ;;  %v4092_v14 = vpop.f32.mrb[64].mxu0 }
 0x1b1   :  { %v3175_v45 = vpop.eup %3174  ;;  %3194 = vpow2.f32 %v2756_v51  ;;  %1317 = vadd.xlane.f32.xlu1 %v1204_v26  ;;  %v1097_v56 = vmul.f32 %v3173_v0, %v3157_v11  ;;  %v4096_v23 = vpop.f32.mrb[65].mxu0  ;;  %v2790_v51 = vmul.f32 -1.442695, %v582_v42  ;;  %v396_v42 = vadd.f32 %v3978_v39, %v3699_v60 }
 0x1b2   :  { %v3177_v30 = vpop.eup %3176  ;;  %3196 = vrcp.f32 %v907_v20  ;;  %v940_v5 = vadd.f32 1.0, %v3175_v45  ;;  %v2758_v45 = vmul.f32 -1.442695, %v390_v47 }
 0x1b3   :  { %v3179_v28 = vpop.eup %3178  ;;  %3198 = vpow2.f32 %v2789_v27  ;;  %v1130_v50 = vmul.f32 %v3177_v30, %v3167_v18  ;;  %v1172_v34 = vmul.f32 %v4085_v22, %v1097_v56  ;;  %v574_v18 = vadd.f32 %v3930_v15, %v3702_v62 }
 0x1b4   :  { %v3181_v41 = vpop.eup %3180  ;;  %3200 = vrcp.f32 %v940_v5  ;;  %v588_v15 = vadd.f32 %v3967_v29, %v3699_v60  ;;  %v388_v29 = vadd.f32 %v3959_v4, %v3702_v62 }
 0x1b5   :  { %v3183_v11 = vpop.eup %3182  ;;  %3202 = vtanh.f32 %v568_v63  ;;  %v1205_v12 = vmul.f32 %v4085_v22, %v1130_v50  ;;  %1253 = vadd.xlane.f32.xlu1 %v1172_v34  ;;  %v2759_v34 = vmul.f32 -1.442695, %v396_v42 }
 0x1b6   :  { %v3185_v10 = vpop.eup %3184  ;;  %v908_v26 = vadd.f32 1.0, %v3183_v11  ;;  %3204 = vtanh.f32 %v376_v59  ;;  %v580_v59 = vadd.f32 %v3946_v54, %v3702_v62  ;;  %v594_v54 = vadd.f32 %v3980_v46, %v3699_v60 }
 0x1b7   :  { %v3187_v0 = vpop.eup %3186  ;;  %3206 = vpow2.f32 %v2757_v55  ;;  %1319 = vadd.xlane.f32.xlu0 %v1205_v12  ;;  %v1098_v27 = vmul.f32 %v3185_v10, %v3169_v25 }
 0x1b8   :  { %v3189_v31 = vpop.eup %3188  ;;  %3208 = vrcp.f32 %v908_v26  ;;  %v941_v20 = vadd.f32 1.0, %v3187_v0 }
 0x1b9   :  { %v3191_v63 = vpop.eup %3190  ;;  %3210 = vpow2.f32 %v2790_v51  ;;  %v1173_v56 = vmul.f32 %v4085_v22, %v1098_v27  ;;  %v1131_v30 = vmul.f32 %v3189_v31, %v3179_v28  ;;  %v2791_v51 = vmul.f32 -1.442695, %v588_v15 }
 0x1ba   :  { %v3193_v5 = vpop.eup %3192  ;;  %3212 = vrcp.f32 %v941_v20  ;;  %v394_v27 = vadd.f32 %v3972_v17, %v3702_v62 }
 0x1bb   :  { %v3195_v25 = vpop.eup %3194  ;;  %3214 = vtanh.f32 %v574_v18  ;;  %1255 = vadd.xlane.f32.xlu0 %v1173_v56  ;;  %v1206_v52 = vmul.f32 %v4085_v22, %v1131_v30 }
 0x1bc   :  { %v3197_v55 = vpop.eup %3196  ;;  %v909_v50 = vadd.f32 1.0, %v3195_v25  ;;  %3216 = vpow2.f32 %v2758_v45  ;;  %v408_v45 = vadd.f32 %v4009_v8, %v3699_v60 }
 0x1bd   :  { %v3199_v39 = vpop.eup %3198  ;;  %3218 = vtanh.f32 %v382_v1  ;;  %1321 = vadd.xlane.f32.xlu1 %v1206_v52  ;;  %v1099_v28 = vmul.f32 %v3197_v55, %v3181_v41  ;;  %v402_v41 = vadd.f32 %v3992_v61, %v3699_v60  ;;  %v2792_v1 = vmul.f32 -1.442695, %v594_v54 }
 0x1be   :  { %v3201_v47 = vpop.eup %3200  ;;  %3220 = vrcp.f32 %v909_v50  ;;  %v942_v11 = vadd.f32 1.0, %v3199_v39  ;;  %v2761_v8 = vmul.f32 -1.442695, %v408_v45  ;;  %v592_v39 = vadd.f32 %v3974_v43, %v3702_v62 }
 0x1bf   :  { %v3203_v12 = vpop.eup %3202  ;;  %3222 = vtanh.f32 %v580_v59  ;;  %v1132_v10 = vmul.f32 %v3201_v47, %v3191_v63  ;;  %v1174_v26 = vmul.f32 %v4085_v22, %v1099_v28  ;;  %v2760_v56 = vmul.f32 -1.442695, %v402_v41 }
 0x1c0   :  { %v3205_v0 = vpop.eup %3204  ;;  %3224 = vrcp.f32 %v942_v11  ;;  %v586_v59 = vadd.f32 %v3961_v21, %v3702_v62  ;;  %v400_v21 = vadd.f32 %v3988_v24, %v3702_v62  ;;  %v414_v47 = vadd.f32 %v4022_v48, %v3699_v60 }
 0x1c1   :  { %v3207_v18 = vpop.eup %3206  ;;  %3226 = vpow2.f32 %v2759_v34  ;;  %v1207_v4 = vmul.f32 %v4085_v22, %v1132_v10  ;;  %1257 = vadd.xlane.f32.xlu1 %v1174_v26  ;;  %v600_v34 = vadd.f32 %v3994_v2, %v3699_v60 }
 0x1c2   :  { %v3209_v31 = vpop.eup %3208  ;;  %v910_v20 = vadd.f32 1.0, %v3207_v18  ;;  %3228 = vpow2.f32 %v2791_v51  ;;  %v2762_v24 = vmul.f32 -1.442695, %v414_v47 }
 0x1c3   :  { %v3211_v46 = vpop.eup %3210  ;;  %3230 = vtanh.f32 %v388_v29  ;;  %1323 = vadd.xlane.f32.xlu0 %v1207_v4  ;;  %v1100_v63 = vmul.f32 %v3209_v31, %v3193_v5  ;;  %v2793_v2 = vmul.f32 -1.442695, %v600_v34  ;;  %v598_v31 = vadd.f32 %v3990_v19, %v3702_v62 }
 0x1c4   :  { %v3213_v61 = vpop.eup %3212  ;;  %3232 = vrcp.f32 %v910_v20  ;;  %v943_v42 = vadd.f32 1.0, %v3211_v46  ;;  %v606_v20 = vadd.f32 %v4011_v9, %v3699_v60 }
 0x1c5   :  { %v3215_v17 = vpop.eup %3214  ;;  %3234 = vtanh.f32 %v394_v27  ;;  %v1175_v30 = vmul.f32 %v4085_v22, %v1100_v63  ;;  %v1133_v15 = vmul.f32 %v3213_v61, %v3203_v12  ;;  %v420_v27 = vadd.f32 %v4036_v16, %v3699_v60 }
 0x1c6   :  { %v3217_v25 = vpop.eup %3216  ;;  %3236 = vrcp.f32 %v943_v42  ;;  %v2794_v9 = vmul.f32 -1.442695, %v606_v20 }
 0x1c7   :  { %v3219_v52 = vpop.eup %3218  ;;  %v911_v55 = vadd.f32 1.0, %v3217_v25  ;;  %3238 = vpow2.f32 %v2792_v1  ;;  %1259 = vadd.xlane.f32.xlu0 %v1175_v30  ;;  %v1208_v5 = vmul.f32 %v4085_v22, %v1133_v15  ;;  %v2763_v16 = vmul.f32 -1.442695, %v420_v27 }
 0x1c8   :  { %v3221_v50 = vpop.eup %3220  ;;  %3240 = vpow2.f32 %v2760_v56  ;;  %v612_v56 = vadd.f32 %v4024_v32, %v3699_v60 }
 0x1c9   :  { %v3223_v28 = vpop.eup %3222  ;;  %3242 = vrcp.f32 %v911_v55  ;;  %1325 = vadd.xlane.f32.xlu1 %v1208_v5  ;;  %v1101_v11 = vmul.f32 %v3221_v50, %v3205_v0  ;;  %v406_v0 = vadd.f32 %v4003_v44, %v3702_v62  ;;  %v418_v50 = vadd.f32 %v4032_v49, %v3702_v62 }
 0x1ca   :  { %v3225_v29 = vpop.eup %3224  ;;  %3244 = vtanh.f32 %v586_v59  ;;  %v2795_v32 = vmul.f32 -1.442695, %v612_v56  ;;  %v432_v49 = vadd.f32 %v4065_v35, %v3699_v60  ;;  %v610_v35 = vadd.f32 %v4018_v33, %v3702_v62 }
 0x1cb   :  { %v3227_v51 = vpop.eup %3226  ;;  %3246 = vpow2.f32 %v2761_v8  ;;  %v1134_v12 = vmul.f32 %v3225_v29, %v3215_v17  ;;  %v1176_v43 = vmul.f32 %v4085_v22, %v1101_v11  ;;  %v616_v33 = vadd.f32 %v4034_v57, %v3702_v62 }
 0x1cc   :  { %v3229_v54 = vpop.eup %3228  ;;  %v912_v10 = vadd.f32 1.0, %v3227_v51  ;;  %3248 = vtanh.f32 %v592_v39  ;;  %v618_v39 = vadd.f32 %v4038_v36, %v3699_v60  ;;  %v424_v57 = vadd.f32 %v4047_v37, %v3702_v62 }
 0x1cd   :  { %v3231_v26 = vpop.eup %3230  ;;  %v944_v41 = vadd.f32 1.0, %v3229_v54  ;;  %3250 = vtanh.f32 %v400_v21  ;;  %v1209_v18 = vmul.f32 %v4085_v22, %v1134_v12  ;;  %1261 = vadd.xlane.f32.xlu1 %v1176_v43  ;;  %v426_v21 = vadd.f32 %v4053_v7, %v3699_v60  ;;  %v4165_v54 = vpop.permute.xlu1 %1424 }
 0x1ce   :  { %v3233_v48 = vpop.eup %3232  ;;  %3252 = vrcp.f32 %v912_v10  ;;  %v2796_v43 = vmul.f32 -1.442695, %v618_v39 }
 0x1cf   :  { %v3235_v4 = vpop.eup %3234  ;;  %3254 = vrcp.f32 %v944_v41  ;;  %1327 = vadd.xlane.f32.xlu0 %v1209_v18  ;;  %v1102_v46 = vmul.f32 %v3233_v48, %v3219_v52  ;;  %v412_v52 = vadd.f32 %v4016_v38, %v3702_v62  ;;  %v604_v38 = vadd.f32 %v4005_v3, %v3702_v62 }
 0x1d0   :  { %v3237_v1 = vpop.eup %3236  ;;  %3256 = vpow2.f32 %v2793_v2  ;;  %v2764_v2 = vmul.f32 -1.442695, %v426_v21  ;;  %v2765_v18 = vmul.f32 -1.442695, %v432_v49  ;;  %v438_v48 = vadd.f32 %v4078_v40, %v3699_v60 }
 0x1d1   :  { %v3239_v45 = vpop.eup %3238  ;;  %3258 = vpow2.f32 %v2762_v24  ;;  %v1177_v63 = vmul.f32 %v4085_v22, %v1102_v46  ;;  %v1135_v44 = vmul.f32 %v3237_v1, %v3223_v28  ;;  %v4175_v1 = vpop.permute.xlu1 %1427 }
 0x1d2   :  { %v3241_v61 = vpop.eup %3240  ;;  %v945_v42 = vadd.f32 1.0, %v3239_v45  ;;  %3260 = vtanh.f32 %v406_v0  ;;  %v2766_v40 = vmul.f32 -1.442695, %v438_v48 }
 0x1d3   :  { %v3243_v19 = vpop.eup %3242  ;;  %v913_v17 = vadd.f32 1.0, %v3241_v61  ;;  %3262 = vtanh.f32 %v598_v31  ;;  %1263 = vadd.xlane.f32.xlu0 %v1177_v63  ;;  %v1210_v30 = vmul.f32 %v4085_v22, %v1135_v44  ;;  %v444_v61 = vadd.f32 %v4096_v23, %v3699_v60 }
 0x1d4   :  { %v3245_v15 = vpop.eup %3244  ;;  %3264 = vrcp.f32 %v945_v42  ;;  %v1103_v25 = vmul.f32 %v3243_v19, %v3231_v26 }
 0x1d5   :  { %v3247_v59 = vpop.eup %3246  ;;  %3266 = vrcp.f32 %v913_v17  ;;  %1329 = vadd.xlane.f32.xlu1 %v1210_v30  ;;  %v430_v17 = vadd.f32 %v4061_v58, %v3702_v62  ;;  %v630_v58 = vadd.f32 %v4067_v53, %v3699_v60  ;;  %v436_v53 = vadd.f32 %v4076_v6, %v3702_v62 }
 0x1d6   :  { %v3249_v55 = vpop.eup %3248  ;;  %v914_v8 = vadd.f32 1.0, %v3247_v59  ;;  %3268 = vpow2.f32 %v2763_v16  ;;  %v1178_v34 = vmul.f32 %v4085_v22, %v1103_v25  ;;  %v624_v16 = vadd.f32 %v4055_v13, %v3699_v60 }
 0x1d7   :  { %v3251_v5 = vpop.eup %3250  ;;  %3270 = vpow2.f32 %v2794_v9  ;;  %v2767_v59 = vmul.f32 -1.442695, %v444_v61 }
 0x1d8   :  { %v3253_v28 = vpop.eup %3252  ;;  %3272 = vrcp.f32 %v914_v8 }
 0x1d9   :  { %v3255_v47 = vpop.eup %3254  ;;  %3274 = vtanh.f32 %v412_v52  ;;  %v1104_v11 = vmul.f32 %v3253_v28, %v3235_v4  ;;  %1265 = vadd.xlane.f32.xlu1 %v1178_v34 }
 0x1da   :  { %v3257_v29 = vpop.eup %3256  ;;  %3276 = vpow2.f32 %v2795_v32  ;;  %v1136_v36 = vmul.f32 %v3255_v47, %v3245_v15 }
 0x1db   :  { %v3259_v51 = vpop.eup %3258  ;;  %v946_v12 = vadd.f32 1.0, %v3257_v29  ;;  %3278 = vtanh.f32 %v418_v50  ;;  %v1179_v3 = vmul.f32 %v4085_v22, %v1104_v11  ;;  %v2798_v11 = vmul.f32 -1.442695, %v630_v58 }
 0x1dc   :  { %v3261_v10 = vpop.eup %3260  ;;  %v915_v7 = vadd.f32 1.0, %v3259_v51  ;;  %3280 = vtanh.f32 %v604_v38  ;;  %v1211_v26 = vmul.f32 %v4085_v22, %v1136_v36 }
 0x1dd   :  { %v3263_v41 = vpop.eup %3262  ;;  %3282 = vrcp.f32 %v946_v12  ;;  %1267 = vadd.xlane.f32.xlu0 %v1179_v3 }
 0x1de   :  { %v3265_v24 = vpop.eup %3264  ;;  %3284 = vrcp.f32 %v915_v7  ;;  %1331 = vadd.xlane.f32.xlu1 %v1211_v26  ;;  %v4200_v7 = vpop.permute.xlu0 %1354 }
 0x1df   :  { %v3267_v0 = vpop.eup %3266  ;;  %3286 = vpow2.f32 %v2796_v43  ;;  %v1137_v27 = vmul.f32 %v3265_v24, %v3249_v55  ;;  %v2797_v55 = vmul.f32 -1.442695, %v624_v16  ;;  %v4755_v24 = vld [vmem:[#allocation16_spill] sm:$0xff] }
 0x1e0   :  { %v3269_v4 = vpop.eup %3268  ;;  %3288 = vpow2.f32 %v2764_v2  ;;  %v1105_v31 = vmul.f32 %v3267_v0, %v3251_v5 }
 0x1e1   :  { %v3271_v20 = vpop.eup %3270  ;;  %v916_v46 = vadd.f32 1.0, %v3269_v4  ;;  %3290 = vtanh.f32 %v610_v35  ;;  %v1212_v45 = vmul.f32 %v4085_v22, %v1137_v27  ;;  %v4188_v25 = vpop.xlane.xlu1 %1285 }
 0x1e2   :  { %v3273_v63 = vpop.eup %3272  ;;  %v947_v44 = vadd.f32 1.0, %v3271_v20  ;;  %3292 = vpow2.f32 %v2765_v18  ;;  %v1180_v15 = vmul.f32 %v4085_v22, %v1105_v31  ;;  %v622_v18 = vadd.f32 %v4755_v24, %v3702_v62 }
 0x1e3   :  { %v3275_v42 = vpop.eup %3274  ;;  %3294 = vrcp.f32 %v916_v46  ;;  %v1106_v56 = vmul.f32 %v3273_v63, %v3261_v10  ;;  %1333 = vadd.xlane.f32.xlu1 %v1212_v45  ;;  %v4210_v45 = vpop.xlane.xlu0 %1219 }
 0x1e4   :  { %v3277_v19 = vpop.eup %3276  ;;  %3296 = vrcp.f32 %v947_v44  ;;  %v4756_v44 = vld [vmem:[#allocation17_spill] sm:$0xff] }
 0x1e5   :  { %v3279_v9 = vpop.eup %3278  ;;  %v948_v30 = vadd.f32 1.0, %v3277_v19  ;;  %3298 = vtanh.f32 %v616_v33  ;;  %v1181_v23 = vmul.f32 %v4085_v22, %v1106_v56 }
 0x1e6   :  { %v3281_v13 = vpop.eup %3280  ;;  %3300 = vpow2.f32 %v2766_v40  ;;  %v628_v40 = vadd.f32 %v4756_v44, %v3702_v62  ;;  %v4758_v44 = vld [vmem:[#allocation13_spill] sm:$0xff] }
 0x1e7   :  { %v3283_v52 = vpop.eup %3282  ;;  %3302 = vrcp.f32 %v948_v30  ;;  %1271 = vadd.xlane.f32.xlu0 %v1181_v23  ;;  %1269 = vadd.xlane.f32.xlu1 %v1180_v15  ;;  %v1222_v15 = vpop.xlane.xlu0 %1221 }
 0x1e8   :  { %v3285_v37 = vpop.eup %3284  ;;  %3304 = vtanh.f32 %v424_v57  ;;  %v1138_v8 = vmul.f32 %v3283_v52, %v3263_v41  ;;  %v4192_v50 = vpop.xlane.xlu1 %1223  ;;  %v442_v41 = vadd.f32 %v4092_v14, %v3702_v62 }
 0x1e9   :  { %v3287_v32 = vpop.eup %3286  ;;  %3306 = vtanh.f32 %v430_v17  ;;  %v1107_v5 = vmul.f32 %v3285_v37, %v3275_v42 }
 0x1ea   :  { %v3289_v39 = vpop.eup %3288  ;;  %v949_v34 = vadd.f32 1.0, %v3287_v32  ;;  %3308 = vpow2.f32 %v2767_v59  ;;  %v1213_v28 = vmul.f32 %v4085_v22, %v1138_v8 }
 0x1eb   :  { %v3291_v38 = vpop.eup %3290  ;;  %v917_v21 = vadd.f32 1.0, %v3289_v39  ;;  %3310 = vpow2.f32 %v2797_v55  ;;  %v1182_v46 = vmul.f32 %v4085_v22, %v1107_v5  ;;  %v4220_v39 = vpop.xlane.xlu0 %1287 }
 0x1ec   :  { %v3293_v47 = vpop.eup %3292  ;;  %3312 = vrcp.f32 %v949_v34  ;;  %1335 = vadd.xlane.f32.xlu1 %v1213_v28  ;;  %v4197_v49 = vpop.xlane.xlu1 %1289 }
 0x1ed   :  { %v3295_v29 = vpop.eup %3294  ;;  %3314 = vrcp.f32 %v917_v21  ;;  %v918_v60 = vadd.f32 1.0, %v3293_v47 }
 0x1ee   :  { %v3297_v36 = vpop.eup %3296  ;;  %v1108_v51 = vmul.f32 %v3295_v29, %v3279_v9 }
 0x1ef   :  { %v3299_v12 = vpop.eup %3298  ;;  %3316 = vrcp.f32 %v918_v60  ;;  %v1139_v43 = vmul.f32 %v3297_v36, %v3281_v13  ;;  %v4226_v60 = vpop.xlane.xlu0 %1291 }
 0x1f0   :  { %v3301_v3 = vpop.eup %3300  ;;  %3318 = vpow2.f32 %v2798_v11  ;;  %v1183_v10 = vmul.f32 %v4085_v22, %v1108_v51  ;;  %v4207_v27 = vpop.xlane.xlu1 %1225 }
 0x1f1   :  { %v3303_v2 = vpop.eup %3302  ;;  %3320 = vtanh.f32 %v436_v53  ;;  %v919_v26 = vadd.f32 1.0, %v3301_v3  ;;  %v1214_v6 = vmul.f32 %v4085_v22, %v1139_v43 }
 0x1f2   :  { %v3305_v35 = vpop.eup %3304  ;;  %1275 = vadd.xlane.f32.xlu0 %v1183_v10  ;;  %v1140_v48 = vmul.f32 %v3303_v2, %v3291_v38 }
 0x1f3   :  { %v3307_v0 = vpop.eup %3306  ;;  %3322 = vrcp.f32 %v919_v26  ;;  %1337 = vadd.xlane.f32.xlu1 %v1214_v6  ;;  %v1147_v26 = vld [vmem:[%s4734_s1 + $0x18] sm:$0xff] }
 0x1f4   :  { %v3309_v4 = vpop.eup %3308  ;;  %3324 = vtanh.f32 %v442_v41  ;;  %v1215_v19 = vmul.f32 %v4085_v22, %v1140_v48 }
 0x1f5   :  { %v3311_v31 = vpop.eup %3310  ;;  %v920_v20 = vadd.f32 1.0, %v3309_v4  ;;  %3326 = vtanh.f32 %v622_v18  ;;  %v4757_v4 = vlaneseq }
 0x1f6   :  { %v3313_v14 = vpop.eup %3312  ;;  %v950_v33 = vadd.f32 1.0, %v3311_v31 }
 0x1f7   :  { %v3315_v63 = vpop.eup %3314  ;;  %3328 = vrcp.f32 %v920_v20  ;;  %v1141_v61 = vmul.f32 %v3313_v14, %v3299_v12  ;;  %1273 = vadd.xlane.f32.xlu1 %v1182_v46  ;;  %v4216_v57 = vpop.xlane.xlu1 %1293  ;;  %v4251_v31 = vand.u32 127, %v4757_v4 }
 0x1f8   :  { %3330 = vrcp.f32 %v950_v33  ;;  %v1109_v42 = vmul.f32 %v3315_v63, %v3305_v35  ;;  %v1228_v12 = vpop.xlane.xlu0 %1227  ;;  %v1360_v33 = vadd.f32 %v4200_v7, %v4207_v27 }
 0x1f9   :  { %v3317_v16 = vpop.eup %3316  ;;  %v1216_v56 = vmul.f32 %v4085_v22, %v1141_v61  ;;  %3332 = vtanh.f32 %v628_v40  ;;  %v1507_v20 = vadd.s32 4294967288, %v4251_v31  ;;  %v1358_v61 = vadd.f32 %v4200_v7, %v1222_v15 }
 0x1fa   :  { %v3319_v17 = vpop.eup %3318  ;;  %v1110_v9 = vmul.f32 %v3317_v16, %v3307_v0  ;;  %v1184_v59 = vmul.f32 %v4085_v22, %v1109_v42  ;;  %v1359_v42 = vadd.f32 %v4200_v7, %v4192_v50  ;;  %vm1435_vm8 = vcmp.lt.s32.totalorder %v4251_v31, %v4165_v54 }
 0x1fb   :  { %v3321_v30 = vpop.eup %3320  ;;  %v951_v23 = vadd.f32 1.0, %v3319_v17  ;;  %1341 = vadd.xlane.f32.xlu0 %v1216_v56  ;;  %1339 = vadd.xlane.f32.xlu1 %v1215_v19  ;;  %v1230_v52 = vpop.xlane.xlu1 %1229  ;;  %v4258_v40 = vsub.s32 %v1507_v20, %v4758_v44  ;;  %v4266_v56 = vsub.s32 %v4251_v31, %v4758_v44  ;;  %v1361_v19 = vadd.f32 %v4200_v7, %v1228_v12 }
 0x1fc   :  { %v1185_v62 = vmul.f32 %v4085_v22, %v1110_v9  ;;  %v1362_v63 = vadd.f32 %v4200_v7, %v1230_v52  ;;  %vm1436_vm11 = vcmp.lt.s32.totalorder %v4251_v31, %v4175_v1 }
 0x1fd   :  { %v3323_v13 = vpop.eup %3322  ;;  %3334 = vrcp.f32 %v951_v23  ;;  %v4232_v10 = vpop.xlane.xlu0 %1295  ;;  %v1521_v23 = vrot.slane %v1360_v33, %v4258_v40  ;;  %v1511_v52 = vrot.slane %v1358_v61, %v4258_v40 }
 0x1fe   :  { %v1111_v55 = vmul.f32 %v3323_v13, %v3321_v30  ;;  %v3325_v37 = vpop.eup %3324  ;;  %v1357_v30 = vadd.f32 %v4200_v7, %v4210_v45  ;;  %v1530_v15 = vrot.slane %v1362_v63, %v4258_v40 }
 0x1ff   :  { %1279 = vadd.xlane.f32.xlu0 %v1185_v62  ;;  %1277 = vadd.xlane.f32.xlu1 %v1184_v59  ;;  %v3327_v58 = vpop.eup %3326 }
 0x200   :  { %v1186_v51 = vmul.f32 %v4085_v22, %v1111_v55  ;;  %v1517_v55 = vrot.slane %v1359_v42, %v4266_v56 }
 0x201   :  { %v3329_v8 = vpop.eup %3328  ;;  %v1232_v41 = vpop.xlane.xlu0 %1231 }
 0x202   :  { %v3331_v32 = vpop.eup %3330  ;;  %v1112_v5 = vmul.f32 %v3329_v8, %v3325_v37  ;;  %v4222_v34 = vpop.xlane.xlu1 %1297  ;;  %v1363_v50 = vadd.f32 %v4200_v7, %v1232_v41 }
 0x203   :  { %v1142_v28 = vmul.f32 %v3331_v32, %v3327_v58  ;;  %v3333_v21 = vpop.eup %3332  ;;  %v1526_v58 = vrot.slane %v1361_v19, %v4266_v56 }
 0x204   :  { %v1187_v38 = vmul.f32 %v4085_v22, %v1112_v5 }
 0x205   :  { %v1217_v47 = vmul.f32 %v4085_v22, %v1142_v28 }
 0x206   :  { %1283 = vadd.xlane.f32.xlu0 %v1187_v38  ;;  %v1234_v53 = vpop.xlane.xlu1 %1233  ;;  %v1506_v38 = vrot.slane %v1357_v30, %v4266_v56 }
 0x207   :  { %v3335_v11 = vpop.eup %3334  ;;  %1343 = vadd.xlane.f32.xlu1 %v1217_v47  ;;  %v4244_v24 = vpop.xlane.xlu0 %1299  ;;  %v1364_v16 = vadd.f32 %v4200_v7, %v1234_v53  ;;  %v1535_v47 = vrot.slane %v1363_v50, %v4266_v56 }
 0x208   :  { %v1143_v29 = vmul.f32 %v3335_v11, %v3333_v21  ;;  %v1522_v21 = vsel %vm1512_vm0, %v1521_v23, %v1517_v55 }
 0x209   :  { %v1539_v37 = vrot.slane %v1364_v16, %v4258_v40 }
 0x20a   :  { %v1218_v36 = vmul.f32 %v4085_v22, %v1143_v29  ;;  %v1146_v22 = vld [vmem:[%s4734_s1 + $0x10] sm:$0xff]  ;;  %v1531_v29 = vsel %vm1512_vm0, %v1530_v15, %v1526_v58 }
 0x20b   :  { %v1540_v12 = vsel %vm1512_vm0, %v1539_v37, %v1535_v47 }
 0x20c   :  { %1345 = vadd.xlane.f32.xlu1 %v1218_v36  ;;  %v1236_v48 = vpop.xlane.xlu0 %1235 }
 0x20d   :  { %v1365_v13 = vadd.f32 %v4200_v7, %v1236_v48 }
 0x20e   :  { %v4230_v43 = vpop.xlane.xlu1 %1301 }
 0x20f   :  { %v1544_v53 = vrot.slane %v1365_v13, %v4266_v56 }
 0x210   :  { %1281 = vadd.xlane.f32.xlu1 %v1186_v51  ;;  %v1513_v51 = vsel %vm1512_vm0, %v1511_v52, %v1506_v38 }
 0x211   :  { %v1794_v41 = vsel %vm1793_vm1, %v1522_v21, %v1513_v51  ;;  %v1392_v51 = vadd.f32 %v4200_v7, %v4197_v49  ;;  %v1393_v49 = vadd.f32 %v4200_v7, %v4226_v60 }
 0x212   :  { %v1238_v3 = vpop.xlane.xlu1 %1237  ;;  %v1796_v4 = vsel %vm1795_vm2, %v1531_v29, %v1794_v41 }
 0x213   :  { %v1366_v27 = vadd.f32 %v4200_v7, %v1238_v3  ;;  %v1665_v60 = vrot.slane %v1392_v51, %v4258_v40 }
 0x215   :  { %v1548_v8 = vrot.slane %v1366_v27, %v4258_v40 }
 0x216   :  { %v4234_v2 = vpop.xlane.xlu1 %1303 }
 0x218   :  { %v1240_v46 = vpop.xlane.xlu0 %1239 }
 0x219   :  { %v1367_v45 = vadd.f32 %v4200_v7, %v1240_v46 }
 0x21a   :  { %v4239_v6 = vpop.xlane.xlu1 %1305 }
 0x21b   :  { %v1553_v3 = vrot.slane %v1367_v45, %v4266_v56  ;;  %v1400_v41 = vadd.f32 %v4200_v7, %v4239_v6  ;;  %v1397_v6 = vadd.f32 %v4200_v7, %v4244_v24 }
 0x21c   :  { %1433 = vperm.xlu0 %2950, %v1147_v26  }
 0x21e   :  { %v1242_v35 = vpop.xlane.xlu1 %1241 }
 0x21f   :  { %v1368_v62 = vadd.f32 %v4200_v7, %v1242_v35 }
 0x221   :  { %1430 = vperm.xlu1 %2951, %v1146_v22   ;;  %v1557_v11 = vrot.slane %v1368_v62, %v4258_v40  ;;  %v1549_v22 = vsel %vm1512_vm0, %v1548_v8, %v1544_v53 }
 0x222   :  { %v4246_v18 = vpop.xlane.xlu1 %1307 }
 0x223   :  { %v1558_v20 = vsel %vm1512_vm0, %v1557_v11, %v1553_v3  ;;  %v1396_v3 = vadd.f32 %v4200_v7, %v4222_v34 }
 0x224   :  { %v1244_v17 = vpop.xlane.xlu0 %1243 }
 0x225   :  { %v1369_v32 = vadd.f32 %v4200_v7, %v1244_v17 }
 0x226   :  { %v4248_v0 = vpop.xlane.xlu1 %1309 }
 0x227   :  { %v1562_v35 = vrot.slane %v1369_v32, %v4266_v56  ;;  %v1402_v34 = vadd.f32 %v4200_v7, %v4248_v0  ;;  %v1401_v0 = vadd.f32 %v4200_v7, %v4246_v18  ;;  %v1688_v18 = vrot.slane %v1397_v6, %v4266_v56 }
 0x22a   :  { %v1246_v14 = vpop.xlane.xlu1 %1245 }
 0x22b   :  { %v1370_v59 = vadd.f32 %v4200_v7, %v1246_v14  ;;  %v1798_v14 = vsel %vm1797_vm3, %v1540_v12, %v1796_v4  ;;  %v1394_v12 = vadd.f32 %v4200_v7, %v4216_v57  ;;  %v1395_v57 = vadd.f32 %v4200_v7, %v4232_v10 }
 0x22c   :  { %v1800_v42 = vsel %vm1799_vm4, %v1549_v22, %v1798_v14  ;;  %v1683_v10 = vrot.slane %v1396_v3, %v4258_v40  ;;  %v1670_v14 = vrot.slane %v1393_v49, %v4266_v56 }
 0x22d   :  { %v1566_v36 = vrot.slane %v1370_v59, %v4258_v40  ;;  %v1802_v16 = vsel %vm1801_vm5, %v1558_v20, %v1800_v42  ;;  %v1674_v4 = vrot.slane %v1394_v12, %v4258_v40 }
 0x22e   :  { %v4270_v9 = vpop.xlane.xlu1 %1311 }
 0x22f   :  { %v1567_v33 = vsel %vm1512_vm0, %v1566_v36, %v1562_v35  ;;  %v1391_v35 = vadd.f32 %v4200_v7, %v4220_v39  ;;  %v1399_v39 = vadd.f32 %v4200_v7, %v4234_v2  ;;  %v1679_v2 = vrot.slane %v1395_v57, %v4266_v56 }
 0x230   :  { %v1248_v5 = vpop.xlane.xlu0 %1247  ;;  %v1804_v27 = vsel %vm1803_vm6, %v1567_v33, %v1802_v16  ;;  %v1710_v33 = vrot.slane %v1402_v34, %v4258_v40  ;;  %v4394_v16 = vadd.f32 %v4200_v7, %v4270_v9 }
 0x231   :  { %v1371_v26 = vadd.f32 %v4200_v7, %v1248_v5  ;;  %v1661_v24 = vrot.slane %v1391_v35, %v4266_v56  ;;  %v1697_v42 = vrot.slane %v1399_v39, %v4266_v56 }
 0x232   :  { %v4287_v28 = vpop.xlane.xlu1 %1313  ;;  %v1715_v34 = vrot.slane %v4394_v16, %v4266_v56 }
 0x233   :  { %v1571_v63 = vrot.slane %v1371_v26, %v4266_v56  ;;  %v1398_v26 = vadd.f32 %v4200_v7, %v4230_v43  ;;  %v4367_v43 = vadd.f32 %v4200_v7, %v4188_v25  ;;  %v1701_v25 = vrot.slane %v1400_v41, %v4258_v40 }
 0x235   :  { %v1692_v20 = vrot.slane %v1398_v26, %v4258_v40  ;;  %v4410_v12 = vsel %vm1512_vm0, %v1701_v25, %v1697_v42 }
 0x236   :  { %v1250_v48 = vpop.xlane.xlu1 %1249 }
 0x237   :  { %v1372_v46 = vadd.f32 %v4200_v7, %v1250_v48  ;;  %v4407_v51 = vsel %vm1512_vm0, %v1692_v20, %v1688_v18 }
 0x238   :  { %v4323_v13 = vpop.xlane.xlu0 %1315 }
 0x239   :  { %v1575_v61 = vrot.slane %v1372_v46, %v4258_v40 }
 0x23b   :  { %v1576_v19 = vsel %vm1512_vm0, %v1575_v61, %v1571_v63  ;;  %v1656_v61 = vrot.slane %v4367_v43, %v4258_v40 }
 0x23c   :  { %v1806_v17 = vsel %vm1805_vm7, %v1576_v19, %v1804_v27  ;;  %v4325_v52 = vpop.xlane.xlu0 %1251  ;;  %v4397_v19 = vsel %vm1512_vm0, %v1665_v60, %v1661_v24  ;;  %v4400_v27 = vsel %vm1512_vm0, %v1674_v4, %v1670_v14  ;;  %v4436_v4 = vadd.f32 %v4200_v7, %v4287_v28 }
 0x23d   :  { %v4319_v23 = vsel %vm1435_vm8, %v1806_v17, -inf  ;;  %v4403_v17 = vsel %vm1512_vm0, %v1683_v10, %v1679_v2 }
 0x23e   :  { %v4317_v30 = vpop.xlane.xlu1 %1317  ;;  %v1837_v50 = vsel %vm1836_vm9, %v4319_v23, -inf }
 0x23f   :  { %v1406_v26 = vadd.f32 %v4200_v7, %v4317_v30  ;;  %v1405_v30 = vadd.f32 %v4200_v7, %v4323_v13 }
 0x241   :  { %v1728_v10 = vrot.slane %v1406_v26, %v4258_v40  ;;  %v1724_v20 = vrot.slane %v1405_v30, %v4266_v56 }
 0x242   :  { %v1254_v62 = vpop.xlane.xlu1 %1253 }
 0x243   :  { %v1374_v41 = vadd.f32 %v4200_v7, %v1254_v62  ;;  %v1373_v62 = vadd.f32 %v4200_v7, %v4325_v52 }
 0x244   :  { %v1320_v37 = vpop.xlane.xlu0 %1319 }
 0x245   :  { %1838 = vmax.xlane.f32.xlu1 %v1837_v50  ;;  %v1706_v50 = vrot.slane %v1401_v0, %v4266_v56  ;;  %v1407_v6 = vadd.f32 %v4200_v7, %v1320_v37  ;;  %v1584_v13 = vrot.slane %v1374_v41, %v4258_v40  ;;  %v1580_v25 = vrot.slane %v1373_v62, %v4266_v56 }
 0x246   :  { %v1729_v41 = vsel %vm1512_vm0, %v1728_v10, %v1724_v20 }
 0x247   :  { %v4419_v57 = vsel %vm1512_vm0, %v1710_v33, %v1706_v50 }
 0x248   :  { %v1256_v54 = vpop.xlane.xlu0 %1255 }
 0x24a   :  { %v1322_v15 = vpop.xlane.xlu1 %1321 }
 0x24b   :  { %v1408_v9 = vadd.f32 %v4200_v7, %v1322_v15  ;;  %v1375_v15 = vadd.f32 %v4200_v7, %v1256_v54 }
 0x24d   :  { %v1589_v28 = vrot.slane %v1375_v15, %v4266_v56 }
 0x24e   :  { %v1258_v59 = vpop.xlane.xlu1 %1257 }
 0x24f   :  { %v1376_v3 = vadd.f32 %v4200_v7, %v1258_v59 }
 0x250   :  { %v1324_v8 = vpop.xlane.xlu0 %1323 }
 0x251   :  { %v1593_v54 = vrot.slane %v1376_v3, %v4258_v40 }
 0x253   :  { %v1594_v42 = vsel %vm1512_vm0, %v1593_v54, %v1589_v28 }
 0x254   :  { %v1260_v5 = vpop.xlane.xlu0 %1259 }
 0x255   :  { %v1377_v37 = vadd.f32 %v4200_v7, %v1260_v5 }
 0x256   :  { %v1326_v55 = vpop.xlane.xlu1 %1325 }
 0x257   :  { %v1410_v35 = vadd.f32 %v4200_v7, %v1326_v55  ;;  %v1409_v55 = vadd.f32 %v4200_v7, %v1324_v8  ;;  %v1598_v2 = vrot.slane %v1377_v37, %v4266_v56 }
 0x259   :  { %v1746_v8 = vrot.slane %v1410_v35, %v4258_v40  ;;  %v1742_v24 = vrot.slane %v1409_v55, %v4266_v56  ;;  %v1585_v35 = vsel %vm1512_vm0, %v1584_v13, %v1580_v25 }
 0x25a   :  { %v1262_v45 = vpop.xlane.xlu1 %1261 }
 0x25b   :  { %v1378_v59 = vadd.f32 %v4200_v7, %v1262_v45  ;;  %v1737_v45 = vrot.slane %v1408_v9, %v4258_v40  ;;  %v1747_v3 = vsel %vm1512_vm0, %v1746_v8, %v1742_v24 }
 0x25c   :  { %v4333_v47 = vpop.xlane.xlu0 %1327 }
 0x25d   :  { %v1411_v52 = vadd.f32 %v4200_v7, %v4333_v47  ;;  %v1602_v0 = vrot.slane %v1378_v59, %v4258_v40  ;;  %v1807_v59 = vsel %vm1793_vm1, %v1594_v42, %v1585_v35 }
 0x25f   :  { %v1751_v9 = vrot.slane %v1411_v52, %v4266_v56 }
 0x260   :  { %v4337_v29 = vpop.xlane.xlu0 %1263 }
 0x261   :  { %v1379_v18 = vadd.f32 %v4200_v7, %v4337_v29 }
 0x262   :  { %v1330_v58 = vpop.xlane.xlu1 %1329 }
 0x263   :  { %v1412_v60 = vadd.f32 %v4200_v7, %v1330_v58  ;;  %v1733_v58 = vrot.slane %v1407_v6, %v4266_v56  ;;  %v1603_v6 = vsel %vm1512_vm0, %v1602_v0, %v1598_v2  ;;  %v1607_v55 = vrot.slane %v1379_v18, %v4266_v56 }
 0x264   :  { %v1808_v54 = vsel %vm1795_vm2, %v1603_v6, %v1807_v59 }
 0x265   :  { %v1755_v14 = vrot.slane %v1412_v60, %v4258_v40  ;;  %v1738_v33 = vsel %vm1512_vm0, %v1737_v45, %v1733_v58 }
 0x266   :  { %v4327_v32 = vpop.xlane.xlu1 %1265  ;;  %v1821_v15 = vsel %vm1793_vm1, %v1738_v33, %v1729_v41 }
 0x267   :  { %v1380_v5 = vadd.f32 %v4200_v7, %v4327_v32  ;;  %v1719_v32 = vrot.slane %v4436_v4, %v4258_v40  ;;  %v1756_v30 = vsel %vm1512_vm0, %v1755_v14, %v1751_v9 }
 0x269   :  { %v1611_v29 = vrot.slane %v1380_v5, %v4258_v40 }
 0x26a   :  { %v4341_v36 = vpop.xlane.xlu0 %1267 }
 0x26b   :  { %v4329_v38 = vpop.xlane.xlu1 %1331  ;;  %v1381_v60 = vadd.f32 %v4200_v7, %v4341_v36  ;;  %v1612_v58 = vsel %vm1512_vm0, %v1611_v29, %v1607_v55 }
 0x26c   :  { %v1413_v62 = vadd.f32 %v4200_v7, %v4329_v38 }
 0x26d   :  { %v1616_v20 = vrot.slane %v1381_v60, %v4266_v56 }
 0x26e   :  { %v1760_v28 = vrot.slane %v1413_v62, %v4266_v56 }
 0x270   :  { %v4331_v21 = vpop.xlane.xlu1 %1333 }
 0x271   :  { %v1414_v26 = vadd.f32 %v4200_v7, %v4331_v21  ;;  %v1822_v21 = vsel %vm1795_vm2, %v1747_v3, %v1821_v15 }
 0x272   :  { %v1823_v8 = vsel %vm1797_vm3, %v1756_v30, %v1822_v21 }
 0x273   :  { %v1764_v13 = vrot.slane %v1414_v26, %v4258_v40 }
 0x274   :  { %v4335_v11 = vpop.xlane.xlu1 %1269  ;;  %v4353_v22 = vpop.xlane.xlu0 %1271 }
 0x275   :  { %v1382_v37 = vadd.f32 %v4200_v7, %v4335_v11  ;;  %v1383_v10 = vadd.f32 %v4200_v7, %v4353_v22  ;;  %v1765_v14 = vsel %vm1512_vm0, %v1764_v13, %v1760_v28 }
 0x277   :  { %v1620_v24 = vrot.slane %v1382_v37, %v4258_v40 }
 0x279   :  { %v4339_v53 = vpop.xlane.xlu1 %1335  ;;  %v1621_v3 = vsel %vm1512_vm0, %v1620_v24, %v1616_v20 }
 0x27f   :  { %v4380_v46 = vpop.xlane.xlu0 %1275 }
 0x280   :  { %v4363_v48 = vpop.xlane.xlu1 %1337  ;;  %v1385_v25 = vadd.f32 %v4200_v7, %v4380_v46 }
 0x281   :  { %v1416_v36 = vadd.f32 %v4200_v7, %v4363_v48  ;;  %v1415_v48 = vadd.f32 %v4200_v7, %v4339_v53 }
 0x284   :  { %v4386_v63 = vpop.xlane.xlu1 %1273 }
 0x285   :  { %v1384_v11 = vadd.f32 %v4200_v7, %v4386_v63  ;;  %v1625_v63 = vrot.slane %v1383_v10, %v4266_v56 }
 0x287   :  { %v1629_v33 = vrot.slane %v1384_v11, %v4258_v40 }
 0x288   :  { %v1340_v49 = vpop.xlane.xlu1 %1339  ;;  %v4426_v39 = vpop.xlane.xlu0 %1341 }
 0x289   :  { %v1417_v22 = vadd.f32 %v4200_v7, %v1340_v49  ;;  %v1418_v2 = vadd.f32 %v4200_v7, %v4426_v39  ;;  %v1630_v15 = vsel %vm1512_vm0, %v1629_v33, %v1625_v63 }
 0x28b   :  { %v1778_v39 = vrot.slane %v1417_v22, %v4266_v56  ;;  %v1782_v41 = vrot.slane %v1418_v2, %v4258_v40 }
 0x28c   :  { %v1278_v47 = vpop.xlane.xlu1 %1277  ;;  %v1280_v50 = vpop.xlane.xlu0 %1279 }
 0x28d   :  { %v1386_v5 = vadd.f32 %v4200_v7, %v1278_v47  ;;  %v1773_v47 = vrot.slane %v1416_v36, %v4258_v40  ;;  %v1387_v35 = vadd.f32 %v4200_v7, %v1280_v50  ;;  %v1783_v21 = vsel %vm1512_vm0, %v1782_v41, %v1778_v39 }
 0x28f   :  { %v1638_v9 = vrot.slane %v1386_v5, %v4258_v40  ;;  %v1643_v10 = vrot.slane %v1387_v35, %v4266_v56 }
 0x293   :  { %v1284_v45 = vpop.xlane.xlu0 %1283 }
 0x294   :  { %v1389_v38 = vadd.f32 %v4200_v7, %v1284_v45  ;;  %v1344_v52 = vpop.xlane.xlu1 %1343  ;;  %v1824_v45 = vsel %vm1799_vm4, %v1765_v14, %v1823_v8 }
 0x295   :  { %v1419_v53 = vadd.f32 %v4200_v7, %v1344_v52 }
 0x296   :  { %v1652_v0 = vrot.slane %v1389_v38, %v4266_v56 }
 0x297   :  { %v1787_v59 = vrot.slane %v1419_v53, %v4266_v56 }
 0x298   :  { %v1657_v49 = vsel %vm1512_vm0, %v1656_v61, %v1652_v0  ;;  %v1634_v61 = vrot.slane %v1385_v25, %v4266_v56 }
 0x299   :  { %v1814_v46 = vsel %vm1793_vm1, %v4397_v19, %v1657_v49  ;;  %v1346_v18 = vpop.xlane.xlu1 %1345  ;;  %v1769_v19 = vrot.slane %v1415_v48, %v4266_v56 }
 0x29a   :  { %v1815_v42 = vsel %vm1795_vm2, %v4400_v27, %v1814_v46  ;;  %v1420_v43 = vadd.f32 %v4200_v7, %v1346_v18  ;;  %v1639_v50 = vsel %vm1512_vm0, %v1638_v9, %v1634_v61 }
 0x29b   :  { %v1816_v26 = vsel %vm1797_vm3, %v4403_v17, %v1815_v42  ;;  %v1774_v29 = vsel %vm1512_vm0, %v1773_v47, %v1769_v19  ;;  %v1809_v17 = vsel %vm1797_vm3, %v1612_v58, %v1808_v54  ;;  %v1434_v13 = vpop.permute.xlu0 %1433 }
 0x29c   :  { %v1791_v27 = vrot.slane %v1420_v43, %v4258_v40  ;;  %v1817_v6 = vsel %vm1799_vm4, %v4407_v51, %v1816_v26  ;;  %v1810_v60 = vsel %vm1799_vm4, %v1621_v3, %v1809_v17  ;;  %vm1438_vm12 = vcmp.lt.s32.totalorder %v4251_v31, %v1434_v13 }
 0x29d   :  { %v1282_v30 = vpop.xlane.xlu1 %1281  ;;  %v1818_v62 = vsel %vm1801_vm5, %v4410_v12, %v1817_v6  ;;  %v1811_v54 = vsel %vm1801_vm5, %v1630_v15, %v1810_v60  ;;  %v4605_v60 = vsub.s32 6, %v4758_v44 }
 0x29e   :  { %v1388_v55 = vadd.f32 %v4200_v7, %v1282_v30  ;;  %v1819_v51 = vsel %vm1803_vm6, %v4419_v57, %v1818_v62  ;;  %v1792_v37 = vsel %vm1512_vm0, %v1791_v27, %v1787_v59  ;;  %v1825_v7 = vsel %vm1801_vm5, %v1774_v29, %v1824_v45  ;;  %v4759_v27 = vld [vmem:[#allocation15_spill] sm:$0xff]  ;;  %v4760_v29 = vld [vmem:[#allocation14_spill] sm:$0xff] }
 0x29f   :  { %v1720_v57 = vsel %vm1512_vm0, %v1719_v32, %v1715_v34  ;;  %v1812_v52 = vsel %vm1803_vm6, %v1639_v50, %v1811_v54  ;;  %v1826_v8 = vsel %vm1803_vm6, %v1783_v21, %v1825_v7  ;;  %v4589_v59 = vsub.s32 2, %v4758_v44  ;;  %v2538_v54 = vld [vmem:[#allocation8 + $0x8] sm:$0xff]  ;;  %v2539_v7 = vld [vmem:[#allocation8 + $0x10] sm:$0xff] }
 0x2a0   :  { %v1647_v12 = vrot.slane %v1388_v55, %v4258_v40  ;;  %v1820_v58 = vsel %vm1805_vm7, %v1720_v57, %v1819_v51  ;;  %v1827_v11 = vsel %vm1805_vm7, %v1792_v37, %v1826_v8  ;;  %v4593_v62 = vsub.s32 3, %v4758_v44 }
 0x2a1   :  { %v1431_v38 = vpop.permute.xlu1 %1430  ;;  %v1835_v32 = vsel %vm1438_vm12, %v1827_v11, -inf  ;;  %v4597_v55 = vsub.s32 4, %v4758_v44  ;;  %v4601_v21 = vsub.s32 5, %v4758_v44  ;;  %v4609_v45 = vsub.s32 7, %v4758_v44 }
 0x2a2   :  { %vm1437_vm10 = vcmp.lt.s32.totalorder %v4251_v31, %v1431_v38  ;;  %v1648_v36 = vsel %vm1512_vm0, %v1647_v12, %v1643_v10  ;;  %v1846_v28 = vsel %vm1836_vm9, %v1835_v32, -inf  ;;  %v2537_v12 = vld [vmem:[#allocation8] sm:$0xff]  ;;  %v2540_v38 = vld [vmem:[#allocation8 + $0x18] sm:$0xff] }
 0x2a3   :  { %v1834_v56 = vsel %vm1437_vm10, %v1820_v58, -inf  ;;  %v1813_v40 = vsel %vm1805_vm7, %v1648_v36, %v1812_v52  ;;  %v2892_v13 = vpack.c.bf16 %v2538_v54, %v2537_v12  ;;  %v2896_v57 = vpack.c.bf16 %v2540_v38, %v2539_v7  ;;  %v3359_v7 = vld [vmem:[#allocation3 + $0x30] sm:$0xff]  ;;  %v3360_v38 = vld [vmem:[#allocation3 + $0x38] sm:$0xff] }
 0x2a4   :  { %v1843_v16 = vsel %vm1836_vm9, %v1834_v56, -inf  ;;  %v1833_v34 = vsel %vm1436_vm11, %v1813_v40, -inf }
 0x2a5   :  { %1844 = vmax.xlane.f32.xlu1 %v1843_v16  ;;  %v1840_v4 = vsel %vm1836_vm9, %v1833_v34, -inf  ;;  %2893 = vmatprep.subr.bf16.mxu1 %v2892_v13 }
 0x2a6   :  { %1841 = vmax.xlane.f32.xlu0 %v1840_v4  ;;  %2895 = vmatpush3.bf16.msra.mxu1 %v2892_v13 }
 0x2a7   :  { %2897 = vmatprep.subr.bf16.mxu1 %v2896_v57 }
 0x2a9   :  { %1847 = vmax.xlane.f32.xlu1 %v1846_v28 }
 0x2aa   :  { %2899 = vmatpush3.bf16.msra.mxu1 %v2896_v57 }
 0x2d2   :  { %v1839_v0 = vpop.xlane.xlu1 %1838 }
 0x2d3   :  { %v1849_v22 = vmax.f32 %v1839_v0, -1e+30 }
 0x2d5   :  { %v1853_v1 = vsub.f32 %v4319_v23, %v1849_v22 }
 0x2d7   :  { %v1857_v5 = vmul.f32 1.442695, %v1853_v1 }
 0x2d9   :  { %3336 = vpow2.f32 %v1857_v5 }
 0x2e3   :  { %v3337_v20 = vpop.eup %3336 }
 0x2e4   :  { %v1865_v31 = vsel %vm1836_vm9, %v3337_v20, 0.0 }
 0x2e5   :  { %1866 = vadd.xlane.f32.xlu1 %v1865_v31  ;;  %v2541_v31 = vld [vmem:[#allocation8 + $0x20] sm:$0xff] }
 0x332   :  { %v1845_v25 = vpop.xlane.xlu1 %1844 }
 0x333   :  { %v1851_v24 = vmax.f32 %v1845_v25, -1e+30  ;;  %v1842_v48 = vpop.xlane.xlu0 %1841  ;;  %v2542_v25 = vld [vmem:[#allocation8 + $0x28] sm:$0xff] }
 0x334   :  { %v1850_v63 = vmax.f32 %v1842_v48, -1e+30  ;;  %v2900_v48 = vpack.c.bf16 %v2542_v25, %v2541_v31 }
 0x335   :  { %v1855_v14 = vsub.f32 %v1834_v56, %v1851_v24 }
 0x336   :  { %v1848_v2 = vpop.xlane.xlu1 %1847  ;;  %v1854_v47 = vsub.f32 %v1833_v34, %v1850_v63  ;;  %2901 = vmatprep.subr.bf16.mxu1 %v2900_v48 }
 0x337   :  { %v1861_v49 = vmul.f32 1.442695, %v1855_v14  ;;  %v1852_v46 = vmax.f32 %v1848_v2, -1e+30  ;;  %2903 = vmatpush3.bf16.msra.mxu1 %v2900_v48 }
 0x338   :  { %v1859_v53 = vmul.f32 1.442695, %v1854_v47 }
 0x339   :  { %3338 = vpow2.f32 %v1861_v49  ;;  %v1856_v33 = vsub.f32 %v1835_v32, %v1852_v46 }
 0x33b   :  { %v1863_v18 = vmul.f32 1.442695, %v1856_v33  ;;  %v3353_v33 = vld [vmem:[#allocation3 + $0x10] sm:$0xff] }
 0x33d   :  { %3340 = vpow2.f32 %v1863_v18  ;;  %v3354_v18 = vld [vmem:[#allocation3 + $0x18] sm:$0xff] }
 0x33e   :  { %3342 = vpow2.f32 %v1859_v53 }
 0x343   :  { %v4570_v23 = vpop.eup %3338 }
 0x344   :  { %v1871_v42 = vsel %vm1836_vm9, %v4570_v23, 0.0 }
 0x345   :  { %1872 = vadd.xlane.f32.xlu0 %v1871_v42 }
 0x347   :  { %v4574_v39 = vpop.eup %3340 }
 0x348   :  { %v1874_v9 = vsel %vm1836_vm9, %v4574_v39, 0.0  ;;  %v4578_v43 = vpop.eup %3342 }
 0x349   :  { %1875 = vadd.xlane.f32.xlu1 %v1874_v9  ;;  %v1868_v61 = vsel %vm1836_vm9, %v4578_v43, 0.0 }
 0x34d   :  { %1869 = vadd.xlane.f32.xlu1 %v1868_v61 }
 0x372   :  { %v1867_v3 = vpop.xlane.xlu1 %1866 }
 0x373   :  { %v1877_v19 = vmax.f32 %v1867_v3, 1e-30 }
 0x375   :  { %3344 = vrcp.f32 %v1877_v19 }
 0x37f   :  { %v3345_v26 = vpop.eup %3344 }
 0x380   :  { %v1882_v41 = vmul.f32 %v3345_v26, %v3337_v20  ;;  %v3357_v26 = vld [vmem:[#allocation3 + $0x20] sm:$0xff] }
 0x382   :  { %v1889_v35 = vmax.f32 %v1882_v41, 1e-05 }
 0x384   :  { %1893 = vst.msk [vmem:[%s4742_s9] sm:$0xff] %vm1836_vm9, %v1889_v35  ;;  %v1900_v6 = vrot.slane %v1889_v35, %v4759_v27  ;;  %v1911_v15 = vrot.slane %v1889_v35, %v4760_v29  ;;  %v1922_v30 = vrot.slane %v1889_v35, %v4589_v59  ;;  %v1933_v17 = vrot.slane %v1889_v35, %v4593_v62 }
 0x385   :  { %v1944_v50 = vrot.slane %v1889_v35, %v4597_v55  ;;  %v1955_v51 = vrot.slane %v1889_v35, %v4601_v21  ;;  %v1966_v37 = vrot.slane %v1889_v35, %v4605_v60  ;;  %v1977_v10 = vrot.slane %v1889_v35, %v4609_v45  ;;  %v3358_v35 = vld [vmem:[#allocation3 + $0x28] sm:$0xff] }
 0x386   :  { %1902 = vbcast.lane.b32.xlu0 %v1900_v6, 256  ;;  %1906 = vbcast.lane.b32.xlu1 %v1900_v6, 264 }
 0x38a   :  { %1917 = vbcast.lane.b32.xlu0 %v1911_v15, 264  ;;  %1913 = vbcast.lane.b32.xlu1 %v1911_v15, 256  ;;  %v2543_v15 = vld [vmem:[#allocation8 + $0x30] sm:$0xff] }
 0x38e   :  { %1928 = vbcast.lane.b32.xlu0 %v1922_v30, 264  ;;  %1924 = vbcast.lane.b32.xlu1 %v1922_v30, 256  ;;  %v2544_v30 = vld [vmem:[#allocation8 + $0x38] sm:$0xff] }
 0x392   :  { %1939 = vbcast.lane.b32.xlu0 %v1933_v17, 264  ;;  %1935 = vbcast.lane.b32.xlu1 %v1933_v17, 256  ;;  %v2904_v17 = vpack.c.bf16 %v2544_v30, %v2543_v15 }
 0x394   :  { %2905 = vmatprep.subr.bf16.mxu1 %v2904_v17 }
 0x395   :  { %2907 = vmatpush3.bf16.msra.mxu1 %v2904_v17 }
 0x396   :  { %1950 = vbcast.lane.b32.xlu0 %v1944_v50, 264  ;;  %1946 = vbcast.lane.b32.xlu1 %v1944_v50, 256 }
 0x39a   :  { %1961 = vbcast.lane.b32.xlu0 %v1955_v51, 264  ;;  %1957 = vbcast.lane.b32.xlu1 %v1955_v51, 256 }
 0x39e   :  { %1972 = vbcast.lane.b32.xlu0 %v1966_v37, 264  ;;  %1968 = vbcast.lane.b32.xlu1 %v1966_v37, 256 }
 0x3a2   :  { %1983 = vbcast.lane.b32.xlu0 %v1977_v10, 264  ;;  %1979 = vbcast.lane.b32.xlu1 %v1977_v10, 256 }
 0x3d2   :  { %v1873_v52 = vpop.xlane.xlu0 %1872 }
 0x3d3   :  { %v1879_v8 = vmax.f32 %v1873_v52, 1e-30 }
 0x3d5   :  { %3346 = vrcp.f32 %v1879_v8 }
 0x3d6   :  { %v1876_v44 = vpop.xlane.xlu1 %1875 }
 0x3d7   :  { %v1880_v58 = vmax.f32 %v1876_v44, 1e-30 }
 0x3d9   :  { %3348 = vrcp.f32 %v1880_v58 }
 0x3da   :  { %v1870_v36 = vpop.xlane.xlu1 %1869 }
 0x3db   :  { %v1878_v11 = vmax.f32 %v1870_v36, 1e-30 }
 0x3dd   :  { %3350 = vrcp.f32 %v1878_v11 }
 0x3df   :  { %v3347_v56 = vpop.eup %3346 }
 0x3e0   :  { %v1886_v40 = vmul.f32 %v3347_v56, %v4570_v23 }
 0x3e2   :  { %v4613_v16 = vmax.f32 %v1886_v40, 1e-05  ;;  %v3361_v40 = vld [vmem:[#allocation3 + $0x40] sm:$0xff] }
 0x3e3   :  { %v3349_v34 = vpop.eup %3348 }
 0x3e4   :  { %1895 = vst.msk [vmem:[%s4742_s9 + $0x10] sm:$0xff] %vm1836_vm9, %v4613_v16  ;;  %v1888_v4 = vmul.f32 %v3349_v34, %v4574_v39  ;;  %v3355_v39 = vld [vmem:[#allocation3 + $0x8] sm:$0xff] }
 0x3e6   :  { %v4621_v32 = vmax.f32 %v1888_v4, 1e-05  ;;  %v3362_v4 = vld [vmem:[#allocation3 + $0x48] sm:$0xff] }
 0x3e7   :  { %v3351_v28 = vpop.eup %3350 }
 0x3e8   :  { %1896 = vst.msk [vmem:[%s4742_s9 + $0x18] sm:$0xff] %vm1836_vm9, %v4621_v32  ;;  %v1884_v0 = vmul.f32 %v3351_v28, %v4578_v43  ;;  %v2164_v22 = vrot.slane %v4621_v32, %v4759_v27  ;;  %v2175_v5 = vrot.slane %v4621_v32, %v4760_v29  ;;  %v2186_v20 = vrot.slane %v4621_v32, %v4589_v59  ;;  %v3356_v43 = vld [vmem:[#allocation3] sm:$0xff] }
 0x3e9   :  { %v2197_v24 = vrot.slane %v4621_v32, %v4593_v62  ;;  %v2208_v63 = vrot.slane %v4621_v32, %v4597_v55  ;;  %v2219_v49 = vrot.slane %v4621_v32, %v4601_v21  ;;  %v2230_v42 = vrot.slane %v4621_v32, %v4605_v60 }
 0x3ea   :  { %v4631_v1 = vmax.f32 %v1884_v0, 1e-05  ;;  %2170 = vbcast.lane.b32.xlu0 %v2164_v22, 264  ;;  %2166 = vbcast.lane.b32.xlu1 %v2164_v22, 256 }
 0x3ec   :  { %1894 = vst.msk [vmem:[%s4742_s9 + $0x8] sm:$0xff] %vm1836_vm9, %v4631_v1  ;;  %v1988_v51 = vrot.slane %v4631_v1, %v4759_v27  ;;  %v1999_v8 = vrot.slane %v4631_v1, %v4760_v29  ;;  %v2010_v31 = vrot.slane %v4631_v1, %v4589_v59 }
 0x3ee   :  { %2181 = vbcast.lane.b32.xlu0 %v2175_v5, 264  ;;  %2177 = vbcast.lane.b32.xlu1 %v2175_v5, 256 }
 0x3f2   :  { %2192 = vbcast.lane.b32.xlu0 %v2186_v20, 264  ;;  %2188 = vbcast.lane.b32.xlu1 %v2186_v20, 256 }
 0x3f6   :  { %2203 = vbcast.lane.b32.xlu0 %v2197_v24, 264  ;;  %2199 = vbcast.lane.b32.xlu1 %v2197_v24, 256 }
 0x3f8   :  { %v1907_v14 = vpop.permute.xlu1 %1906  ;;  %v1903_v2 = vpop.permute.xlu0 %1902 }
 0x3f9   :  { %v2250_v9 = vmul.f32 %v3355_v39, %v1907_v14  ;;  %v2249_v61 = vmul.f32 %v3356_v43, %v1903_v2  ;;  %v3363_v2 = vld [vmem:[#allocation3 + $0x50] sm:$0xff] }
 0x3fa   :  { %2214 = vbcast.lane.b32.xlu0 %v2208_v63, 264  ;;  %2210 = vbcast.lane.b32.xlu1 %v2208_v63, 256 }
 0x3fb   :  { %v2313_v37 = vadd.f32 %v2250_v9, %v2249_v61 }
 0x3fc   :  { %v1914_v47 = vpop.permute.xlu1 %1913  ;;  %v1918_v46 = vpop.permute.xlu0 %1917 }
 0x3fd   :  { %v2251_v53 = vmul.f32 %v3353_v33, %v1914_v47  ;;  %v2252_v23 = vmul.f32 %v3354_v18, %v1918_v46  ;;  %v2314_v44 = vrot.slane %v2313_v37, 4  ;;  %v3364_v47 = vld [vmem:[#allocation3 + $0x58] sm:$0xff] }
 0x3fe   :  { %2225 = vbcast.lane.b32.xlu0 %v2219_v49, 264  ;;  %2221 = vbcast.lane.b32.xlu1 %v2219_v49, 256 }
 0x3ff   :  { %v2320_v50 = vadd.f32 %v2252_v23, %v2251_v53  ;;  %v2315_v20 = vadd.f32 %v2314_v44, %v2313_v37  ;;  %v2021_v23 = vrot.slane %v4631_v1, %v4593_v62  ;;  %v2546_v44 = vld [vmem:[#allocation8 + $0x48] sm:$0xff] }
 0x400   :  { %v1925_v3 = vpop.permute.xlu1 %1924  ;;  %v1929_v19 = vpop.permute.xlu0 %1928 }
 0x401   :  { %v2253_v41 = vmul.f32 %v3357_v26, %v1925_v3  ;;  %v2254_v6 = vmul.f32 %v3358_v35, %v1929_v19  ;;  %v2321_v52 = vrot.slane %v2320_v50, 4  ;;  %v2316_v18 = vrot.slane %v2315_v20, 2  ;;  %v3365_v3 = vld [vmem:[#allocation3 + $0x60] sm:$0xff]  ;;  %v3366_v26 = vld [vmem:[#allocation3 + $0x68] sm:$0xff] }
 0x402   :  { %2236 = vbcast.lane.b32.xlu0 %v2230_v42, 264  ;;  %2232 = vbcast.lane.b32.xlu1 %v2230_v42, 256 }
 0x403   :  { %v2327_v10 = vadd.f32 %v2254_v6, %v2253_v41  ;;  %v2322_v22 = vadd.f32 %v2321_v52, %v2320_v50  ;;  %v2317_v17 = vadd.f32 %v2316_v18, %v2315_v20 }
 0x404   :  { %v1936_v12 = vpop.permute.xlu1 %1935  ;;  %v1940_v54 = vpop.permute.xlu0 %1939 }
 0x405   :  { %v2255_v13 = vmul.f32 %v3359_v7, %v1936_v12  ;;  %v2256_v57 = vmul.f32 %v3360_v38, %v1940_v54  ;;  %v2328_v58 = vrot.slane %v2327_v10, 4  ;;  %v2323_v33 = vrot.slane %v2322_v22, 2 }
 0x406   :  { %1994 = vbcast.lane.b32.xlu0 %v1988_v51, 264  ;;  %1990 = vbcast.lane.b32.xlu1 %v1988_v51, 256  ;;  %v2032_v51 = vrot.slane %v4631_v1, %v4597_v55 }
 0x407   :  { %v2334_v36 = vadd.f32 %v2256_v57, %v2255_v13  ;;  %v2329_v25 = vadd.f32 %v2328_v58, %v2327_v10  ;;  %v2324_v15 = vadd.f32 %v2323_v33, %v2322_v22  ;;  %v3367_v13 = vld [vmem:[#allocation3 + $0x70] sm:$0xff]  ;;  %v3368_v57 = vld [vmem:[#allocation3 + $0x78] sm:$0xff]  ;;  %v2318_v22 = vrot.slane %v2317_v17, 1 }
 0x408   :  { %v1947_v11 = vpop.permute.xlu1 %1946  ;;  %v1951_v56 = vpop.permute.xlu0 %1950 }
 0x409   :  { %v2257_v34 = vmul.f32 %v3361_v40, %v1947_v11  ;;  %v2258_v28 = vmul.f32 %v3362_v4, %v1951_v56  ;;  %v2335_v0 = vrot.slane %v2334_v36, 4  ;;  %v2330_v42 = vrot.slane %v2329_v25, 2 }
 0x40a   :  { %2005 = vbcast.lane.b32.xlu0 %v1999_v8, 264  ;;  %2001 = vbcast.lane.b32.xlu1 %v1999_v8, 256  ;;  %v2545_v8 = vld [vmem:[#allocation8 + $0x40] sm:$0xff]  ;;  %v2325_v56 = vrot.slane %v2324_v15, 1 }
 0x40b   :  { %v2341_v5 = vadd.f32 %v2258_v28, %v2257_v34  ;;  %v2336_v63 = vadd.f32 %v2335_v0, %v2334_v36  ;;  %v2331_v50 = vadd.f32 %v2330_v42, %v2329_v25  ;;  %v2908_v11 = vpack.c.bf16 %v2546_v44, %v2545_v8 }
 0x40c   :  { %v1958_v24 = vpop.permute.xlu1 %1957  ;;  %v1962_v48 = vpop.permute.xlu0 %1961  ;;  %v2043_v28 = vrot.slane %v4631_v1, %v4601_v21 }
 0x40d   :  { %v2342_v14 = vrot.slane %v2341_v5, 4  ;;  %v2259_v49 = vmul.f32 %v3363_v2, %v1958_v24  ;;  %v2260_v46 = vmul.f32 %v3364_v47, %v1962_v48  ;;  %v2337_v61 = vrot.slane %v2336_v63, 2  ;;  %2909 = vmatprep.subr.bf16.mxu1 %v2908_v11 }
 0x40e   :  { %2016 = vbcast.lane.b32.xlu0 %v2010_v31, 264  ;;  %2012 = vbcast.lane.b32.xlu1 %v2010_v31, 256  ;;  %v2332_v4 = vrot.slane %v2331_v50, 1  ;;  %v2326_v24 = vadd.f32 %v2325_v56, %v2324_v15  ;;  %v2319_v47 = vadd.f32 %v2318_v22, %v2317_v17 }
 0x40f   :  { %v2343_v53 = vadd.f32 %v2342_v14, %v2341_v5  ;;  %v2348_v39 = vadd.f32 %v2260_v46, %v2259_v49  ;;  %v2338_v54 = vadd.f32 %v2337_v61, %v2336_v63  ;;  %2911 = vmatpush3.bf16.msra.mxu1 %v2908_v11  ;;  %v2054_v49 = vrot.slane %v4631_v1, %v4605_v60 }
 0x410   :  { %v1969_v9 = vpop.permute.xlu1 %1968  ;;  %v1973_v43 = vpop.permute.xlu0 %1972  ;;  %v2333_v2 = vadd.f32 %v2332_v4, %v2331_v50 }
 0x411   :  { %v2261_v19 = vmul.f32 %v3365_v3, %v1969_v9  ;;  %v2262_v41 = vmul.f32 %v3366_v26, %v1973_v43  ;;  %v2344_v35 = vrot.slane %v2343_v53, 2  ;;  %v2349_v6 = vrot.slane %v2348_v39, 4 }
 0x412   :  { %2027 = vbcast.lane.b32.xlu0 %v2021_v23, 264  ;;  %2023 = vbcast.lane.b32.xlu1 %v2021_v23, 256  ;;  %v2339_v5 = vrot.slane %v2338_v54, 1  ;;  %v2592_v23 = vsel %vm1793_vm1, %v2326_v24, %v2319_v47  ;;  %v2065_v9 = vrot.slane %v4631_v1, %v4609_v45  ;;  %v2548_v1 = vld [vmem:[#allocation8 + $0x58] sm:$0xff]  ;;  %v3374_v24 = vld [vmem:[#allocation3 + $0x1a8] sm:$0xff] }
 0x413   :  { %v2355_v30 = vadd.f32 %v2262_v41, %v2261_v19  ;;  %v2350_v37 = vadd.f32 %v2349_v6, %v2348_v39  ;;  %v2345_v58 = vadd.f32 %v2344_v35, %v2343_v53  ;;  %v2593_v61 = vsel %vm1795_vm2, %v2333_v2, %v2592_v23  ;;  %v3376_v23 = vld [vmem:[#allocation3 + $0x1b8] sm:$0xff] }
 0x414   :  { %v1980_v10 = vpop.permute.xlu1 %1979  ;;  %v1984_v12 = vpop.permute.xlu0 %1983  ;;  %v2340_v46 = vadd.f32 %v2339_v5, %v2338_v54  ;;  %v2076_v6 = vrot.slane %v4613_v16, %v4759_v27  ;;  %v2098_v27 = vrot.slane %v4613_v16, %v4589_v59  ;;  %v2551_v54 = vld [vmem:[#allocation8 + $0x70] sm:$0xff]  ;;  %v2131_v59 = vrot.slane %v4613_v16, %v4601_v21  ;;  %v3369_v21 = vld [vmem:[#allocation3 + $0x180] sm:$0xff] }
 0x415   :  { %v2356_v7 = vrot.slane %v2355_v30, 4  ;;  %v2263_v38 = vmul.f32 %v3367_v13, %v1980_v10  ;;  %v2264_v52 = vmul.f32 %v3368_v57, %v1984_v12  ;;  %v2351_v36 = vrot.slane %v2350_v37, 2  ;;  %v2550_v10 = vld [vmem:[#allocation8 + $0x68] sm:$0xff] }
 0x416   :  { %2038 = vbcast.lane.b32.xlu0 %v2032_v51, 264  ;;  %2034 = vbcast.lane.b32.xlu1 %v2032_v51, 256  ;;  %v2346_v25 = vrot.slane %v2345_v58, 1  ;;  %v2594_v19 = vsel %vm1797_vm3, %v2340_v46, %v2593_v61  ;;  %v2087_v51 = vrot.slane %v4613_v16, %v4760_v29  ;;  %v2109_v13 = vrot.slane %v4613_v16, %v4593_v62 }
 0x417   :  { %v2357_v40 = vadd.f32 %v2356_v7, %v2355_v30  ;;  %v2362_v34 = vadd.f32 %v2264_v52, %v2263_v38  ;;  %v2352_v0 = vadd.f32 %v2351_v36, %v2350_v37  ;;  %v2547_v30 = vld [vmem:[#allocation8 + $0x50] sm:$0xff]  ;;  %v2549_v37 = vld [vmem:[#allocation8 + $0x60] sm:$0xff]  ;;  %v2552_v7 = vld [vmem:[#allocation8 + $0x78] sm:$0xff]  ;;  %v2120_v29 = vrot.slane %v4613_v16, %v4597_v55 }
 0x418   :  { %v2347_v18 = vadd.f32 %v2346_v25, %v2345_v58  ;;  %v2912_v50 = vpack.c.bf16 %v2548_v1, %v2547_v30  ;;  %v2916_v12 = vpack.c.bf16 %v2550_v10, %v2549_v37  ;;  %v2920_v38 = vpack.c.bf16 %v2552_v7, %v2551_v54  ;;  %v3370_v58 = vld [vmem:[#allocation3 + $0x188] sm:$0xff] }
 0x419   :  { %v2358_v20 = vrot.slane %v2357_v40, 2  ;;  %v2363_v31 = vrot.slane %v2362_v34, 4  ;;  %v2353_v48 = vrot.slane %v2352_v0, 1  ;;  %v2142_v57 = vrot.slane %v4613_v16, %v4605_v60 }
 0x41a   :  { %2049 = vbcast.lane.b32.xlu0 %v2043_v28, 264  ;;  %2045 = vbcast.lane.b32.xlu1 %v2043_v28, 256  ;;  %v2595_v26 = vsel %vm1799_vm4, %v2347_v18, %v2594_v19  ;;  %v2153_v62 = vrot.slane %v4613_v16, %v4609_v45  ;;  %v2241_v55 = vrot.slane %v4621_v32, %v4609_v45  ;;  %v3372_v16 = vld [vmem:[#allocation3 + $0x198] sm:$0xff] }
 0x41b   :  { %v2359_v63 = vadd.f32 %v2358_v20, %v2357_v40  ;;  %v2364_v14 = vadd.f32 %v2363_v31, %v2362_v34  ;;  %v2354_v42 = vadd.f32 %v2353_v48, %v2352_v0  ;;  %2913 = vmatprep.subr.bf16.mxu1 %v2912_v50  ;;  %v3371_v34 = vld [vmem:[#allocation3 + $0x190] sm:$0xff]  ;;  %v3373_v31 = vld [vmem:[#allocation3 + $0x1a0] sm:$0xff] }
 0x41c   :  { %2915 = vmatpush3.bf16.msra.mxu1 %v2912_v50 }
 0x41d   :  { %v2360_v33 = vrot.slane %v2359_v63, 1  ;;  %v2365_v53 = vrot.slane %v2364_v14, 2  ;;  %v2596_v35 = vsel %vm1801_vm5, %v2354_v42, %v2595_v26  ;;  %2917 = vmatprep.subr.bf16.mxu1 %v2916_v12 }
 0x41e   :  { %2060 = vbcast.lane.b32.xlu0 %v2054_v49, 264  ;;  %2056 = vbcast.lane.b32.xlu1 %v2054_v49, 256 }
 0x41f   :  { %v2366_v39 = vadd.f32 %v2365_v53, %v2364_v14  ;;  %v2361_v43 = vadd.f32 %v2360_v33, %v2359_v63  ;;  %v3375_v53 = vld [vmem:[#allocation3 + $0x1b0] sm:$0xff] }
 0x420   :  { %2919 = vmatpush3.bf16.msra.mxu1 %v2916_v12 }
 0x421   :  { %v2367_v3 = vrot.slane %v2366_v39, 1  ;;  %v2597_v15 = vsel %vm1803_vm6, %v2361_v43, %v2596_v35  ;;  %2921 = vmatprep.subr.bf16.mxu1 %v2920_v38  ;;  %v3377_v35 = vld [vmem:[#allocation3 + $0x1c0] sm:$0xff] }
 0x422   :  { %2071 = vbcast.lane.b32.xlu0 %v2065_v9, 264  ;;  %2067 = vbcast.lane.b32.xlu1 %v2065_v9, 256 }
 0x423   :  { %v2368_v41 = vadd.f32 %v2367_v3, %v2366_v39 }
 0x424   :  { %2923 = vmatpush3.bf16.msra.mxu1 %v2920_v38  ;;  %v3379_v38 = vld [vmem:[#allocation3 + $0x1d0] sm:$0xff] }
 0x425   :  { %v2598_v17 = vsel %vm1805_vm7, %v2368_v41, %v2597_v15  ;;  %v3378_v15 = vld [vmem:[#allocation3 + $0x1c8] sm:$0xff] }
 0x426   :  { %2082 = vbcast.lane.b32.xlu0 %v2076_v6, 264  ;;  %2078 = vbcast.lane.b32.xlu1 %v2076_v6, 256 }
 0x427   :  { %2854 = vmatprep.mubr.f32.mxu1 %v2598_v17 }
 0x42a   :  { %2093 = vbcast.lane.b32.xlu0 %v2087_v51, 264  ;;  %2089 = vbcast.lane.b32.xlu1 %v2087_v51, 256 }
 0x42e   :  { %2104 = vbcast.lane.b32.xlu0 %v2098_v27, 264  ;;  %2100 = vbcast.lane.b32.xlu1 %v2098_v27, 256 }
 0x432   :  { %2115 = vbcast.lane.b32.xlu0 %v2109_v13, 264  ;;  %2111 = vbcast.lane.b32.xlu1 %v2109_v13, 256 }
 0x436   :  { %2126 = vbcast.lane.b32.xlu0 %v2120_v29, 264  ;;  %2122 = vbcast.lane.b32.xlu1 %v2120_v29, 256 }
 0x43a   :  { %2137 = vbcast.lane.b32.xlu0 %v2131_v59, 264  ;;  %2133 = vbcast.lane.b32.xlu1 %v2131_v59, 256 }
 0x43e   :  { %2148 = vbcast.lane.b32.xlu0 %v2142_v57, 264  ;;  %2144 = vbcast.lane.b32.xlu1 %v2142_v57, 256  ;;  %v3380_v57 = vld [vmem:[#allocation3 + $0x1d8] sm:$0xff] }
 0x442   :  { %2159 = vbcast.lane.b32.xlu0 %v2153_v62, 264  ;;  %2155 = vbcast.lane.b32.xlu1 %v2153_v62, 256 }
 0x446   :  { %2247 = vbcast.lane.b32.xlu0 %v2241_v55, 264  ;;  %2243 = vbcast.lane.b32.xlu1 %v2241_v55, 256 }
 0x45c   :  { %v2167_v52 = vpop.permute.xlu1 %2166  ;;  %v2171_v8 = vpop.permute.xlu0 %2170 }
 0x45d   :  { %v2297_v44 = vmul.f32 %v3369_v21, %v2167_v52  ;;  %v2298_v36 = vmul.f32 %v3370_v58, %v2171_v8 }
 0x45f   :  { %v2481_v11 = vadd.f32 %v2298_v36, %v2297_v44 }
 0x460   :  { %v2178_v60 = vpop.permute.xlu1 %2177  ;;  %v2182_v56 = vpop.permute.xlu0 %2181 }
 0x461   :  { %v2482_v40 = vrot.slane %v2481_v11, 4  ;;  %v2299_v4 = vmul.f32 %v3371_v34, %v2178_v60  ;;  %v2300_v28 = vmul.f32 %v3372_v16, %v2182_v56  ;;  %v3382_v56 = vld [vmem:[#allocation3 + $0x1e8] sm:$0xff] }
 0x463   :  { %v2483_v0 = vadd.f32 %v2482_v40, %v2481_v11  ;;  %v2488_v22 = vadd.f32 %v2300_v28, %v2299_v4  ;;  %v3381_v11 = vld [vmem:[#allocation3 + $0x1e0] sm:$0xff] }
 0x464   :  { %v2189_v5 = vpop.permute.xlu1 %2188  ;;  %v2193_v45 = vpop.permute.xlu0 %2192 }
 0x465   :  { %v2484_v32 = vrot.slane %v2483_v0, 2  ;;  %v2489_v20 = vrot.slane %v2488_v22, 4  ;;  %v2301_v25 = vmul.f32 %v3373_v31, %v2189_v5  ;;  %v2302_v48 = vmul.f32 %v3374_v24, %v2193_v45 }
 0x467   :  { %v2485_v63 = vadd.f32 %v2484_v32, %v2483_v0  ;;  %v2490_v14 = vadd.f32 %v2489_v20, %v2488_v22  ;;  %v2495_v2 = vadd.f32 %v2302_v48, %v2301_v25 }
 0x468   :  { %v2200_v49 = vpop.permute.xlu1 %2199  ;;  %v2204_v47 = vpop.permute.xlu0 %2203 }
 0x469   :  { %v2491_v46 = vrot.slane %v2490_v14, 2  ;;  %v2496_v33 = vrot.slane %v2495_v2, 4  ;;  %v2303_v18 = vmul.f32 %v3375_v53, %v2200_v49  ;;  %v2304_v42 = vmul.f32 %v3376_v23, %v2204_v47 }
 0x46a   :  { %v2486_v39 = vrot.slane %v2485_v63, 1 }
 0x46b   :  { %v2492_v9 = vadd.f32 %v2491_v46, %v2490_v14  ;;  %v2497_v43 = vadd.f32 %v2496_v33, %v2495_v2  ;;  %v2502_v61 = vadd.f32 %v2304_v42, %v2303_v18  ;;  %v3383_v18 = vld [vmem:[#allocation3 + $0x90] sm:$0xff]  ;;  %v3384_v42 = vld [vmem:[#allocation3 + $0x98] sm:$0xff] }
 0x46c   :  { %v2211_v3 = vpop.permute.xlu1 %2210  ;;  %v2215_v19 = vpop.permute.xlu0 %2214  ;;  %v2487_v17 = vadd.f32 %v2486_v39, %v2485_v63 }
 0x46d   :  { %v2493_v26 = vrot.slane %v2492_v9, 1  ;;  %v2498_v41 = vrot.slane %v2497_v43, 2  ;;  %v2305_v6 = vmul.f32 %v3377_v35, %v2211_v3  ;;  %v2306_v30 = vmul.f32 %v3378_v15, %v2215_v19  ;;  %v3385_v19 = vld [vmem:[#allocation3 + $0x80] sm:$0xff] }
 0x46e   :  { %v2503_v1 = vrot.slane %v2502_v61, 4 }
 0x46f   :  { %v2494_v50 = vadd.f32 %v2493_v26, %v2492_v9  ;;  %v2499_v51 = vadd.f32 %v2498_v41, %v2497_v43  ;;  %v2509_v37 = vadd.f32 %v2306_v30, %v2305_v6  ;;  %v3386_v41 = vld [vmem:[#allocation3 + $0x88] sm:$0xff]  ;;  %v3387_v6 = vld [vmem:[#allocation3 + $0xa0] sm:$0xff] }
 0x470   :  { %v2504_v10 = vadd.f32 %v2503_v1, %v2502_v61  ;;  %v2222_v27 = vpop.permute.xlu1 %2221  ;;  %v2226_v12 = vpop.permute.xlu0 %2225  ;;  %v3388_v30 = vld [vmem:[#allocation3 + $0xa8] sm:$0xff] }
 0x471   :  { %v2613_v54 = vsel %vm1793_vm1, %v2494_v50, %v2487_v17  ;;  %v2500_v7 = vrot.slane %v2499_v51, 1  ;;  %v2510_v13 = vrot.slane %v2509_v37, 4  ;;  %v2307_v29 = vmul.f32 %v3379_v38, %v2222_v27 }
 0x472   :  { %v2505_v59 = vrot.slane %v2504_v10, 2  ;;  %v2308_v62 = vmul.f32 %v3380_v57, %v2226_v12 }
 0x473   :  { %v2501_v55 = vadd.f32 %v2500_v7, %v2499_v51  ;;  %v2511_v52 = vadd.f32 %v2510_v13, %v2509_v37  ;;  %v3390_v13 = vld [vmem:[#allocation3 + $0xb8] sm:$0xff] }
 0x474   :  { %v2506_v8 = vadd.f32 %v2505_v59, %v2504_v10  ;;  %v2516_v21 = vadd.f32 %v2308_v62, %v2307_v29  ;;  %v2233_v44 = vpop.permute.xlu1 %2232  ;;  %v2237_v58 = vpop.permute.xlu0 %2236 }
 0x475   :  { %v2512_v36 = vrot.slane %v2511_v52, 2  ;;  %v2309_v60 = vmul.f32 %v3381_v11, %v2233_v44  ;;  %v2310_v40 = vmul.f32 %v3382_v56, %v2237_v58  ;;  %v2614_v34 = vsel %vm1795_vm2, %v2501_v55, %v2613_v54  ;;  %v3389_v54 = vld [vmem:[#allocation3 + $0xb0] sm:$0xff]  ;;  %v3392_v58 = vld [vmem:[#allocation3 + $0xc8] sm:$0xff] }
 0x476   :  { %v2507_v4 = vrot.slane %v2506_v8, 1  ;;  %v2517_v16 = vrot.slane %v2516_v21, 4 }
 0x477   :  { %v2513_v28 = vadd.f32 %v2512_v36, %v2511_v52  ;;  %v2523_v0 = vadd.f32 %v2310_v40, %v2309_v60 }
 0x478   :  { %v2508_v22 = vadd.f32 %v2507_v4, %v2506_v8  ;;  %v2518_v5 = vadd.f32 %v2517_v16, %v2516_v21  ;;  %v1991_v45 = vpop.permute.xlu1 %1990  ;;  %v1995_v32 = vpop.permute.xlu0 %1994  ;;  %v3391_v21 = vld [vmem:[#allocation3 + $0xc0] sm:$0xff] }
 0x479   :  { %v2514_v20 = vrot.slane %v2513_v28, 1  ;;  %v2524_v31 = vrot.slane %v2523_v0, 4  ;;  %v2265_v26 = vmul.f32 %v3385_v19, %v1991_v45  ;;  %v2266_v35 = vmul.f32 %v3386_v41, %v1995_v32  ;;  %v3394_v45 = vld [vmem:[#allocation3 + $0xd8] sm:$0xff] }
 0x47a   :  { %v2519_v25 = vrot.slane %v2518_v5, 2  ;;  %v2615_v24 = vsel %vm1797_vm3, %v2508_v22, %v2614_v34 }
 0x47b   :  { %v2515_v48 = vadd.f32 %v2514_v20, %v2513_v28  ;;  %v2525_v63 = vadd.f32 %v2524_v31, %v2523_v0  ;;  %v2369_v27 = vadd.f32 %v2266_v35, %v2265_v26  ;;  %v3393_v0 = vld [vmem:[#allocation3 + $0xd0] sm:$0xff] }
 0x47c   :  { %v2520_v14 = vadd.f32 %v2519_v25, %v2518_v5  ;;  %v2002_v2 = vpop.permute.xlu1 %2001  ;;  %v2006_v49 = vpop.permute.xlu0 %2005  ;;  %v3397_v26 = vld [vmem:[#allocation3 + $0xf0] sm:$0xff] }
 0x47d   :  { %v2526_v47 = vrot.slane %v2525_v63, 2  ;;  %v2616_v33 = vsel %vm1799_vm4, %v2515_v48, %v2615_v24  ;;  %v2267_v23 = vmul.f32 %v3383_v18, %v2002_v2  ;;  %v2268_v39 = vmul.f32 %v3384_v42, %v2006_v49  ;;  %v3395_v2 = vld [vmem:[#allocation3 + $0xe0] sm:$0xff] }
 0x47e   :  { %v2521_v46 = vrot.slane %v2520_v14, 1  ;;  %v2370_v52 = vrot.slane %v2369_v27, 4 }
 0x47f   :  { %v2527_v53 = vadd.f32 %v2526_v47, %v2525_v63  ;;  %v2376_v50 = vadd.f32 %v2268_v39, %v2267_v23  ;;  %v3396_v47 = vld [vmem:[#allocation3 + $0xe8] sm:$0xff] }
 0x480   :  { %v2522_v9 = vadd.f32 %v2521_v46, %v2520_v14  ;;  %v2013_v43 = vpop.permute.xlu1 %2012  ;;  %v2017_v61 = vpop.permute.xlu0 %2016  ;;  %v2371_v4 = vadd.f32 %v2370_v52, %v2369_v27 }
 0x481   :  { %v2528_v3 = vrot.slane %v2527_v53, 1  ;;  %v2269_v15 = vmul.f32 %v3387_v6, %v2013_v43  ;;  %v2270_v1 = vmul.f32 %v3388_v30, %v2017_v61  ;;  %v2377_v59 = vrot.slane %v2376_v50, 4 }
 0x482   :  { %v2617_v17 = vsel %vm1801_vm5, %v2522_v9, %v2616_v33  ;;  %v2372_v63 = vrot.slane %v2371_v4, 2 }
 0x483   :  { %v2529_v51 = vadd.f32 %v2528_v3, %v2527_v53  ;;  %v2383_v12 = vadd.f32 %v2270_v1, %v2269_v15  ;;  %v2378_v60 = vadd.f32 %v2377_v59, %v2376_v50  ;;  %v3398_v15 = vld [vmem:[#allocation3 + $0xf8] sm:$0xff] }
 0x484   :  { %v2024_v37 = vpop.permute.xlu1 %2023  ;;  %v2028_v10 = vpop.permute.xlu0 %2027  ;;  %v2373_v61 = vadd.f32 %v2372_v63, %v2371_v4  ;;  %v3403_v63 = vld [vmem:[#allocation3 + $0x120] sm:$0xff] }
 0x485   :  { %v2271_v7 = vmul.f32 %v3389_v54, %v2024_v37  ;;  %v2272_v38 = vmul.f32 %v3390_v13, %v2028_v10  ;;  %v4697_v29 = vsel %vm1803_vm6, %v2529_v51, %v2617_v17  ;;  %v2384_v8 = vrot.slane %v2383_v12, 4 }
 0x486   :  { %v2379_v20 = vrot.slane %v2378_v60, 2 }
 0x487   :  { %v2390_v57 = vadd.f32 %v2272_v38, %v2271_v7  ;;  %v2385_v16 = vadd.f32 %v2384_v8, %v2383_v12  ;;  %v2374_v12 = vrot.slane %v2373_v61, 1 }
 0x488   :  { %v2035_v62 = vpop.permute.xlu1 %2034  ;;  %v2039_v55 = vpop.permute.xlu0 %2038  ;;  %v2380_v18 = vadd.f32 %v2379_v20, %v2378_v60 }
 0x489   :  { %v2273_v44 = vmul.f32 %v3391_v21, %v2035_v62  ;;  %v2274_v36 = vmul.f32 %v3392_v58, %v2039_v55  ;;  %v2391_v11 = vrot.slane %v2390_v57, 4  ;;  %v2386_v14 = vrot.slane %v2385_v16, 2 }
 0x48a   :  { %v2381_v1 = vrot.slane %v2380_v18, 1 }
 0x48b   :  { %v2397_v56 = vadd.f32 %v2274_v36, %v2273_v44  ;;  %v2392_v5 = vadd.f32 %v2391_v11, %v2390_v57  ;;  %v2387_v3 = vadd.f32 %v2386_v14, %v2385_v16  ;;  %v2375_v44 = vadd.f32 %v2374_v12, %v2373_v61  ;;  %v3405_v61 = vld [vmem:[#allocation3 + $0x130] sm:$0xff] }
 0x48c   :  { %v2046_v40 = vpop.permute.xlu1 %2045  ;;  %v2050_v34 = vpop.permute.xlu0 %2049  ;;  %v2382_v59 = vadd.f32 %v2381_v1, %v2380_v18 }
 0x48d   :  { %v2398_v28 = vrot.slane %v2397_v56, 4  ;;  %v2275_v22 = vmul.f32 %v3393_v0, %v2046_v40  ;;  %v2276_v32 = vmul.f32 %v3394_v45, %v2050_v34  ;;  %v2393_v33 = vrot.slane %v2392_v5, 2  ;;  %v3400_v34 = vld [vmem:[#allocation3 + $0x118] sm:$0xff] }
 0x48e   :  { %v2388_v54 = vrot.slane %v2387_v3, 1  ;;  %v2599_v16 = vsel %vm1793_vm1, %v2382_v59, %v2375_v44  ;;  %v3410_v44 = vld [vmem:[#allocation3 + $0x158] sm:$0xff] }
 0x48f   :  { %v2399_v31 = vadd.f32 %v2398_v28, %v2397_v56  ;;  %v2404_v25 = vadd.f32 %v2276_v32, %v2275_v22  ;;  %v2394_v35 = vadd.f32 %v2393_v33, %v2392_v5  ;;  %v3399_v56 = vld [vmem:[#allocation3 + $0x110] sm:$0xff]  ;;  %v3401_v5 = vld [vmem:[#allocation3 + $0x100] sm:$0xff]  ;;  %v3402_v32 = vld [vmem:[#allocation3 + $0x108] sm:$0xff] }
 0x490   :  { %v2057_v24 = vpop.permute.xlu1 %2056  ;;  %v2061_v48 = vpop.permute.xlu0 %2060  ;;  %v2389_v58 = vadd.f32 %v2388_v54, %v2387_v3 }
 0x491   :  { %v2277_v49 = vmul.f32 %v3395_v2, %v2057_v24  ;;  %v2278_v46 = vmul.f32 %v3396_v47, %v2061_v48  ;;  %v2405_v53 = vrot.slane %v2404_v25, 4  ;;  %v2400_v23 = vrot.slane %v2399_v31, 2  ;;  %v3404_v2 = vld [vmem:[#allocation3 + $0x128] sm:$0xff] }
 0x492   :  { %v2395_v13 = vrot.slane %v2394_v35, 1  ;;  %v2600_v24 = vsel %vm1795_vm2, %v2389_v58, %v2599_v16  ;;  %v3411_v16 = vld [vmem:[#allocation3 + $0x160] sm:$0xff] }
 0x493   :  { %v2411_v42 = vadd.f32 %v2278_v46, %v2277_v49  ;;  %v2406_v39 = vadd.f32 %v2405_v53, %v2404_v25  ;;  %v2401_v17 = vadd.f32 %v2400_v23, %v2399_v31 }
 0x494   :  { %v2068_v9 = vpop.permute.xlu1 %2067  ;;  %v2072_v43 = vpop.permute.xlu0 %2071  ;;  %v2396_v11 = vadd.f32 %v2395_v13, %v2394_v35 }
 0x495   :  { %v2412_v19 = vrot.slane %v2411_v42, 4  ;;  %v2279_v41 = vmul.f32 %v3397_v26, %v2068_v9  ;;  %v2407_v6 = vrot.slane %v2406_v39, 2  ;;  %v2280_v30 = vmul.f32 %v3398_v15, %v2072_v43 }
 0x496   :  { %v2402_v57 = vrot.slane %v2401_v17, 1  ;;  %v2601_v47 = vsel %vm1797_vm3, %v2396_v11, %v2600_v24 }
 0x497   :  { %v2413_v50 = vadd.f32 %v2412_v19, %v2411_v42  ;;  %v2408_v51 = vadd.f32 %v2407_v6, %v2406_v39  ;;  %v2418_v37 = vadd.f32 %v2280_v30, %v2279_v41  ;;  %v3406_v41 = vld [vmem:[#allocation3 + $0x138] sm:$0xff] }
 0x498   :  { %v2079_v10 = vpop.permute.xlu1 %2078  ;;  %v2083_v27 = vpop.permute.xlu0 %2082  ;;  %v2403_v28 = vadd.f32 %v2402_v57, %v2401_v17 }
 0x499   :  { %v2414_v7 = vrot.slane %v2413_v50, 2  ;;  %v2419_v38 = vrot.slane %v2418_v37, 4  ;;  %v2409_v55 = vrot.slane %v2408_v51, 1  ;;  %v2281_v45 = vmul.f32 %v3401_v5, %v2079_v10  ;;  %v3408_v10 = vld [vmem:[#allocation3 + $0x148] sm:$0xff] }
 0x49a   :  { %v2282_v20 = vmul.f32 %v3402_v32, %v2083_v27  ;;  %v2602_v53 = vsel %vm1799_vm4, %v2403_v28, %v2601_v47 }
 0x49b   :  { %v2415_v62 = vadd.f32 %v2414_v7, %v2413_v50  ;;  %v2420_v52 = vadd.f32 %v2419_v38, %v2418_v37  ;;  %v2410_v0 = vadd.f32 %v2409_v55, %v2408_v51  ;;  %v3407_v51 = vld [vmem:[#allocation3 + $0x140] sm:$0xff] }
 0x49c   :  { %v2090_v8 = vpop.permute.xlu1 %2089  ;;  %v2094_v21 = vpop.permute.xlu0 %2093  ;;  %v2425_v23 = vadd.f32 %v2282_v20, %v2281_v45 }
 0x49d   :  { %v2416_v36 = vrot.slane %v2415_v62, 1  ;;  %v2421_v60 = vrot.slane %v2420_v52, 2  ;;  %v2283_v40 = vmul.f32 %v3399_v56, %v2090_v8  ;;  %v2284_v4 = vmul.f32 %v3400_v34, %v2094_v21 }
 0x49e   :  { %v2603_v43 = vsel %vm1801_vm5, %v2410_v0, %v2602_v53  ;;  %v2426_v15 = vrot.slane %v2425_v23, 4  ;;  %v3412_v0 = vld [vmem:[#allocation3 + $0x168] sm:$0xff] }
 0x49f   :  { %v2422_v22 = vadd.f32 %v2421_v60, %v2420_v52  ;;  %v2417_v48 = vadd.f32 %v2416_v36, %v2415_v62  ;;  %v2432_v33 = vadd.f32 %v2284_v4, %v2283_v40  ;;  %v3409_v52 = vld [vmem:[#allocation3 + $0x150] sm:$0xff] }
 0x4a0   :  { %v2101_v31 = vpop.permute.xlu1 %2100  ;;  %v2105_v25 = vpop.permute.xlu0 %2104  ;;  %v2427_v13 = vadd.f32 %v2426_v15, %v2425_v23 }
 0x4a1   :  { %v2285_v14 = vmul.f32 %v3403_v63, %v2101_v31  ;;  %v2286_v49 = vmul.f32 %v3404_v2, %v2105_v25  ;;  %v2423_v46 = vrot.slane %v2422_v22, 1  ;;  %v2604_v19 = vsel %vm1803_vm6, %v2417_v48, %v2603_v43 }
 0x4a2   :  { %v2433_v26 = vrot.slane %v2432_v33, 4  ;;  %v2428_v11 = vrot.slane %v2427_v13, 2 }
 0x4a3   :  { %v2424_v18 = vadd.f32 %v2423_v46, %v2422_v22  ;;  %v2439_v42 = vadd.f32 %v2286_v49, %v2285_v14  ;;  %v3413_v49 = vld [vmem:[#allocation3 + $0x170] sm:$0xff]  ;;  %v3414_v46 = vld [vmem:[#allocation3 + $0x178] sm:$0xff] }
 0x4a4   :  { %v2112_v39 = vpop.permute.xlu1 %2111  ;;  %v2116_v9 = vpop.permute.xlu0 %2115  ;;  %v2434_v12 = vadd.f32 %v2433_v26, %v2432_v33  ;;  %v2429_v31 = vadd.f32 %v2428_v11, %v2427_v13 }
 0x4a5   :  { %v2287_v3 = vmul.f32 %v3405_v61, %v2112_v39  ;;  %v2288_v35 = vmul.f32 %v3406_v41, %v2116_v9  ;;  %v2605_v6 = vsel %vm1805_vm7, %v2424_v18, %v2604_v19  ;;  %v2440_v30 = vrot.slane %v2439_v42, 4 }
 0x4a6   :  { %2855 = vmatmul.mubr.f32.vlgmr.msra.gmra.mrb[62].mxu1 %v2605_v6  ;;  %v2435_v21 = vrot.slane %v2434_v12, 2  ;;  %v2430_v9 = vrot.slane %v2429_v31, 1  ;;  %v3415_v6 = vld [vmem:[#allocation3 + $0x1f0] sm:$0xff] }
 0x4a7   :  { %v2446_v1 = vadd.f32 %v2288_v35, %v2287_v3  ;;  %v2441_v38 = vadd.f32 %v2440_v30, %v2439_v42  ;;  %v3416_v30 = vld [vmem:[#allocation3 + $0x1f8] sm:$0xff] }
 0x4a8   :  { %v2123_v17 = vpop.permute.xlu1 %2122  ;;  %v2127_v50 = vpop.permute.xlu0 %2126  ;;  %v2436_v5 = vadd.f32 %v2435_v21, %v2434_v12  ;;  %v2431_v12 = vadd.f32 %v2430_v9, %v2429_v31 }
 0x4a9   :  { %v2289_v37 = vmul.f32 %v3407_v51, %v2123_v17  ;;  %v2290_v27 = vmul.f32 %v3408_v10, %v2127_v50  ;;  %v2447_v54 = vrot.slane %v2446_v1, 4  ;;  %v2442_v60 = vrot.slane %v2441_v38, 2 }
 0x4aa   :  { %v2437_v53 = vrot.slane %v2436_v5, 1 }
 0x4ab   :  { %v2453_v7 = vadd.f32 %v2290_v27, %v2289_v37  ;;  %v2448_v59 = vadd.f32 %v2447_v54, %v2446_v1  ;;  %v2443_v25 = vadd.f32 %v2442_v60, %v2441_v38 }
 0x4ac   :  { %v2134_v57 = vpop.permute.xlu1 %2133  ;;  %v2138_v62 = vpop.permute.xlu0 %2137  ;;  %v2438_v17 = vadd.f32 %v2437_v53, %v2436_v5  ;;  %v2801_v5 = vld [vmem:[%s4740_s7] ss:$0 sm:$0xff] }
 0x4ad   :  { %v2454_v55 = vrot.slane %v2453_v7, 4  ;;  %v2291_v8 = vmul.f32 %v3409_v52, %v2134_v57  ;;  %v2292_v58 = vmul.f32 %v3410_v44, %v2138_v62  ;;  %v2449_v56 = vrot.slane %v2448_v59, 2 }
 0x4ae   :  { %v2444_v43 = vrot.slane %v2443_v25, 1  ;;  %v2606_v62 = vsel %vm1793_vm1, %v2438_v17, %v2431_v12 }
 0x4af   :  { %v2455_v36 = vadd.f32 %v2454_v55, %v2453_v7  ;;  %v2460_v40 = vadd.f32 %v2292_v58, %v2291_v8  ;;  %v2450_v24 = vadd.f32 %v2449_v56, %v2448_v59 }
 0x4b0   :  { %v2145_v34 = vpop.permute.xlu1 %2144  ;;  %v2149_v4 = vpop.permute.xlu0 %2148  ;;  %v2445_v54 = vadd.f32 %v2444_v43, %v2443_v25 }
 0x4b1   :  { %v2293_v28 = vmul.f32 %v3411_v16, %v2145_v34  ;;  %v2294_v22 = vmul.f32 %v3412_v0, %v2149_v4  ;;  %v2456_v45 = vrot.slane %v2455_v36, 2  ;;  %v2461_v32 = vrot.slane %v2460_v40, 4 }
 0x4b2   :  { %v2451_v61 = vrot.slane %v2450_v24, 1  ;;  %v2607_v44 = vsel %vm1795_vm2, %v2445_v54, %v2606_v62 }
 0x4b3   :  { %v2467_v20 = vadd.f32 %v2294_v22, %v2293_v28  ;;  %v2462_v48 = vadd.f32 %v2461_v32, %v2460_v40  ;;  %v2457_v18 = vadd.f32 %v2456_v45, %v2455_v36 }
 0x4b4   :  { %v2156_v63 = vpop.permute.xlu1 %2155  ;;  %v2160_v14 = vpop.permute.xlu0 %2159  ;;  %v2452_v7 = vadd.f32 %v2451_v61, %v2450_v24 }
 0x4b5   :  { %v2468_v2 = vrot.slane %v2467_v20, 4  ;;  %v2295_v47 = vmul.f32 %v3413_v49, %v2156_v63  ;;  %v2296_v33 = vmul.f32 %v3414_v46, %v2160_v14  ;;  %v2463_v23 = vrot.slane %v2462_v48, 2 }
 0x4b6   :  { %v2458_v50 = vrot.slane %v2457_v18, 1  ;;  %v2608_v11 = vsel %vm1797_vm3, %v2452_v7, %v2607_v44 }
 0x4b7   :  { %v2469_v42 = vadd.f32 %v2468_v2, %v2467_v20  ;;  %v2474_v39 = vadd.f32 %v2296_v33, %v2295_v47  ;;  %v2464_v3 = vadd.f32 %v2463_v23, %v2462_v48 }
 0x4b8   :  { %v2244_v19 = vpop.permute.xlu1 %2243  ;;  %v2248_v26 = vpop.permute.xlu0 %2247  ;;  %v2459_v57 = vadd.f32 %v2458_v50, %v2457_v18 }
 0x4b9   :  { %v2470_v41 = vrot.slane %v2469_v42, 2  ;;  %v2475_v35 = vrot.slane %v2474_v39, 4  ;;  %v2311_v15 = vmul.f32 %v3415_v6, %v2244_v19  ;;  %v2312_v1 = vmul.f32 %v3416_v30, %v2248_v26 }
 0x4ba   :  { %v2465_v51 = vrot.slane %v2464_v3, 1  ;;  %v2609_v60 = vsel %vm1799_vm4, %v2459_v57, %v2608_v11 }
 0x4bb   :  { %v2471_v37 = vadd.f32 %v2470_v41, %v2469_v42  ;;  %v2476_v10 = vadd.f32 %v2475_v35, %v2474_v39  ;;  %v2530_v27 = vadd.f32 %v2312_v1, %v2311_v15 }
 0x4bc   :  { %v2466_v55 = vadd.f32 %v2465_v51, %v2464_v3 }
 0x4bd   :  { %v2472_v13 = vrot.slane %v2471_v37, 1  ;;  %v2477_v38 = vrot.slane %v2476_v10, 2  ;;  %v2531_v59 = vrot.slane %v2530_v27, 4 }
 0x4be   :  { %v2610_v34 = vsel %vm1801_vm5, %v2466_v55, %v2609_v60 }
 0x4bf   :  { %v2478_v52 = vadd.f32 %v2477_v38, %v2476_v10  ;;  %v2532_v8 = vadd.f32 %v2531_v59, %v2530_v27  ;;  %v2473_v21 = vadd.f32 %v2472_v13, %v2471_v37 }
 0x4c1   :  { %v2533_v58 = vrot.slane %v2532_v8, 2  ;;  %v2479_v36 = vrot.slane %v2478_v52, 1  ;;  %v2611_v4 = vsel %vm1803_vm6, %v2473_v21, %v2610_v34 }
 0x4c3   :  { %v2534_v56 = vadd.f32 %v2533_v58, %v2532_v8  ;;  %v2480_v40 = vadd.f32 %v2479_v36, %v2478_v52 }
 0x4c5   :  { %v2612_v16 = vsel %vm1805_vm7, %v2480_v40, %v2611_v4  ;;  %v2535_v28 = vrot.slane %v2534_v56, 1 }
 0x4c6   :  { %2857 = vmatprep.mubr.f32.mxu1 %v2612_v16 }
 0x4c7   :  { %v2536_v0 = vadd.f32 %v2535_v28, %v2534_v56 }
 0x4c9   :  { %v2619_v22 = vsel %vm1805_vm7, %v2536_v0, %v4697_v29 }
 0x4ca   :  { %2858 = vmatmul.mubr.f32.gmra.mrb[64].mxu1 %v2619_v22 }
 0x579   :  { %v2856_v45 = vpop.f32.mrb[62].mxu1 }
 0x57a   :  { %v2696_v32 = vadd.f32 %v2856_v45, %v2801_v5  ;;  %v2690_v20 = vpop.f32.mrb[63].mxu1 }
 0x57b   :  { %v2691_v31 = vadd.f32 %v2801_v5, %v2690_v20 }
 0x57c   :  { %2710 = vst [vmem:[#allocation9 + $0x8] sm:$0xff] %v2696_v32 }
 0x57d   :  { %2709 = vst [vmem:[#allocation9] sm:$0xff] %v2691_v31 }
 0x59d   :  { %v2859_v25 = vpop.f32.mrb[64].mxu1 }
 0x59e   :  { %v2706_v24 = vadd.f32 %v2859_v25, %v2801_v5  ;;  %v2700_v48 = vpop.f32.mrb[65].mxu1 }
 0x59f   :  { %v2701_v63 = vadd.f32 %v2801_v5, %v2700_v48 }
 0x5a0   :  { %2712 = vst [vmem:[#allocation9 + $0x18] sm:$0xff] %v2706_v24 }
 0x5a1   :  { %2711 = vst [vmem:[#allocation9 + $0x10] sm:$0xff] %v2701_v63 }
 0x5a2   :  { %3494 = shalt.err (!%p3491_p0)
}
 0x5a3   :  { %s3495_s26 = scalar_lea.hbm %s4741_s8, 512 }
 0x5a4   :  { %p3496_p1 = scmp.ne.s32.totalorder %s4741_s8, %s3495_s26  ;;  %p3499_p2 = scmp.lt.u32.totalorder %s3495_s26, %s4741_s8 }
 0x5a6   :  { %p3501_p3 = pnand %p3499_p2, %p3496_p1 }
 0x5a8   :  { %3504 = shalt.err (!%p3501_p3)
}
 0x5a9   :  { %2724 = dma.vmem_to_hbm [thread:$0]  %s2719_s0, 512, %s4741_s8, [#allocation5], %s3515_s2, %s3515_s2, %s3516_s12  }
 0x5aa   :  { %3509 = dma.done.wait [#allocation5], 512  }
 0x5ab   :  { %3510 = vsyncadd [#allocation5], 4294966784 }
 0x5ac   :  { %2732 = vsyncpa [#allocation4], 1 }
 0x5ad   :  { %2733 = vsyncpa [#allocation7], 1 }
 0x5ae   :  { %2734 = vsyncpa [#allocation5], 1 }

</bundles_post_ra>
